<compile_context>
chip_gen: v7x
topology: tpu7x:2x2x1
jax: 0.10.0
libtpu: 0.0.40
codegen_flags: <defaults>
</compile_context>

<pallas_src>
import functools

import numpy as np
import jax
import jax.numpy as jnp
from jax.experimental import pallas as pl
from jax.experimental.pallas import tpu as pltpu

# ---------------- hyper-parameters consistent with the module ----------------
VOCAB = 50
VOCAB_PAD = 128        # pad tied output projection to a lane-dense 128 columns
D_MODEL = 32           # == embedding_size
D_FF = 64
N_LAYER = 2
N_HEAD = 4
D_K = 8
D_V = 8
PAD_IDX = 0
SCALE_EMB = True
EPS = 1e-6

B = 2                  # batch
T_CAP = 9              # caption length before the [:, :-1] trim  -> T = 8
S_IMG = 49             # 7x7 image-feature tokens
C_FEAT = 2048          # image_feature_projection input width


# =========================== fused Pallas kernel =============================
def _captioner_kernel(feat_ref, pw_ref, pb_ref,
                      emb_ref, pos_ref, mask_ref, dg_ref, db_ref,
                      s_wqkv_ref, s_wo_ref, s_lng_ref, s_lnb_ref,
                      c_wqkv_ref, c_wo_ref, c_lng_ref, c_lnb_ref,
                      w1_ref, b1_ref, w2_ref, b2_ref, f_lng_ref, f_lnb_ref,
                      outw_ref, logits_ref,
                      *, n_layer, n_head, d_k, d_v, eps, scale):
    """Whole CaptioningTransformer forward for one batch element."""
    inv_sqrt_dk = 1.0 / (float(d_k) ** 0.5)
    n_qk = n_head * d_k

    def layer_norm(y, g, b):
        mu = jnp.mean(y, axis=-1, keepdims=True)
        var = jnp.mean(jnp.square(y - mu), axis=-1, keepdims=True)
        return (y - mu) * jax.lax.rsqrt(var + eps) * g + b

    def mha(q_in, kv_in, wqkv, wo, g, b, m, fused_qkv):
        if fused_qkv:
            # self-attention: single fused QKV matmul
            qkv = jnp.dot(q_in, wqkv, preferred_element_type=jnp.float32)
            q = qkv[:, :n_qk] * inv_sqrt_dk          # fold 1/sqrt(dk) into q
            kv = qkv[:, n_qk:]
        else:
            q = jnp.dot(q_in, wqkv[:, :n_qk],
                        preferred_element_type=jnp.float32) * inv_sqrt_dk
            kv = jnp.dot(kv_in, wqkv[:, n_qk:],
                         preferred_element_type=jnp.float32)
        k = kv[:, :n_qk]
        v = kv[:, n_qk:]

        out = None
        for h in range(n_head):                       # fully unrolled heads
            qh = q[:, h * d_k:(h + 1) * d_k]
            kh = k[:, h * d_k:(h + 1) * d_k]
            vh = v[:, h * d_v:(h + 1) * d_v]
            s = jax.lax.dot_general(qh, kh, (((1,), (1,)), ((), ())),
                                    preferred_element_type=jnp.float32)
            if m is not None:
                s = jnp.where(m == 0, -1e9, s)
            s = s - jnp.max(s, axis=-1, keepdims=True)
            p = jnp.exp(s)
            p = p * pl.reciprocal(jnp.sum(p, axis=-1, keepdims=True),
                                  approx=True)
            oh = jnp.dot(p, vh, preferred_element_type=jnp.float32)
            # concat-free output projection: sum_h oh @ wo[h*dv:(h+1)*dv, :]
            term = jnp.dot(oh, wo[h * d_v:(h + 1) * d_v, :],
                           preferred_element_type=jnp.float32)
            out = term if out is None else out + term

        return layer_norm(out + q_in, g, b)

    # ---- image_feature_projection + ReLU (this batch's (S, C) slab) --------
    enc = jnp.maximum(
        jnp.dot(feat_ref[0], pw_ref[...], preferred_element_type=jnp.float32)
        + pb_ref[...], 0.0)                                       # (S, D) f32

    # ---- decoder prologue: emb * sqrt(d_model) + pos-enc, LayerNorm --------
    mask = mask_ref[0]                                            # (T, T) i32
    x = emb_ref[0] * scale + pos_ref[0]
    x = layer_norm(x, dg_ref[...], db_ref[...])

    # ---- decoder layers (unrolled; weights stacked on leading L axis) ------
    s_wqkv = s_wqkv_ref[...]; s_wo = s_wo_ref[...]
    s_lng = s_lng_ref[...];   s_lnb = s_lnb_ref[...]
    c_wqkv = c_wqkv_ref[...]; c_wo = c_wo_ref[...]
    c_lng = c_lng_ref[...];   c_lnb = c_lnb_ref[...]
    w1 = w1_ref[...]; b1 = b1_ref[...]
    w2 = w2_ref[...]; b2 = b2_ref[...]
    f_lng = f_lng_ref[...]; f_lnb = f_lnb_ref[...]

    for l in range(n_layer):
        # masked self-attention
        x = mha(x, x, s_wqkv[l], s_wo[l], s_lng[l], s_lnb[l], mask, True)
        # encoder-decoder attention (mask=None in the reference module)
        x = mha(x, enc, c_wqkv[l], c_wo[l], c_lng[l], c_lnb[l], None, False)
        # position-wise feed-forward
        h1 = jnp.maximum(
            jnp.dot(x, w1[l], preferred_element_type=jnp.float32) + b1[l], 0.0)
        h2 = jnp.dot(h1, w2[l], preferred_element_type=jnp.float32) + b2[l]
        x = layer_norm(h2 + x, f_lng[l], f_lnb[l])

    # ---- tied output projection (lane-dense 128-column store) --------------
    logits_ref[0] = jnp.dot(x, outw_ref[...],
                            preferred_element_type=jnp.float32)


def pallas_captioner(feat_bf, proj_w_bf, proj_b, emb, pos, mask,
                     dln_g, dln_b, st, out_w_pad):
    """Single fused pallas_call over grid=(B,)."""
    Bq, S, C = feat_bf.shape
    T = emb.shape[1]
    D = D_MODEL
    L = N_LAYER

    cmap2 = lambda b: (0, 0)
    cmap3 = lambda b: (0, 0, 0)
    bmap3 = lambda b: (b, 0, 0)

    kernel = functools.partial(
        _captioner_kernel, n_layer=L, n_head=N_HEAD, d_k=D_K, d_v=D_V,
        eps=EPS, scale=(float(D_MODEL) ** 0.5 if SCALE_EMB else 1.0))

    return pl.pallas_call(
        kernel,
        out_shape=jax.ShapeDtypeStruct((Bq, T, VOCAB_PAD), jnp.float32),
        grid=(Bq,),
        in_specs=[
            pl.BlockSpec((1, S, C), bmap3),                     # features (bf16)
            pl.BlockSpec((C, D), cmap2),                        # proj_w   (bf16)
            pl.BlockSpec((1, D), cmap2),                        # proj_b
            pl.BlockSpec((1, T, D), bmap3),                     # token embeddings
            pl.BlockSpec((1, T, D), cmap3),                     # pos table
            pl.BlockSpec((1, T, T), bmap3),                     # self-attn mask
            pl.BlockSpec((1, D), cmap2),                        # dec ln gamma
            pl.BlockSpec((1, D), cmap2),                        # dec ln beta
            pl.BlockSpec((L, D, 3 * N_HEAD * D_K), cmap3),      # self wqkv
            pl.BlockSpec((L, N_HEAD * D_V, D), cmap3),          # self wo
            pl.BlockSpec((L, 1, D), cmap3),                     # self ln g
            pl.BlockSpec((L, 1, D), cmap3),                     # self ln b
            pl.BlockSpec((L, D, 3 * N_HEAD * D_K), cmap3),      # cross wqkv
            pl.BlockSpec((L, N_HEAD * D_V, D), cmap3),          # cross wo
            pl.BlockSpec((L, 1, D), cmap3),                     # cross ln g
            pl.BlockSpec((L, 1, D), cmap3),                     # cross ln b
            pl.BlockSpec((L, D, D_FF), cmap3),                  # ffn w1
            pl.BlockSpec((L, 1, D_FF), cmap3),                  # ffn b1
            pl.BlockSpec((L, D_FF, D), cmap3),                  # ffn w2
            pl.BlockSpec((L, 1, D), cmap3),                     # ffn b2
            pl.BlockSpec((L, 1, D), cmap3),                     # ffn ln g
            pl.BlockSpec((L, 1, D), cmap3),                     # ffn ln b
            pl.BlockSpec((D, VOCAB_PAD), cmap2),                # tied out proj
        ],
        out_specs=pl.BlockSpec((1, T, VOCAB_PAD), bmap3),
        compiler_params=pltpu.CompilerParams(
            dimension_semantics=("parallel",)),   # v7x: 2 TCs split the batch
    )(feat_bf, proj_w_bf, proj_b, emb, pos, mask, dln_g, dln_b,
      st["s_wqkv"], st["s_wo"], st["s_lng"], st["s_lnb"],
      st["c_wqkv"], st["c_wo"], st["c_lng"], st["c_lnb"],
      st["w1"], st["b1"], st["w2"], st["b2"], st["f_lng"], st["f_lnb"],
      out_w_pad)


# ============================ forward (pallas) ================================
@jax.jit
def pallas_forward(params, features, captions):
    # dropout layers are identity (eval / inference semantics).
    captions = captions[:, :-1]
    Bq, T = captions.shape

    # get_pad_mask & get_subsequent_mask -> (B, T, T) int32 (cheap XLA glue)
    pad = (captions != PAD_IDX)
    sub = jnp.tril(jnp.ones((T, T), dtype=bool))
    self_mask = (pad[:, None, :] & sub[None, :, :]).astype(jnp.int32)
    # cross-attention mask is None in the module -> no mask tensor at all.

    # embedding gather (XLA glue); scale/pos/LN happen inside the kernel.
    emb = params["emb"][captions]                               # (B, T, D)
    pos = params["pos_table"][:T].reshape(1, T, D_MODEL)

    logits_pad = pallas_captioner(
        features.astype(jnp.bfloat16),                          # halve DMA bytes
        params["proj_w"].astype(jnp.bfloat16),
        params["proj_b"].reshape(1, D_MODEL),
        emb, pos, self_mask,
        params["dec_ln_g"].reshape(1, D_MODEL),
        params["dec_ln_b"].reshape(1, D_MODEL),
        params["stacked"], params["out_w_pad"])

    return logits_pad.reshape(Bq * T, VOCAB_PAD)[:, :VOCAB]     # (B*T, VOCAB)


# ======================== pure-JAX reference ==================================
def _ln_ref(x, g, b):
    mu = jnp.mean(x, axis=-1, keepdims=True)
    var = jnp.mean(jnp.square(x - mu), axis=-1, keepdims=True)
    return (x - mu) * jax.lax.rsqrt(var + EPS) * g + b


def _mha_ref(q_in, kv_in, wqkv, wo, g, b, mask):
    Bq, Lq, D = q_in.shape
    Lk = kv_in.shape[1]
    n_qk = N_HEAD * D_K
    q = (q_in @ wqkv[:, :n_qk]).reshape(Bq, Lq, N_HEAD, D_K).transpose(0, 2, 1, 3)
    kv = kv_in @ wqkv[:, n_qk:]
    k = kv[..., :n_qk].reshape(Bq, Lk, N_HEAD, D_K).transpose(0, 2, 1, 3)
    v = kv[..., n_qk:].reshape(Bq, Lk, N_HEAD, D_V).transpose(0, 2, 1, 3)
    s = jnp.einsum("bhqd,bhkd->bhqk", q, k) / (D_K ** 0.5)
    if mask is not None:
        s = jnp.where(mask[:, None, :, :] == 0, -1e9, s)
    p = jax.nn.softmax(s, axis=-1)
    o = jnp.einsum("bhqk,bhkd->bhqd", p, v).transpose(0, 2, 1, 3)
    o = o.reshape(Bq, Lq, N_HEAD * D_V)
    return _ln_ref(o @ wo + q_in, g, b)


def reference_forward(params, features, captions):
    captions = captions[:, :-1]
    Bq, T = captions.shape
    S, C = features.shape[1], features.shape[2]

    feat = jnp.dot(features.reshape(Bq * S, C).astype(jnp.bfloat16),
                   params["proj_w"].astype(jnp.bfloat16),
                   preferred_element_type=jnp.float32) + params["proj_b"]
    enc = jnp.maximum(feat, 0.0).reshape(Bq, S, D_MODEL)

    pad = (captions != PAD_IDX)
    sub = jnp.tril(jnp.ones((T, T), dtype=bool))
    mask = (pad[:, None, :] & sub[None, :, :]).astype(jnp.int32)

    emb = params["emb"][captions]
    if SCALE_EMB:
        emb = emb * (D_MODEL ** 0.5)
    emb = emb + params["pos_table"][:T][None, :, :]
    x = _ln_ref(emb, params["dec_ln_g"], params["dec_ln_b"])

    for lp in params["layers"]:
        x = _mha_ref(x, x, lp["s_wqkv"], lp["s_wo"], lp["s_lng"], lp["s_lnb"], mask)
        x = _mha_ref(x, enc, lp["c_wqkv"], lp["c_wo"], lp["c_lng"], lp["c_lnb"], None)
        h = jnp.maximum(x @ lp["w1"] + lp["b1"], 0.0)
        h = h @ lp["w2"] + lp["b2"]
        x = _ln_ref(h + x, lp["f_lng"], lp["f_lnb"])

    return x.reshape(Bq * T, D_MODEL) @ params["emb"].T        # (B*T, VOCAB)


# ============================ parameter init ==================================
def make_pos_table(d_model, max_pos=100):
    pos = np.arange(max_pos)[:, None].astype(np.float64)
    i = np.arange(d_model)[None, :]
    angle = pos / np.power(10000.0, 2 * (i // 2) / np.float32(d_model))
    angle[:, 0::2] = np.sin(angle[:, 0::2])
    angle[:, 1::2] = np.cos(angle[:, 1::2])
    return angle.astype(np.float32)


def init_params(key):
    keys = iter(jax.random.split(key, 64))

    def xavier(shape):
        a = float(np.sqrt(6.0 / (shape[0] + shape[1])))
        return jax.random.uniform(next(keys), shape, jnp.float32, -a, a)

    def mha_params(prefix):
        return {
            f"{prefix}_wqkv": xavier((D_MODEL, 3 * N_HEAD * D_K)),   # [Wq|Wk|Wv]
            f"{prefix}_wo": xavier((N_HEAD * D_V, D_MODEL)),
            f"{prefix}_lng": jnp.ones((D_MODEL,), jnp.float32),
            f"{prefix}_lnb": jnp.zeros((D_MODEL,), jnp.float32),
        }

    layers = []
    for _ in range(N_LAYER):
        lp = {}
        lp.update(mha_params("s"))
        lp.update(mha_params("c"))
        lp.update({
            "w1": xavier((D_MODEL, D_FF)),
            "b1": jnp.zeros((D_FF,), jnp.float32),
            "w2": xavier((D_FF, D_MODEL)),
            "b2": jnp.zeros((D_MODEL,), jnp.float32),
            "f_lng": jnp.ones((D_MODEL,), jnp.float32),
            "f_lnb": jnp.zeros((D_MODEL,), jnp.float32),
        })
        layers.append(lp)

    # per-layer weights stacked on a leading N_LAYER axis for the fused kernel
    def stack(name, add_row=False):
        arrs = [lp[name] for lp in layers]
        if add_row:
            arrs = [a.reshape(1, -1) for a in arrs]
        return jnp.stack(arrs, axis=0)

    stacked = {
        "s_wqkv": stack("s_wqkv"), "s_wo": stack("s_wo"),
        "s_lng": stack("s_lng", True), "s_lnb": stack("s_lnb", True),
        "c_wqkv": stack("c_wqkv"), "c_wo": stack("c_wo"),
        "c_lng": stack("c_lng", True), "c_lnb": stack("c_lnb", True),
        "w1": stack("w1"), "b1": stack("b1", True),
        "w2": stack("w2"), "b2": stack("b2", True),
        "f_lng": stack("f_lng", True), "f_lnb": stack("f_lnb", True),
    }

    emb = xavier((VOCAB, D_MODEL))
    # weight-tied output projection, transposed once and zero-padded to 128
    # columns (lane-dense store); the padded columns are sliced off post-kernel.
    out_w_pad = jnp.zeros((D_MODEL, VOCAB_PAD), jnp.float32).at[:, :VOCAB].set(emb.T)

    return {
        "emb": emb,
        "out_w_pad": out_w_pad,
        "proj_w": xavier((C_FEAT, D_MODEL)),
        "proj_b": jnp.zeros((D_MODEL,), jnp.float32),
        "dec_ln_g": jnp.ones((D_MODEL,), jnp.float32),
        "dec_ln_b": jnp.zeros((D_MODEL,), jnp.float32),
        "pos_table": jnp.asarray(make_pos_table(D_MODEL, 100)),
        "layers": layers,
        "stacked": stacked,
    }


# ================================ main ========================================
if __name__ == "__main__":
    key = jax.random.PRNGKey(0)
    kp, kf, kc = jax.random.split(key, 3)

    params = init_params(kp)
    # TODO(synk): the ResNet34 FeatureExtractor is upstream of this forward;
    # we feed its (B, 49, 2048) output directly, as CaptioningTransformer.forward does.
    features = jax.random.normal(kf, (B, S_IMG, C_FEAT), jnp.float32)
    captions = jax.random.randint(kc, (B, T_CAP), 0, VOCAB, dtype=jnp.int32)
    captions = captions.at[:, 0].set(1).at[:, -2:].set(PAD_IDX)  # BOS + trailing pad

    logits = jax.block_until_ready(pallas_forward(params, features, captions))

    # pure-JAX reference of the same forward pass (same bf16 projection math)
    ref = jax.block_until_ready(
        jax.jit(reference_forward)(params, features, captions))

    assert logits.shape == (B * (T_CAP - 1), VOCAB), logits.shape
    assert bool(jnp.all(jnp.isfinite(logits)))
    max_diff = float(jnp.max(jnp.abs(logits - ref)))
    assert max_diff < 5e-2, f"mismatch vs reference: {max_diff}"
    print("KERNEL_OK")
</pallas_src>

<mosaic_0001>
module attributes {stable_mosaic.version = 11 : i64} {
  func.func @_captioner_kernel(%arg0: i32, %arg1: memref<1x49x2048xbf16, #tpu.memory_space<vmem>>, %arg2: memref<2048x32xbf16, #tpu.memory_space<vmem>>, %arg3: memref<1x32xf32, #tpu.memory_space<vmem>>, %arg4: memref<1x8x32xf32, #tpu.memory_space<vmem>>, %arg5: memref<1x8x32xf32, #tpu.memory_space<vmem>>, %arg6: memref<1x8x8xi32, #tpu.memory_space<vmem>>, %arg7: memref<1x32xf32, #tpu.memory_space<vmem>>, %arg8: memref<1x32xf32, #tpu.memory_space<vmem>>, %arg9: memref<2x32x96xf32, #tpu.memory_space<vmem>>, %arg10: memref<2x32x32xf32, #tpu.memory_space<vmem>>, %arg11: memref<2x1x32xf32, #tpu.memory_space<vmem>>, %arg12: memref<2x1x32xf32, #tpu.memory_space<vmem>>, %arg13: memref<2x32x96xf32, #tpu.memory_space<vmem>>, %arg14: memref<2x32x32xf32, #tpu.memory_space<vmem>>, %arg15: memref<2x1x32xf32, #tpu.memory_space<vmem>>, %arg16: memref<2x1x32xf32, #tpu.memory_space<vmem>>, %arg17: memref<2x32x64xf32, #tpu.memory_space<vmem>>, %arg18: memref<2x1x64xf32, #tpu.memory_space<vmem>>, %arg19: memref<2x64x32xf32, #tpu.memory_space<vmem>>, %arg20: memref<2x1x32xf32, #tpu.memory_space<vmem>>, %arg21: memref<2x1x32xf32, #tpu.memory_space<vmem>>, %arg22: memref<2x1x32xf32, #tpu.memory_space<vmem>>, %arg23: memref<32x128xf32, #tpu.memory_space<vmem>>, %arg24: memref<1x8x128xf32, #tpu.memory_space<vmem>>) attributes {dimension_semantics = [#tpu.dimension_semantics<parallel>], iteration_bounds = array<i64: 2>, scalar_prefetch = 0 : i64, scratch_operands = 0 : i64, tpu.core_type = #tpu.core_type<tc>, window_params = [{transform_indices = @transform_0, window_bounds = array<i64: 1, 49, 2048>}, {pipeline_mode = #tpu.pipeline_mode<synchronous>, transform_indices = @transform_1, window_bounds = array<i64: 2048, 32>}, {pipeline_mode = #tpu.pipeline_mode<synchronous>, transform_indices = @transform_2, window_bounds = array<i64: 1, 32>}, {transform_indices = @transform_3, window_bounds = array<i64: 1, 8, 32>}, {pipeline_mode = #tpu.pipeline_mode<synchronous>, transform_indices = @transform_4, window_bounds = array<i64: 1, 8, 32>}, {transform_indices = @transform_5, window_bounds = array<i64: 1, 8, 8>}, {pipeline_mode = #tpu.pipeline_mode<synchronous>, transform_indices = @transform_6, window_bounds = array<i64: 1, 32>}, {pipeline_mode = #tpu.pipeline_mode<synchronous>, transform_indices = @transform_7, window_bounds = array<i64: 1, 32>}, {pipeline_mode = #tpu.pipeline_mode<synchronous>, transform_indices = @transform_8, window_bounds = array<i64: 2, 32, 96>}, {pipeline_mode = #tpu.pipeline_mode<synchronous>, transform_indices = @transform_9, window_bounds = array<i64: 2, 32, 32>}, {pipeline_mode = #tpu.pipeline_mode<synchronous>, transform_indices = @transform_10, window_bounds = array<i64: 2, 1, 32>}, {pipeline_mode = #tpu.pipeline_mode<synchronous>, transform_indices = @transform_11, window_bounds = array<i64: 2, 1, 32>}, {pipeline_mode = #tpu.pipeline_mode<synchronous>, transform_indices = @transform_12, window_bounds = array<i64: 2, 32, 96>}, {pipeline_mode = #tpu.pipeline_mode<synchronous>, transform_indices = @transform_13, window_bounds = array<i64: 2, 32, 32>}, {pipeline_mode = #tpu.pipeline_mode<synchronous>, transform_indices = @transform_14, window_bounds = array<i64: 2, 1, 32>}, {pipeline_mode = #tpu.pipeline_mode<synchronous>, transform_indices = @transform_15, window_bounds = array<i64: 2, 1, 32>}, {pipeline_mode = #tpu.pipeline_mode<synchronous>, transform_indices = @transform_16, window_bounds = array<i64: 2, 32, 64>}, {pipeline_mode = #tpu.pipeline_mode<synchronous>, transform_indices = @transform_17, window_bounds = array<i64: 2, 1, 64>}, {pipeline_mode = #tpu.pipeline_mode<synchronous>, transform_indices = @transform_18, window_bounds = array<i64: 2, 64, 32>}, {pipeline_mode = #tpu.pipeline_mode<synchronous>, transform_indices = @transform_19, window_bounds = array<i64: 2, 1, 32>}, {pipeline_mode = #tpu.pipeline_mode<synchronous>, transform_indices = @transform_20, window_bounds = array<i64: 2, 1, 32>}, {pipeline_mode = #tpu.pipeline_mode<synchronous>, transform_indices = @transform_21, window_bounds = array<i64: 2, 1, 32>}, {pipeline_mode = #tpu.pipeline_mode<synchronous>, transform_indices = @transform_22, window_bounds = array<i64: 32, 128>}, {transform_indices = @transform_23, window_bounds = array<i64: 1, 8, 128>}]} {
    %c0 = arith.constant 0 : index
    %c0_0 = arith.constant 0 : index
    %c0_1 = arith.constant 0 : index
    %0 = vector.load %arg1[%c0, %c0_0, %c0_1] : memref<1x49x2048xbf16, #tpu.memory_space<vmem>>, vector<1x49x2048xbf16>
    %1 = vector.shape_cast %0 : vector<1x49x2048xbf16> to vector<49x2048xbf16>
    %c0_2 = arith.constant 0 : index
    %c0_3 = arith.constant 0 : index
    %2 = vector.load %arg2[%c0_2, %c0_3] : memref<2048x32xbf16, #tpu.memory_space<vmem>>, vector<2048x32xbf16>
    %cst = arith.constant dense<0.000000e+00> : vector<49x32xf32>
    %3 = tpu.matmul %1, %2, %cst {dimension_numbers = #tpu.dot_dimension_numbers<[1], [0], [0], [1], [0, 0, 1, 1], [], []>} : vector<49x2048xbf16>, vector<2048x32xbf16>, vector<49x32xf32> -> vector<49x32xf32>
    %c0_4 = arith.constant 0 : index
    %c0_5 = arith.constant 0 : index
    %4 = vector.load %arg3[%c0_4, %c0_5] : memref<1x32xf32, #tpu.memory_space<vmem>>, vector<1x32xf32>
    %5 = vector.broadcast %4 : vector<1x32xf32> to vector<49x32xf32>
    %6 = arith.addf %3, %5 : vector<49x32xf32>
    %cst_6 = arith.constant 0.000000e+00 : f32
    %7 = vector.broadcast %cst_6 : f32 to vector<49x32xf32>
    %8 = arith.maximumf %6, %7 : vector<49x32xf32>
    %c0_7 = arith.constant 0 : index
    %c0_8 = arith.constant 0 : index
    %c0_9 = arith.constant 0 : index
    %9 = vector.load %arg6[%c0_7, %c0_8, %c0_9] : memref<1x8x8xi32, #tpu.memory_space<vmem>>, vector<1x8x8xi32>
    %10 = vector.shape_cast %9 : vector<1x8x8xi32> to vector<8x8xi32>
    %c0_10 = arith.constant 0 : index
    %c0_11 = arith.constant 0 : index
    %c0_12 = arith.constant 0 : index
    %11 = vector.load %arg4[%c0_10, %c0_11, %c0_12] : memref<1x8x32xf32, #tpu.memory_space<vmem>>, vector<1x8x32xf32>
    %12 = vector.shape_cast %11 : vector<1x8x32xf32> to vector<8x32xf32>
    %cst_13 = arith.constant 5.65685415 : f32
    %13 = vector.broadcast %cst_13 : f32 to vector<8x32xf32>
    %14 = arith.mulf %12, %13 : vector<8x32xf32>
    %c0_14 = arith.constant 0 : index
    %c0_15 = arith.constant 0 : index
    %c0_16 = arith.constant 0 : index
    %15 = vector.load %arg5[%c0_14, %c0_15, %c0_16] : memref<1x8x32xf32, #tpu.memory_space<vmem>>, vector<1x8x32xf32>
    %16 = vector.shape_cast %15 : vector<1x8x32xf32> to vector<8x32xf32>
    %17 = arith.addf %14, %16 : vector<8x32xf32>
    %c0_17 = arith.constant 0 : index
    %c0_18 = arith.constant 0 : index
    %18 = vector.load %arg7[%c0_17, %c0_18] : memref<1x32xf32, #tpu.memory_space<vmem>>, vector<1x32xf32>
    %c0_19 = arith.constant 0 : index
    %c0_20 = arith.constant 0 : index
    %19 = vector.load %arg8[%c0_19, %c0_20] : memref<1x32xf32, #tpu.memory_space<vmem>>, vector<1x32xf32>
    %cst_21 = arith.constant dense<0.000000e+00> : vector<8xf32>
    %20 = vector.multi_reduction <add>, %17, %cst_21 [1] : vector<8x32xf32> to vector<8xf32>
    %21 = vector.shape_cast %20 : vector<8xf32> to vector<8x1xf32>
    %cst_22 = arith.constant 3.200000e+01 : f32
    %22 = vector.broadcast %cst_22 : f32 to vector<8x1xf32>
    %23 = arith.divf %21, %22 : vector<8x1xf32>
    %24 = vector.broadcast %23 : vector<8x1xf32> to vector<8x32xf32>
    %25 = arith.subf %17, %24 : vector<8x32xf32>
    %26 = arith.mulf %25, %25 : vector<8x32xf32>
    %cst_23 = arith.constant dense<0.000000e+00> : vector<8xf32>
    %27 = vector.multi_reduction <add>, %26, %cst_23 [1] : vector<8x32xf32> to vector<8xf32>
    %28 = vector.shape_cast %27 : vector<8xf32> to vector<8x1xf32>
    %cst_24 = arith.constant 3.200000e+01 : f32
    %29 = vector.broadcast %cst_24 : f32 to vector<8x1xf32>
    %30 = arith.divf %28, %29 : vector<8x1xf32>
    %31 = vector.broadcast %23 : vector<8x1xf32> to vector<8x32xf32>
    %32 = arith.subf %17, %31 : vector<8x32xf32>
    %cst_25 = arith.constant 9.99999997E-7 : f32
    %33 = vector.broadcast %cst_25 : f32 to vector<8x1xf32>
    %34 = arith.addf %30, %33 : vector<8x1xf32>
    %35 = math.rsqrt %34 : vector<8x1xf32>
    %36 = vector.broadcast %35 : vector<8x1xf32> to vector<8x32xf32>
    %37 = arith.mulf %32, %36 : vector<8x32xf32>
    %38 = vector.broadcast %18 : vector<1x32xf32> to vector<8x32xf32>
    %39 = arith.mulf %37, %38 : vector<8x32xf32>
    %40 = vector.broadcast %19 : vector<1x32xf32> to vector<8x32xf32>
    %41 = arith.addf %39, %40 : vector<8x32xf32>
    %c0_26 = arith.constant 0 : index
    %c0_27 = arith.constant 0 : index
    %c0_28 = arith.constant 0 : index
    %42 = vector.load %arg9[%c0_26, %c0_27, %c0_28] : memref<2x32x96xf32, #tpu.memory_space<vmem>>, vector<2x32x96xf32>
    %c0_29 = arith.constant 0 : index
    %c0_30 = arith.constant 0 : index
    %c0_31 = arith.constant 0 : index
    %43 = vector.load %arg10[%c0_29, %c0_30, %c0_31] : memref<2x32x32xf32, #tpu.memory_space<vmem>>, vector<2x32x32xf32>
    %c0_32 = arith.constant 0 : index
    %c0_33 = arith.constant 0 : index
    %c0_34 = arith.constant 0 : index
    %44 = vector.load %arg11[%c0_32, %c0_33, %c0_34] : memref<2x1x32xf32, #tpu.memory_space<vmem>>, vector<2x1x32xf32>
    %c0_35 = arith.constant 0 : index
    %c0_36 = arith.constant 0 : index
    %c0_37 = arith.constant 0 : index
    %45 = vector.load %arg12[%c0_35, %c0_36, %c0_37] : memref<2x1x32xf32, #tpu.memory_space<vmem>>, vector<2x1x32xf32>
    %c0_38 = arith.constant 0 : index
    %c0_39 = arith.constant 0 : index
    %c0_40 = arith.constant 0 : index
    %46 = vector.load %arg13[%c0_38, %c0_39, %c0_40] : memref<2x32x96xf32, #tpu.memory_space<vmem>>, vector<2x32x96xf32>
    %c0_41 = arith.constant 0 : index
    %c0_42 = arith.constant 0 : index
    %c0_43 = arith.constant 0 : index
    %47 = vector.load %arg14[%c0_41, %c0_42, %c0_43] : memref<2x32x32xf32, #tpu.memory_space<vmem>>, vector<2x32x32xf32>
    %c0_44 = arith.constant 0 : index
    %c0_45 = arith.constant 0 : index
    %c0_46 = arith.constant 0 : index
    %48 = vector.load %arg15[%c0_44, %c0_45, %c0_46] : memref<2x1x32xf32, #tpu.memory_space<vmem>>, vector<2x1x32xf32>
    %c0_47 = arith.constant 0 : index
    %c0_48 = arith.constant 0 : index
    %c0_49 = arith.constant 0 : index
    %49 = vector.load %arg16[%c0_47, %c0_48, %c0_49] : memref<2x1x32xf32, #tpu.memory_space<vmem>>, vector<2x1x32xf32>
    %c0_50 = arith.constant 0 : index
    %c0_51 = arith.constant 0 : index
    %c0_52 = arith.constant 0 : index
    %50 = vector.load %arg17[%c0_50, %c0_51, %c0_52] : memref<2x32x64xf32, #tpu.memory_space<vmem>>, vector<2x32x64xf32>
    %c0_53 = arith.constant 0 : index
    %c0_54 = arith.constant 0 : index
    %c0_55 = arith.constant 0 : index
    %51 = vector.load %arg18[%c0_53, %c0_54, %c0_55] : memref<2x1x64xf32, #tpu.memory_space<vmem>>, vector<2x1x64xf32>
    %c0_56 = arith.constant 0 : index
    %c0_57 = arith.constant 0 : index
    %c0_58 = arith.constant 0 : index
    %52 = vector.load %arg19[%c0_56, %c0_57, %c0_58] : memref<2x64x32xf32, #tpu.memory_space<vmem>>, vector<2x64x32xf32>
    %c0_59 = arith.constant 0 : index
    %c0_60 = arith.constant 0 : index
    %c0_61 = arith.constant 0 : index
    %53 = vector.load %arg20[%c0_59, %c0_60, %c0_61] : memref<2x1x32xf32, #tpu.memory_space<vmem>>, vector<2x1x32xf32>
    %c0_62 = arith.constant 0 : index
    %c0_63 = arith.constant 0 : index
    %c0_64 = arith.constant 0 : index
    %54 = vector.load %arg21[%c0_62, %c0_63, %c0_64] : memref<2x1x32xf32, #tpu.memory_space<vmem>>, vector<2x1x32xf32>
    %c0_65 = arith.constant 0 : index
    %c0_66 = arith.constant 0 : index
    %c0_67 = arith.constant 0 : index
    %55 = vector.load %arg22[%c0_65, %c0_66, %c0_67] : memref<2x1x32xf32, #tpu.memory_space<vmem>>, vector<2x1x32xf32>
    %56 = vector.extract_strided_slice %42 {offsets = [0, 0, 0], sizes = [1, 32, 96], strides = [1, 1, 1]} : vector<2x32x96xf32> to vector<1x32x96xf32>
    %57 = vector.shape_cast %56 : vector<1x32x96xf32> to vector<32x96xf32>
    %58 = vector.extract_strided_slice %43 {offsets = [0, 0, 0], sizes = [1, 32, 32], strides = [1, 1, 1]} : vector<2x32x32xf32> to vector<1x32x32xf32>
    %59 = vector.shape_cast %58 : vector<1x32x32xf32> to vector<32x32xf32>
    %60 = vector.extract_strided_slice %44 {offsets = [0, 0, 0], sizes = [1, 1, 32], strides = [1, 1, 1]} : vector<2x1x32xf32> to vector<1x1x32xf32>
    %61 = vector.shape_cast %60 : vector<1x1x32xf32> to vector<1x32xf32>
    %62 = vector.extract_strided_slice %45 {offsets = [0, 0, 0], sizes = [1, 1, 32], strides = [1, 1, 1]} : vector<2x1x32xf32> to vector<1x1x32xf32>
    %63 = vector.shape_cast %62 : vector<1x1x32xf32> to vector<1x32xf32>
    %cst_68 = arith.constant dense<0.000000e+00> : vector<8x96xf32>
    %64 = tpu.matmul %41, %57, %cst_68 {dimension_numbers = #tpu.dot_dimension_numbers<[1], [0], [0], [1], [0, 0, 1, 1], [], []>} : vector<8x32xf32>, vector<32x96xf32>, vector<8x96xf32> -> vector<8x96xf32>
    %65 = vector.extract_strided_slice %64 {offsets = [0, 0], sizes = [8, 32], strides = [1, 1]} : vector<8x96xf32> to vector<8x32xf32>
    %cst_69 = arith.constant 0.353553385 : f32
    %66 = vector.broadcast %cst_69 : f32 to vector<8x32xf32>
    %67 = arith.mulf %65, %66 : vector<8x32xf32>
    %68 = vector.extract_strided_slice %64 {offsets = [0, 32], sizes = [8, 64], strides = [1, 1]} : vector<8x96xf32> to vector<8x64xf32>
    %69 = vector.extract_strided_slice %68 {offsets = [0, 0], sizes = [8, 32], strides = [1, 1]} : vector<8x64xf32> to vector<8x32xf32>
    %70 = vector.extract_strided_slice %68 {offsets = [0, 32], sizes = [8, 32], strides = [1, 1]} : vector<8x64xf32> to vector<8x32xf32>
    %71 = vector.extract_strided_slice %67 {offsets = [0, 0], sizes = [8, 8], strides = [1, 1]} : vector<8x32xf32> to vector<8x8xf32>
    %72 = vector.extract_strided_slice %69 {offsets = [0, 0], sizes = [8, 8], strides = [1, 1]} : vector<8x32xf32> to vector<8x8xf32>
    %73 = vector.extract_strided_slice %70 {offsets = [0, 0], sizes = [8, 8], strides = [1, 1]} : vector<8x32xf32> to vector<8x8xf32>
    %cst_70 = arith.constant dense<0.000000e+00> : vector<8x8xf32>
    %74 = tpu.matmul %71, %72, %cst_70 {dimension_numbers = #tpu.dot_dimension_numbers<[1], [1], [0], [0], [0, 0, 1, 0], [], []>} : vector<8x8xf32>, vector<8x8xf32>, vector<8x8xf32> -> vector<8x8xf32>
    %c0_i32 = arith.constant 0 : i32
    %75 = vector.broadcast %c0_i32 : i32 to vector<8x8xi32>
    %76 = arith.cmpi eq, %10, %75 : vector<8x8xi32>
    %cst_71 = arith.constant -1.000000e+09 : f32
    %77 = vector.broadcast %cst_71 : f32 to vector<8x8xf32>
    %78 = arith.select %76, %77, %74 : vector<8x8xi1>, vector<8x8xf32>
    %cst_72 = arith.constant dense<0xFF800000> : vector<8xf32>
    %79 = vector.multi_reduction <maximumf>, %78, %cst_72 [1] : vector<8x8xf32> to vector<8xf32>
    %80 = vector.shape_cast %79 : vector<8xf32> to vector<8x1xf32>
    %81 = vector.broadcast %80 : vector<8x1xf32> to vector<8x8xf32>
    %82 = arith.subf %78, %81 : vector<8x8xf32>
    %83 = math.exp %82 : vector<8x8xf32>
    %cst_73 = arith.constant dense<0.000000e+00> : vector<8xf32>
    %84 = vector.multi_reduction <add>, %83, %cst_73 [1] : vector<8x8xf32> to vector<8xf32>
    %85 = vector.shape_cast %84 : vector<8xf32> to vector<8x1xf32>
    %86 = tpu.reciprocal %85 {approx = true} : vector<8x1xf32> -> vector<8x1xf32>
    %87 = vector.broadcast %86 : vector<8x1xf32> to vector<8x8xf32>
    %88 = arith.mulf %83, %87 : vector<8x8xf32>
    %cst_74 = arith.constant dense<0.000000e+00> : vector<8x8xf32>
    %89 = tpu.matmul %88, %73, %cst_74 {dimension_numbers = #tpu.dot_dimension_numbers<[1], [0], [0], [1], [0, 0, 1, 1], [], []>} : vector<8x8xf32>, vector<8x8xf32>, vector<8x8xf32> -> vector<8x8xf32>
    %90 = vector.extract_strided_slice %59 {offsets = [0, 0], sizes = [8, 32], strides = [1, 1]} : vector<32x32xf32> to vector<8x32xf32>
    %cst_75 = arith.constant dense<0.000000e+00> : vector<8x32xf32>
    %91 = tpu.matmul %89, %90, %cst_75 {dimension_numbers = #tpu.dot_dimension_numbers<[1], [0], [0], [1], [0, 0, 1, 1], [], []>} : vector<8x8xf32>, vector<8x32xf32>, vector<8x32xf32> -> vector<8x32xf32>
    %92 = vector.extract_strided_slice %67 {offsets = [0, 8], sizes = [8, 8], strides = [1, 1]} : vector<8x32xf32> to vector<8x8xf32>
    %93 = vector.extract_strided_slice %69 {offsets = [0, 8], sizes = [8, 8], strides = [1, 1]} : vector<8x32xf32> to vector<8x8xf32>
    %94 = vector.extract_strided_slice %70 {offsets = [0, 8], sizes = [8, 8], strides = [1, 1]} : vector<8x32xf32> to vector<8x8xf32>
    %cst_76 = arith.constant dense<0.000000e+00> : vector<8x8xf32>
    %95 = tpu.matmul %92, %93, %cst_76 {dimension_numbers = #tpu.dot_dimension_numbers<[1], [1], [0], [0], [0, 0, 1, 0], [], []>} : vector<8x8xf32>, vector<8x8xf32>, vector<8x8xf32> -> vector<8x8xf32>
    %c0_i32_77 = arith.constant 0 : i32
    %96 = vector.broadcast %c0_i32_77 : i32 to vector<8x8xi32>
    %97 = arith.cmpi eq, %10, %96 : vector<8x8xi32>
    %cst_78 = arith.constant -1.000000e+09 : f32
    %98 = vector.broadcast %cst_78 : f32 to vector<8x8xf32>
    %99 = arith.select %97, %98, %95 : vector<8x8xi1>, vector<8x8xf32>
    %cst_79 = arith.constant dense<0xFF800000> : vector<8xf32>
    %100 = vector.multi_reduction <maximumf>, %99, %cst_79 [1] : vector<8x8xf32> to vector<8xf32>
    %101 = vector.shape_cast %100 : vector<8xf32> to vector<8x1xf32>
    %102 = vector.broadcast %101 : vector<8x1xf32> to vector<8x8xf32>
    %103 = arith.subf %99, %102 : vector<8x8xf32>
    %104 = math.exp %103 : vector<8x8xf32>
    %cst_80 = arith.constant dense<0.000000e+00> : vector<8xf32>
    %105 = vector.multi_reduction <add>, %104, %cst_80 [1] : vector<8x8xf32> to vector<8xf32>
    %106 = vector.shape_cast %105 : vector<8xf32> to vector<8x1xf32>
    %107 = tpu.reciprocal %106 {approx = true} : vector<8x1xf32> -> vector<8x1xf32>
    %108 = vector.broadcast %107 : vector<8x1xf32> to vector<8x8xf32>
    %109 = arith.mulf %104, %108 : vector<8x8xf32>
    %cst_81 = arith.constant dense<0.000000e+00> : vector<8x8xf32>
    %110 = tpu.matmul %109, %94, %cst_81 {dimension_numbers = #tpu.dot_dimension_numbers<[1], [0], [0], [1], [0, 0, 1, 1], [], []>} : vector<8x8xf32>, vector<8x8xf32>, vector<8x8xf32> -> vector<8x8xf32>
    %111 = vector.extract_strided_slice %59 {offsets = [8, 0], sizes = [8, 32], strides = [1, 1]} : vector<32x32xf32> to vector<8x32xf32>
    %cst_82 = arith.constant dense<0.000000e+00> : vector<8x32xf32>
    %112 = tpu.matmul %110, %111, %cst_82 {dimension_numbers = #tpu.dot_dimension_numbers<[1], [0], [0], [1], [0, 0, 1, 1], [], []>} : vector<8x8xf32>, vector<8x32xf32>, vector<8x32xf32> -> vector<8x32xf32>
    %113 = arith.addf %91, %112 : vector<8x32xf32>
    %114 = vector.extract_strided_slice %67 {offsets = [0, 16], sizes = [8, 8], strides = [1, 1]} : vector<8x32xf32> to vector<8x8xf32>
    %115 = vector.extract_strided_slice %69 {offsets = [0, 16], sizes = [8, 8], strides = [1, 1]} : vector<8x32xf32> to vector<8x8xf32>
    %116 = vector.extract_strided_slice %70 {offsets = [0, 16], sizes = [8, 8], strides = [1, 1]} : vector<8x32xf32> to vector<8x8xf32>
    %cst_83 = arith.constant dense<0.000000e+00> : vector<8x8xf32>
    %117 = tpu.matmul %114, %115, %cst_83 {dimension_numbers = #tpu.dot_dimension_numbers<[1], [1], [0], [0], [0, 0, 1, 0], [], []>} : vector<8x8xf32>, vector<8x8xf32>, vector<8x8xf32> -> vector<8x8xf32>
    %c0_i32_84 = arith.constant 0 : i32
    %118 = vector.broadcast %c0_i32_84 : i32 to vector<8x8xi32>
    %119 = arith.cmpi eq, %10, %118 : vector<8x8xi32>
    %cst_85 = arith.constant -1.000000e+09 : f32
    %120 = vector.broadcast %cst_85 : f32 to vector<8x8xf32>
    %121 = arith.select %119, %120, %117 : vector<8x8xi1>, vector<8x8xf32>
    %cst_86 = arith.constant dense<0xFF800000> : vector<8xf32>
    %122 = vector.multi_reduction <maximumf>, %121, %cst_86 [1] : vector<8x8xf32> to vector<8xf32>
    %123 = vector.shape_cast %122 : vector<8xf32> to vector<8x1xf32>
    %124 = vector.broadcast %123 : vector<8x1xf32> to vector<8x8xf32>
    %125 = arith.subf %121, %124 : vector<8x8xf32>
    %126 = math.exp %125 : vector<8x8xf32>
    %cst_87 = arith.constant dense<0.000000e+00> : vector<8xf32>
    %127 = vector.multi_reduction <add>, %126, %cst_87 [1] : vector<8x8xf32> to vector<8xf32>
    %128 = vector.shape_cast %127 : vector<8xf32> to vector<8x1xf32>
    %129 = tpu.reciprocal %128 {approx = true} : vector<8x1xf32> -> vector<8x1xf32>
    %130 = vector.broadcast %129 : vector<8x1xf32> to vector<8x8xf32>
    %131 = arith.mulf %126, %130 : vector<8x8xf32>
    %cst_88 = arith.constant dense<0.000000e+00> : vector<8x8xf32>
    %132 = tpu.matmul %131, %116, %cst_88 {dimension_numbers = #tpu.dot_dimension_numbers<[1], [0], [0], [1], [0, 0, 1, 1], [], []>} : vector<8x8xf32>, vector<8x8xf32>, vector<8x8xf32> -> vector<8x8xf32>
    %133 = vector.extract_strided_slice %59 {offsets = [16, 0], sizes = [8, 32], strides = [1, 1]} : vector<32x32xf32> to vector<8x32xf32>
    %cst_89 = arith.constant dense<0.000000e+00> : vector<8x32xf32>
    %134 = tpu.matmul %132, %133, %cst_89 {dimension_numbers = #tpu.dot_dimension_numbers<[1], [0], [0], [1], [0, 0, 1, 1], [], []>} : vector<8x8xf32>, vector<8x32xf32>, vector<8x32xf32> -> vector<8x32xf32>
    %135 = arith.addf %113, %134 : vector<8x32xf32>
    %136 = vector.extract_strided_slice %67 {offsets = [0, 24], sizes = [8, 8], strides = [1, 1]} : vector<8x32xf32> to vector<8x8xf32>
    %137 = vector.extract_strided_slice %69 {offsets = [0, 24], sizes = [8, 8], strides = [1, 1]} : vector<8x32xf32> to vector<8x8xf32>
    %138 = vector.extract_strided_slice %70 {offsets = [0, 24], sizes = [8, 8], strides = [1, 1]} : vector<8x32xf32> to vector<8x8xf32>
    %cst_90 = arith.constant dense<0.000000e+00> : vector<8x8xf32>
    %139 = tpu.matmul %136, %137, %cst_90 {dimension_numbers = #tpu.dot_dimension_numbers<[1], [1], [0], [0], [0, 0, 1, 0], [], []>} : vector<8x8xf32>, vector<8x8xf32>, vector<8x8xf32> -> vector<8x8xf32>
    %c0_i32_91 = arith.constant 0 : i32
    %140 = vector.broadcast %c0_i32_91 : i32 to vector<8x8xi32>
    %141 = arith.cmpi eq, %10, %140 : vector<8x8xi32>
    %cst_92 = arith.constant -1.000000e+09 : f32
    %142 = vector.broadcast %cst_92 : f32 to vector<8x8xf32>
    %143 = arith.select %141, %142, %139 : vector<8x8xi1>, vector<8x8xf32>
    %cst_93 = arith.constant dense<0xFF800000> : vector<8xf32>
    %144 = vector.multi_reduction <maximumf>, %143, %cst_93 [1] : vector<8x8xf32> to vector<8xf32>
    %145 = vector.shape_cast %144 : vector<8xf32> to vector<8x1xf32>
    %146 = vector.broadcast %145 : vector<8x1xf32> to vector<8x8xf32>
    %147 = arith.subf %143, %146 : vector<8x8xf32>
    %148 = math.exp %147 : vector<8x8xf32>
    %cst_94 = arith.constant dense<0.000000e+00> : vector<8xf32>
    %149 = vector.multi_reduction <add>, %148, %cst_94 [1] : vector<8x8xf32> to vector<8xf32>
    %150 = vector.shape_cast %149 : vector<8xf32> to vector<8x1xf32>
    %151 = tpu.reciprocal %150 {approx = true} : vector<8x1xf32> -> vector<8x1xf32>
    %152 = vector.broadcast %151 : vector<8x1xf32> to vector<8x8xf32>
    %153 = arith.mulf %148, %152 : vector<8x8xf32>
    %cst_95 = arith.constant dense<0.000000e+00> : vector<8x8xf32>
    %154 = tpu.matmul %153, %138, %cst_95 {dimension_numbers = #tpu.dot_dimension_numbers<[1], [0], [0], [1], [0, 0, 1, 1], [], []>} : vector<8x8xf32>, vector<8x8xf32>, vector<8x8xf32> -> vector<8x8xf32>
    %155 = vector.extract_strided_slice %59 {offsets = [24, 0], sizes = [8, 32], strides = [1, 1]} : vector<32x32xf32> to vector<8x32xf32>
    %cst_96 = arith.constant dense<0.000000e+00> : vector<8x32xf32>
    %156 = tpu.matmul %154, %155, %cst_96 {dimension_numbers = #tpu.dot_dimension_numbers<[1], [0], [0], [1], [0, 0, 1, 1], [], []>} : vector<8x8xf32>, vector<8x32xf32>, vector<8x32xf32> -> vector<8x32xf32>
    %157 = arith.addf %135, %156 : vector<8x32xf32>
    %158 = arith.addf %157, %41 : vector<8x32xf32>
    %cst_97 = arith.constant dense<0.000000e+00> : vector<8xf32>
    %159 = vector.multi_reduction <add>, %158, %cst_97 [1] : vector<8x32xf32> to vector<8xf32>
    %160 = vector.shape_cast %159 : vector<8xf32> to vector<8x1xf32>
    %cst_98 = arith.constant 3.200000e+01 : f32
    %161 = vector.broadcast %cst_98 : f32 to vector<8x1xf32>
    %162 = arith.divf %160, %161 : vector<8x1xf32>
    %163 = vector.broadcast %162 : vector<8x1xf32> to vector<8x32xf32>
    %164 = arith.subf %158, %163 : vector<8x32xf32>
    %165 = arith.mulf %164, %164 : vector<8x32xf32>
    %cst_99 = arith.constant dense<0.000000e+00> : vector<8xf32>
    %166 = vector.multi_reduction <add>, %165, %cst_99 [1] : vector<8x32xf32> to vector<8xf32>
    %167 = vector.shape_cast %166 : vector<8xf32> to vector<8x1xf32>
    %cst_100 = arith.constant 3.200000e+01 : f32
    %168 = vector.broadcast %cst_100 : f32 to vector<8x1xf32>
    %169 = arith.divf %167, %168 : vector<8x1xf32>
    %170 = vector.broadcast %162 : vector<8x1xf32> to vector<8x32xf32>
    %171 = arith.subf %158, %170 : vector<8x32xf32>
    %cst_101 = arith.constant 9.99999997E-7 : f32
    %172 = vector.broadcast %cst_101 : f32 to vector<8x1xf32>
    %173 = arith.addf %169, %172 : vector<8x1xf32>
    %174 = math.rsqrt %173 : vector<8x1xf32>
    %175 = vector.broadcast %174 : vector<8x1xf32> to vector<8x32xf32>
    %176 = arith.mulf %171, %175 : vector<8x32xf32>
    %177 = vector.broadcast %61 : vector<1x32xf32> to vector<8x32xf32>
    %178 = arith.mulf %176, %177 : vector<8x32xf32>
    %179 = vector.broadcast %63 : vector<1x32xf32> to vector<8x32xf32>
    %180 = arith.addf %178, %179 : vector<8x32xf32>
    %181 = vector.extract_strided_slice %46 {offsets = [0, 0, 0], sizes = [1, 32, 96], strides = [1, 1, 1]} : vector<2x32x96xf32> to vector<1x32x96xf32>
    %182 = vector.shape_cast %181 : vector<1x32x96xf32> to vector<32x96xf32>
    %183 = vector.extract_strided_slice %47 {offsets = [0, 0, 0], sizes = [1, 32, 32], strides = [1, 1, 1]} : vector<2x32x32xf32> to vector<1x32x32xf32>
    %184 = vector.shape_cast %183 : vector<1x32x32xf32> to vector<32x32xf32>
    %185 = vector.extract_strided_slice %48 {offsets = [0, 0, 0], sizes = [1, 1, 32], strides = [1, 1, 1]} : vector<2x1x32xf32> to vector<1x1x32xf32>
    %186 = vector.shape_cast %185 : vector<1x1x32xf32> to vector<1x32xf32>
    %187 = vector.extract_strided_slice %49 {offsets = [0, 0, 0], sizes = [1, 1, 32], strides = [1, 1, 1]} : vector<2x1x32xf32> to vector<1x1x32xf32>
    %188 = vector.shape_cast %187 : vector<1x1x32xf32> to vector<1x32xf32>
    %189 = vector.extract_strided_slice %182 {offsets = [0, 0], sizes = [32, 32], strides = [1, 1]} : vector<32x96xf32> to vector<32x32xf32>
    %cst_102 = arith.constant dense<0.000000e+00> : vector<8x32xf32>
    %190 = tpu.matmul %180, %189, %cst_102 {dimension_numbers = #tpu.dot_dimension_numbers<[1], [0], [0], [1], [0, 0, 1, 1], [], []>} : vector<8x32xf32>, vector<32x32xf32>, vector<8x32xf32> -> vector<8x32xf32>
    %cst_103 = arith.constant 0.353553385 : f32
    %191 = vector.broadcast %cst_103 : f32 to vector<8x32xf32>
    %192 = arith.mulf %190, %191 : vector<8x32xf32>
    %193 = vector.extract_strided_slice %182 {offsets = [0, 32], sizes = [32, 64], strides = [1, 1]} : vector<32x96xf32> to vector<32x64xf32>
    %cst_104 = arith.constant dense<0.000000e+00> : vector<49x64xf32>
    %194 = tpu.matmul %8, %193, %cst_104 {dimension_numbers = #tpu.dot_dimension_numbers<[1], [0], [0], [1], [0, 0, 1, 1], [], []>} : vector<49x32xf32>, vector<32x64xf32>, vector<49x64xf32> -> vector<49x64xf32>
    %195 = vector.extract_strided_slice %194 {offsets = [0, 0], sizes = [49, 32], strides = [1, 1]} : vector<49x64xf32> to vector<49x32xf32>
    %196 = vector.extract_strided_slice %194 {offsets = [0, 32], sizes = [49, 32], strides = [1, 1]} : vector<49x64xf32> to vector<49x32xf32>
    %197 = vector.extract_strided_slice %192 {offsets = [0, 0], sizes = [8, 8], strides = [1, 1]} : vector<8x32xf32> to vector<8x8xf32>
    %198 = vector.extract_strided_slice %195 {offsets = [0, 0], sizes = [49, 8], strides = [1, 1]} : vector<49x32xf32> to vector<49x8xf32>
    %199 = vector.extract_strided_slice %196 {offsets = [0, 0], sizes = [49, 8], strides = [1, 1]} : vector<49x32xf32> to vector<49x8xf32>
    %cst_105 = arith.constant dense<0.000000e+00> : vector<8x49xf32>
    %200 = tpu.matmul %197, %198, %cst_105 {dimension_numbers = #tpu.dot_dimension_numbers<[1], [1], [0], [0], [0, 0, 1, 0], [], []>} : vector<8x8xf32>, vector<49x8xf32>, vector<8x49xf32> -> vector<8x49xf32>
    %cst_106 = arith.constant dense<0xFF800000> : vector<8xf32>
    %201 = vector.multi_reduction <maximumf>, %200, %cst_106 [1] : vector<8x49xf32> to vector<8xf32>
    %202 = vector.shape_cast %201 : vector<8xf32> to vector<8x1xf32>
    %203 = vector.broadcast %202 : vector<8x1xf32> to vector<8x49xf32>
    %204 = arith.subf %200, %203 : vector<8x49xf32>
    %205 = math.exp %204 : vector<8x49xf32>
    %cst_107 = arith.constant dense<0.000000e+00> : vector<8xf32>
    %206 = vector.multi_reduction <add>, %205, %cst_107 [1] : vector<8x49xf32> to vector<8xf32>
    %207 = vector.shape_cast %206 : vector<8xf32> to vector<8x1xf32>
    %208 = tpu.reciprocal %207 {approx = true} : vector<8x1xf32> -> vector<8x1xf32>
    %209 = vector.broadcast %208 : vector<8x1xf32> to vector<8x49xf32>
    %210 = arith.mulf %205, %209 : vector<8x49xf32>
    %cst_108 = arith.constant dense<0.000000e+00> : vector<8x8xf32>
    %211 = tpu.matmul %210, %199, %cst_108 {dimension_numbers = #tpu.dot_dimension_numbers<[1], [0], [0], [1], [0, 0, 1, 1], [], []>} : vector<8x49xf32>, vector<49x8xf32>, vector<8x8xf32> -> vector<8x8xf32>
    %212 = vector.extract_strided_slice %184 {offsets = [0, 0], sizes = [8, 32], strides = [1, 1]} : vector<32x32xf32> to vector<8x32xf32>
    %cst_109 = arith.constant dense<0.000000e+00> : vector<8x32xf32>
    %213 = tpu.matmul %211, %212, %cst_109 {dimension_numbers = #tpu.dot_dimension_numbers<[1], [0], [0], [1], [0, 0, 1, 1], [], []>} : vector<8x8xf32>, vector<8x32xf32>, vector<8x32xf32> -> vector<8x32xf32>
    %214 = vector.extract_strided_slice %192 {offsets = [0, 8], sizes = [8, 8], strides = [1, 1]} : vector<8x32xf32> to vector<8x8xf32>
    %215 = vector.extract_strided_slice %195 {offsets = [0, 8], sizes = [49, 8], strides = [1, 1]} : vector<49x32xf32> to vector<49x8xf32>
    %216 = vector.extract_strided_slice %196 {offsets = [0, 8], sizes = [49, 8], strides = [1, 1]} : vector<49x32xf32> to vector<49x8xf32>
    %cst_110 = arith.constant dense<0.000000e+00> : vector<8x49xf32>
    %217 = tpu.matmul %214, %215, %cst_110 {dimension_numbers = #tpu.dot_dimension_numbers<[1], [1], [0], [0], [0, 0, 1, 0], [], []>} : vector<8x8xf32>, vector<49x8xf32>, vector<8x49xf32> -> vector<8x49xf32>
    %cst_111 = arith.constant dense<0xFF800000> : vector<8xf32>
    %218 = vector.multi_reduction <maximumf>, %217, %cst_111 [1] : vector<8x49xf32> to vector<8xf32>
    %219 = vector.shape_cast %218 : vector<8xf32> to vector<8x1xf32>
    %220 = vector.broadcast %219 : vector<8x1xf32> to vector<8x49xf32>
    %221 = arith.subf %217, %220 : vector<8x49xf32>
    %222 = math.exp %221 : vector<8x49xf32>
    %cst_112 = arith.constant dense<0.000000e+00> : vector<8xf32>
    %223 = vector.multi_reduction <add>, %222, %cst_112 [1] : vector<8x49xf32> to vector<8xf32>
    %224 = vector.shape_cast %223 : vector<8xf32> to vector<8x1xf32>
    %225 = tpu.reciprocal %224 {approx = true} : vector<8x1xf32> -> vector<8x1xf32>
    %226 = vector.broadcast %225 : vector<8x1xf32> to vector<8x49xf32>
    %227 = arith.mulf %222, %226 : vector<8x49xf32>
    %cst_113 = arith.constant dense<0.000000e+00> : vector<8x8xf32>
    %228 = tpu.matmul %227, %216, %cst_113 {dimension_numbers = #tpu.dot_dimension_numbers<[1], [0], [0], [1], [0, 0, 1, 1], [], []>} : vector<8x49xf32>, vector<49x8xf32>, vector<8x8xf32> -> vector<8x8xf32>
    %229 = vector.extract_strided_slice %184 {offsets = [8, 0], sizes = [8, 32], strides = [1, 1]} : vector<32x32xf32> to vector<8x32xf32>
    %cst_114 = arith.constant dense<0.000000e+00> : vector<8x32xf32>
    %230 = tpu.matmul %228, %229, %cst_114 {dimension_numbers = #tpu.dot_dimension_numbers<[1], [0], [0], [1], [0, 0, 1, 1], [], []>} : vector<8x8xf32>, vector<8x32xf32>, vector<8x32xf32> -> vector<8x32xf32>
    %231 = arith.addf %213, %230 : vector<8x32xf32>
    %232 = vector.extract_strided_slice %192 {offsets = [0, 16], sizes = [8, 8], strides = [1, 1]} : vector<8x32xf32> to vector<8x8xf32>
    %233 = vector.extract_strided_slice %195 {offsets = [0, 16], sizes = [49, 8], strides = [1, 1]} : vector<49x32xf32> to vector<49x8xf32>
    %234 = vector.extract_strided_slice %196 {offsets = [0, 16], sizes = [49, 8], strides = [1, 1]} : vector<49x32xf32> to vector<49x8xf32>
    %cst_115 = arith.constant dense<0.000000e+00> : vector<8x49xf32>
    %235 = tpu.matmul %232, %233, %cst_115 {dimension_numbers = #tpu.dot_dimension_numbers<[1], [1], [0], [0], [0, 0, 1, 0], [], []>} : vector<8x8xf32>, vector<49x8xf32>, vector<8x49xf32> -> vector<8x49xf32>
    %cst_116 = arith.constant dense<0xFF800000> : vector<8xf32>
    %236 = vector.multi_reduction <maximumf>, %235, %cst_116 [1] : vector<8x49xf32> to vector<8xf32>
    %237 = vector.shape_cast %236 : vector<8xf32> to vector<8x1xf32>
    %238 = vector.broadcast %237 : vector<8x1xf32> to vector<8x49xf32>
    %239 = arith.subf %235, %238 : vector<8x49xf32>
    %240 = math.exp %239 : vector<8x49xf32>
    %cst_117 = arith.constant dense<0.000000e+00> : vector<8xf32>
    %241 = vector.multi_reduction <add>, %240, %cst_117 [1] : vector<8x49xf32> to vector<8xf32>
    %242 = vector.shape_cast %241 : vector<8xf32> to vector<8x1xf32>
    %243 = tpu.reciprocal %242 {approx = true} : vector<8x1xf32> -> vector<8x1xf32>
    %244 = vector.broadcast %243 : vector<8x1xf32> to vector<8x49xf32>
    %245 = arith.mulf %240, %244 : vector<8x49xf32>
    %cst_118 = arith.constant dense<0.000000e+00> : vector<8x8xf32>
    %246 = tpu.matmul %245, %234, %cst_118 {dimension_numbers = #tpu.dot_dimension_numbers<[1], [0], [0], [1], [0, 0, 1, 1], [], []>} : vector<8x49xf32>, vector<49x8xf32>, vector<8x8xf32> -> vector<8x8xf32>
    %247 = vector.extract_strided_slice %184 {offsets = [16, 0], sizes = [8, 32], strides = [1, 1]} : vector<32x32xf32> to vector<8x32xf32>
    %cst_119 = arith.constant dense<0.000000e+00> : vector<8x32xf32>
    %248 = tpu.matmul %246, %247, %cst_119 {dimension_numbers = #tpu.dot_dimension_numbers<[1], [0], [0], [1], [0, 0, 1, 1], [], []>} : vector<8x8xf32>, vector<8x32xf32>, vector<8x32xf32> -> vector<8x32xf32>
    %249 = arith.addf %231, %248 : vector<8x32xf32>
    %250 = vector.extract_strided_slice %192 {offsets = [0, 24], sizes = [8, 8], strides = [1, 1]} : vector<8x32xf32> to vector<8x8xf32>
    %251 = vector.extract_strided_slice %195 {offsets = [0, 24], sizes = [49, 8], strides = [1, 1]} : vector<49x32xf32> to vector<49x8xf32>
    %252 = vector.extract_strided_slice %196 {offsets = [0, 24], sizes = [49, 8], strides = [1, 1]} : vector<49x32xf32> to vector<49x8xf32>
    %cst_120 = arith.constant dense<0.000000e+00> : vector<8x49xf32>
    %253 = tpu.matmul %250, %251, %cst_120 {dimension_numbers = #tpu.dot_dimension_numbers<[1], [1], [0], [0], [0, 0, 1, 0], [], []>} : vector<8x8xf32>, vector<49x8xf32>, vector<8x49xf32> -> vector<8x49xf32>
    %cst_121 = arith.constant dense<0xFF800000> : vector<8xf32>
    %254 = vector.multi_reduction <maximumf>, %253, %cst_121 [1] : vector<8x49xf32> to vector<8xf32>
    %255 = vector.shape_cast %254 : vector<8xf32> to vector<8x1xf32>
    %256 = vector.broadcast %255 : vector<8x1xf32> to vector<8x49xf32>
    %257 = arith.subf %253, %256 : vector<8x49xf32>
    %258 = math.exp %257 : vector<8x49xf32>
    %cst_122 = arith.constant dense<0.000000e+00> : vector<8xf32>
    %259 = vector.multi_reduction <add>, %258, %cst_122 [1] : vector<8x49xf32> to vector<8xf32>
    %260 = vector.shape_cast %259 : vector<8xf32> to vector<8x1xf32>
    %261 = tpu.reciprocal %260 {approx = true} : vector<8x1xf32> -> vector<8x1xf32>
    %262 = vector.broadcast %261 : vector<8x1xf32> to vector<8x49xf32>
    %263 = arith.mulf %258, %262 : vector<8x49xf32>
    %cst_123 = arith.constant dense<0.000000e+00> : vector<8x8xf32>
    %264 = tpu.matmul %263, %252, %cst_123 {dimension_numbers = #tpu.dot_dimension_numbers<[1], [0], [0], [1], [0, 0, 1, 1], [], []>} : vector<8x49xf32>, vector<49x8xf32>, vector<8x8xf32> -> vector<8x8xf32>
    %265 = vector.extract_strided_slice %184 {offsets = [24, 0], sizes = [8, 32], strides = [1, 1]} : vector<32x32xf32> to vector<8x32xf32>
    %cst_124 = arith.constant dense<0.000000e+00> : vector<8x32xf32>
    %266 = tpu.matmul %264, %265, %cst_124 {dimension_numbers = #tpu.dot_dimension_numbers<[1], [0], [0], [1], [0, 0, 1, 1], [], []>} : vector<8x8xf32>, vector<8x32xf32>, vector<8x32xf32> -> vector<8x32xf32>
    %267 = arith.addf %249, %266 : vector<8x32xf32>
    %268 = arith.addf %267, %180 : vector<8x32xf32>
    %cst_125 = arith.constant dense<0.000000e+00> : vector<8xf32>
    %269 = vector.multi_reduction <add>, %268, %cst_125 [1] : vector<8x32xf32> to vector<8xf32>
    %270 = vector.shape_cast %269 : vector<8xf32> to vector<8x1xf32>
    %cst_126 = arith.constant 3.200000e+01 : f32
    %271 = vector.broadcast %cst_126 : f32 to vector<8x1xf32>
    %272 = arith.divf %270, %271 : vector<8x1xf32>
    %273 = vector.broadcast %272 : vector<8x1xf32> to vector<8x32xf32>
    %274 = arith.subf %268, %273 : vector<8x32xf32>
    %275 = arith.mulf %274, %274 : vector<8x32xf32>
    %cst_127 = arith.constant dense<0.000000e+00> : vector<8xf32>
    %276 = vector.multi_reduction <add>, %275, %cst_127 [1] : vector<8x32xf32> to vector<8xf32>
    %277 = vector.shape_cast %276 : vector<8xf32> to vector<8x1xf32>
    %cst_128 = arith.constant 3.200000e+01 : f32
    %278 = vector.broadcast %cst_128 : f32 to vector<8x1xf32>
    %279 = arith.divf %277, %278 : vector<8x1xf32>
    %280 = vector.broadcast %272 : vector<8x1xf32> to vector<8x32xf32>
    %281 = arith.subf %268, %280 : vector<8x32xf32>
    %cst_129 = arith.constant 9.99999997E-7 : f32
    %282 = vector.broadcast %cst_129 : f32 to vector<8x1xf32>
    %283 = arith.addf %279, %282 : vector<8x1xf32>
    %284 = math.rsqrt %283 : vector<8x1xf32>
    %285 = vector.broadcast %284 : vector<8x1xf32> to vector<8x32xf32>
    %286 = arith.mulf %281, %285 : vector<8x32xf32>
    %287 = vector.broadcast %186 : vector<1x32xf32> to vector<8x32xf32>
    %288 = arith.mulf %286, %287 : vector<8x32xf32>
    %289 = vector.broadcast %188 : vector<1x32xf32> to vector<8x32xf32>
    %290 = arith.addf %288, %289 : vector<8x32xf32>
    %291 = vector.extract_strided_slice %50 {offsets = [0, 0, 0], sizes = [1, 32, 64], strides = [1, 1, 1]} : vector<2x32x64xf32> to vector<1x32x64xf32>
    %292 = vector.shape_cast %291 : vector<1x32x64xf32> to vector<32x64xf32>
    %cst_130 = arith.constant dense<0.000000e+00> : vector<8x64xf32>
    %293 = tpu.matmul %290, %292, %cst_130 {dimension_numbers = #tpu.dot_dimension_numbers<[1], [0], [0], [1], [0, 0, 1, 1], [], []>} : vector<8x32xf32>, vector<32x64xf32>, vector<8x64xf32> -> vector<8x64xf32>
    %294 = vector.extract_strided_slice %51 {offsets = [0, 0, 0], sizes = [1, 1, 64], strides = [1, 1, 1]} : vector<2x1x64xf32> to vector<1x1x64xf32>
    %295 = vector.shape_cast %294 : vector<1x1x64xf32> to vector<1x64xf32>
    %296 = vector.broadcast %295 : vector<1x64xf32> to vector<8x64xf32>
    %297 = arith.addf %293, %296 : vector<8x64xf32>
    %cst_131 = arith.constant 0.000000e+00 : f32
    %298 = vector.broadcast %cst_131 : f32 to vector<8x64xf32>
    %299 = arith.maximumf %297, %298 : vector<8x64xf32>
    %300 = vector.extract_strided_slice %52 {offsets = [0, 0, 0], sizes = [1, 64, 32], strides = [1, 1, 1]} : vector<2x64x32xf32> to vector<1x64x32xf32>
    %301 = vector.shape_cast %300 : vector<1x64x32xf32> to vector<64x32xf32>
    %cst_132 = arith.constant dense<0.000000e+00> : vector<8x32xf32>
    %302 = tpu.matmul %299, %301, %cst_132 {dimension_numbers = #tpu.dot_dimension_numbers<[1], [0], [0], [1], [0, 0, 1, 1], [], []>} : vector<8x64xf32>, vector<64x32xf32>, vector<8x32xf32> -> vector<8x32xf32>
    %303 = vector.extract_strided_slice %53 {offsets = [0, 0, 0], sizes = [1, 1, 32], strides = [1, 1, 1]} : vector<2x1x32xf32> to vector<1x1x32xf32>
    %304 = vector.shape_cast %303 : vector<1x1x32xf32> to vector<1x32xf32>
    %305 = vector.broadcast %304 : vector<1x32xf32> to vector<8x32xf32>
    %306 = arith.addf %302, %305 : vector<8x32xf32>
    %307 = arith.addf %306, %290 : vector<8x32xf32>
    %308 = vector.extract_strided_slice %54 {offsets = [0, 0, 0], sizes = [1, 1, 32], strides = [1, 1, 1]} : vector<2x1x32xf32> to vector<1x1x32xf32>
    %309 = vector.shape_cast %308 : vector<1x1x32xf32> to vector<1x32xf32>
    %310 = vector.extract_strided_slice %55 {offsets = [0, 0, 0], sizes = [1, 1, 32], strides = [1, 1, 1]} : vector<2x1x32xf32> to vector<1x1x32xf32>
    %311 = vector.shape_cast %310 : vector<1x1x32xf32> to vector<1x32xf32>
    %cst_133 = arith.constant dense<0.000000e+00> : vector<8xf32>
    %312 = vector.multi_reduction <add>, %307, %cst_133 [1] : vector<8x32xf32> to vector<8xf32>
    %313 = vector.shape_cast %312 : vector<8xf32> to vector<8x1xf32>
    %cst_134 = arith.constant 3.200000e+01 : f32
    %314 = vector.broadcast %cst_134 : f32 to vector<8x1xf32>
    %315 = arith.divf %313, %314 : vector<8x1xf32>
    %316 = vector.broadcast %315 : vector<8x1xf32> to vector<8x32xf32>
    %317 = arith.subf %307, %316 : vector<8x32xf32>
    %318 = arith.mulf %317, %317 : vector<8x32xf32>
    %cst_135 = arith.constant dense<0.000000e+00> : vector<8xf32>
    %319 = vector.multi_reduction <add>, %318, %cst_135 [1] : vector<8x32xf32> to vector<8xf32>
    %320 = vector.shape_cast %319 : vector<8xf32> to vector<8x1xf32>
    %cst_136 = arith.constant 3.200000e+01 : f32
    %321 = vector.broadcast %cst_136 : f32 to vector<8x1xf32>
    %322 = arith.divf %320, %321 : vector<8x1xf32>
    %323 = vector.broadcast %315 : vector<8x1xf32> to vector<8x32xf32>
    %324 = arith.subf %307, %323 : vector<8x32xf32>
    %cst_137 = arith.constant 9.99999997E-7 : f32
    %325 = vector.broadcast %cst_137 : f32 to vector<8x1xf32>
    %326 = arith.addf %322, %325 : vector<8x1xf32>
    %327 = math.rsqrt %326 : vector<8x1xf32>
    %328 = vector.broadcast %327 : vector<8x1xf32> to vector<8x32xf32>
    %329 = arith.mulf %324, %328 : vector<8x32xf32>
    %330 = vector.broadcast %309 : vector<1x32xf32> to vector<8x32xf32>
    %331 = arith.mulf %329, %330 : vector<8x32xf32>
    %332 = vector.broadcast %311 : vector<1x32xf32> to vector<8x32xf32>
    %333 = arith.addf %331, %332 : vector<8x32xf32>
    %334 = vector.extract_strided_slice %42 {offsets = [1, 0, 0], sizes = [1, 32, 96], strides = [1, 1, 1]} : vector<2x32x96xf32> to vector<1x32x96xf32>
    %335 = vector.shape_cast %334 : vector<1x32x96xf32> to vector<32x96xf32>
    %336 = vector.extract_strided_slice %43 {offsets = [1, 0, 0], sizes = [1, 32, 32], strides = [1, 1, 1]} : vector<2x32x32xf32> to vector<1x32x32xf32>
    %337 = vector.shape_cast %336 : vector<1x32x32xf32> to vector<32x32xf32>
    %338 = vector.extract_strided_slice %44 {offsets = [1, 0, 0], sizes = [1, 1, 32], strides = [1, 1, 1]} : vector<2x1x32xf32> to vector<1x1x32xf32>
    %339 = vector.shape_cast %338 : vector<1x1x32xf32> to vector<1x32xf32>
    %340 = vector.extract_strided_slice %45 {offsets = [1, 0, 0], sizes = [1, 1, 32], strides = [1, 1, 1]} : vector<2x1x32xf32> to vector<1x1x32xf32>
    %341 = vector.shape_cast %340 : vector<1x1x32xf32> to vector<1x32xf32>
    %cst_138 = arith.constant dense<0.000000e+00> : vector<8x96xf32>
    %342 = tpu.matmul %333, %335, %cst_138 {dimension_numbers = #tpu.dot_dimension_numbers<[1], [0], [0], [1], [0, 0, 1, 1], [], []>} : vector<8x32xf32>, vector<32x96xf32>, vector<8x96xf32> -> vector<8x96xf32>
    %343 = vector.extract_strided_slice %342 {offsets = [0, 0], sizes = [8, 32], strides = [1, 1]} : vector<8x96xf32> to vector<8x32xf32>
    %cst_139 = arith.constant 0.353553385 : f32
    %344 = vector.broadcast %cst_139 : f32 to vector<8x32xf32>
    %345 = arith.mulf %343, %344 : vector<8x32xf32>
    %346 = vector.extract_strided_slice %342 {offsets = [0, 32], sizes = [8, 64], strides = [1, 1]} : vector<8x96xf32> to vector<8x64xf32>
    %347 = vector.extract_strided_slice %346 {offsets = [0, 0], sizes = [8, 32], strides = [1, 1]} : vector<8x64xf32> to vector<8x32xf32>
    %348 = vector.extract_strided_slice %346 {offsets = [0, 32], sizes = [8, 32], strides = [1, 1]} : vector<8x64xf32> to vector<8x32xf32>
    %349 = vector.extract_strided_slice %345 {offsets = [0, 0], sizes = [8, 8], strides = [1, 1]} : vector<8x32xf32> to vector<8x8xf32>
    %350 = vector.extract_strided_slice %347 {offsets = [0, 0], sizes = [8, 8], strides = [1, 1]} : vector<8x32xf32> to vector<8x8xf32>
    %351 = vector.extract_strided_slice %348 {offsets = [0, 0], sizes = [8, 8], strides = [1, 1]} : vector<8x32xf32> to vector<8x8xf32>
    %cst_140 = arith.constant dense<0.000000e+00> : vector<8x8xf32>
    %352 = tpu.matmul %349, %350, %cst_140 {dimension_numbers = #tpu.dot_dimension_numbers<[1], [1], [0], [0], [0, 0, 1, 0], [], []>} : vector<8x8xf32>, vector<8x8xf32>, vector<8x8xf32> -> vector<8x8xf32>
    %c0_i32_141 = arith.constant 0 : i32
    %353 = vector.broadcast %c0_i32_141 : i32 to vector<8x8xi32>
    %354 = arith.cmpi eq, %10, %353 : vector<8x8xi32>
    %cst_142 = arith.constant -1.000000e+09 : f32
    %355 = vector.broadcast %cst_142 : f32 to vector<8x8xf32>
    %356 = arith.select %354, %355, %352 : vector<8x8xi1>, vector<8x8xf32>
    %cst_143 = arith.constant dense<0xFF800000> : vector<8xf32>
    %357 = vector.multi_reduction <maximumf>, %356, %cst_143 [1] : vector<8x8xf32> to vector<8xf32>
    %358 = vector.shape_cast %357 : vector<8xf32> to vector<8x1xf32>
    %359 = vector.broadcast %358 : vector<8x1xf32> to vector<8x8xf32>
    %360 = arith.subf %356, %359 : vector<8x8xf32>
    %361 = math.exp %360 : vector<8x8xf32>
    %cst_144 = arith.constant dense<0.000000e+00> : vector<8xf32>
    %362 = vector.multi_reduction <add>, %361, %cst_144 [1] : vector<8x8xf32> to vector<8xf32>
    %363 = vector.shape_cast %362 : vector<8xf32> to vector<8x1xf32>
    %364 = tpu.reciprocal %363 {approx = true} : vector<8x1xf32> -> vector<8x1xf32>
    %365 = vector.broadcast %364 : vector<8x1xf32> to vector<8x8xf32>
    %366 = arith.mulf %361, %365 : vector<8x8xf32>
    %cst_145 = arith.constant dense<0.000000e+00> : vector<8x8xf32>
    %367 = tpu.matmul %366, %351, %cst_145 {dimension_numbers = #tpu.dot_dimension_numbers<[1], [0], [0], [1], [0, 0, 1, 1], [], []>} : vector<8x8xf32>, vector<8x8xf32>, vector<8x8xf32> -> vector<8x8xf32>
    %368 = vector.extract_strided_slice %337 {offsets = [0, 0], sizes = [8, 32], strides = [1, 1]} : vector<32x32xf32> to vector<8x32xf32>
    %cst_146 = arith.constant dense<0.000000e+00> : vector<8x32xf32>
    %369 = tpu.matmul %367, %368, %cst_146 {dimension_numbers = #tpu.dot_dimension_numbers<[1], [0], [0], [1], [0, 0, 1, 1], [], []>} : vector<8x8xf32>, vector<8x32xf32>, vector<8x32xf32> -> vector<8x32xf32>
    %370 = vector.extract_strided_slice %345 {offsets = [0, 8], sizes = [8, 8], strides = [1, 1]} : vector<8x32xf32> to vector<8x8xf32>
    %371 = vector.extract_strided_slice %347 {offsets = [0, 8], sizes = [8, 8], strides = [1, 1]} : vector<8x32xf32> to vector<8x8xf32>
    %372 = vector.extract_strided_slice %348 {offsets = [0, 8], sizes = [8, 8], strides = [1, 1]} : vector<8x32xf32> to vector<8x8xf32>
    %cst_147 = arith.constant dense<0.000000e+00> : vector<8x8xf32>
    %373 = tpu.matmul %370, %371, %cst_147 {dimension_numbers = #tpu.dot_dimension_numbers<[1], [1], [0], [0], [0, 0, 1, 0], [], []>} : vector<8x8xf32>, vector<8x8xf32>, vector<8x8xf32> -> vector<8x8xf32>
    %c0_i32_148 = arith.constant 0 : i32
    %374 = vector.broadcast %c0_i32_148 : i32 to vector<8x8xi32>
    %375 = arith.cmpi eq, %10, %374 : vector<8x8xi32>
    %cst_149 = arith.constant -1.000000e+09 : f32
    %376 = vector.broadcast %cst_149 : f32 to vector<8x8xf32>
    %377 = arith.select %375, %376, %373 : vector<8x8xi1>, vector<8x8xf32>
    %cst_150 = arith.constant dense<0xFF800000> : vector<8xf32>
    %378 = vector.multi_reduction <maximumf>, %377, %cst_150 [1] : vector<8x8xf32> to vector<8xf32>
    %379 = vector.shape_cast %378 : vector<8xf32> to vector<8x1xf32>
    %380 = vector.broadcast %379 : vector<8x1xf32> to vector<8x8xf32>
    %381 = arith.subf %377, %380 : vector<8x8xf32>
    %382 = math.exp %381 : vector<8x8xf32>
    %cst_151 = arith.constant dense<0.000000e+00> : vector<8xf32>
    %383 = vector.multi_reduction <add>, %382, %cst_151 [1] : vector<8x8xf32> to vector<8xf32>
    %384 = vector.shape_cast %383 : vector<8xf32> to vector<8x1xf32>
    %385 = tpu.reciprocal %384 {approx = true} : vector<8x1xf32> -> vector<8x1xf32>
    %386 = vector.broadcast %385 : vector<8x1xf32> to vector<8x8xf32>
    %387 = arith.mulf %382, %386 : vector<8x8xf32>
    %cst_152 = arith.constant dense<0.000000e+00> : vector<8x8xf32>
    %388 = tpu.matmul %387, %372, %cst_152 {dimension_numbers = #tpu.dot_dimension_numbers<[1], [0], [0], [1], [0, 0, 1, 1], [], []>} : vector<8x8xf32>, vector<8x8xf32>, vector<8x8xf32> -> vector<8x8xf32>
    %389 = vector.extract_strided_slice %337 {offsets = [8, 0], sizes = [8, 32], strides = [1, 1]} : vector<32x32xf32> to vector<8x32xf32>
    %cst_153 = arith.constant dense<0.000000e+00> : vector<8x32xf32>
    %390 = tpu.matmul %388, %389, %cst_153 {dimension_numbers = #tpu.dot_dimension_numbers<[1], [0], [0], [1], [0, 0, 1, 1], [], []>} : vector<8x8xf32>, vector<8x32xf32>, vector<8x32xf32> -> vector<8x32xf32>
    %391 = arith.addf %369, %390 : vector<8x32xf32>
    %392 = vector.extract_strided_slice %345 {offsets = [0, 16], sizes = [8, 8], strides = [1, 1]} : vector<8x32xf32> to vector<8x8xf32>
    %393 = vector.extract_strided_slice %347 {offsets = [0, 16], sizes = [8, 8], strides = [1, 1]} : vector<8x32xf32> to vector<8x8xf32>
    %394 = vector.extract_strided_slice %348 {offsets = [0, 16], sizes = [8, 8], strides = [1, 1]} : vector<8x32xf32> to vector<8x8xf32>
    %cst_154 = arith.constant dense<0.000000e+00> : vector<8x8xf32>
    %395 = tpu.matmul %392, %393, %cst_154 {dimension_numbers = #tpu.dot_dimension_numbers<[1], [1], [0], [0], [0, 0, 1, 0], [], []>} : vector<8x8xf32>, vector<8x8xf32>, vector<8x8xf32> -> vector<8x8xf32>
    %c0_i32_155 = arith.constant 0 : i32
    %396 = vector.broadcast %c0_i32_155 : i32 to vector<8x8xi32>
    %397 = arith.cmpi eq, %10, %396 : vector<8x8xi32>
    %cst_156 = arith.constant -1.000000e+09 : f32
    %398 = vector.broadcast %cst_156 : f32 to vector<8x8xf32>
    %399 = arith.select %397, %398, %395 : vector<8x8xi1>, vector<8x8xf32>
    %cst_157 = arith.constant dense<0xFF800000> : vector<8xf32>
    %400 = vector.multi_reduction <maximumf>, %399, %cst_157 [1] : vector<8x8xf32> to vector<8xf32>
    %401 = vector.shape_cast %400 : vector<8xf32> to vector<8x1xf32>
    %402 = vector.broadcast %401 : vector<8x1xf32> to vector<8x8xf32>
    %403 = arith.subf %399, %402 : vector<8x8xf32>
    %404 = math.exp %403 : vector<8x8xf32>
    %cst_158 = arith.constant dense<0.000000e+00> : vector<8xf32>
    %405 = vector.multi_reduction <add>, %404, %cst_158 [1] : vector<8x8xf32> to vector<8xf32>
    %406 = vector.shape_cast %405 : vector<8xf32> to vector<8x1xf32>
    %407 = tpu.reciprocal %406 {approx = true} : vector<8x1xf32> -> vector<8x1xf32>
    %408 = vector.broadcast %407 : vector<8x1xf32> to vector<8x8xf32>
    %409 = arith.mulf %404, %408 : vector<8x8xf32>
    %cst_159 = arith.constant dense<0.000000e+00> : vector<8x8xf32>
    %410 = tpu.matmul %409, %394, %cst_159 {dimension_numbers = #tpu.dot_dimension_numbers<[1], [0], [0], [1], [0, 0, 1, 1], [], []>} : vector<8x8xf32>, vector<8x8xf32>, vector<8x8xf32> -> vector<8x8xf32>
    %411 = vector.extract_strided_slice %337 {offsets = [16, 0], sizes = [8, 32], strides = [1, 1]} : vector<32x32xf32> to vector<8x32xf32>
    %cst_160 = arith.constant dense<0.000000e+00> : vector<8x32xf32>
    %412 = tpu.matmul %410, %411, %cst_160 {dimension_numbers = #tpu.dot_dimension_numbers<[1], [0], [0], [1], [0, 0, 1, 1], [], []>} : vector<8x8xf32>, vector<8x32xf32>, vector<8x32xf32> -> vector<8x32xf32>
    %413 = arith.addf %391, %412 : vector<8x32xf32>
    %414 = vector.extract_strided_slice %345 {offsets = [0, 24], sizes = [8, 8], strides = [1, 1]} : vector<8x32xf32> to vector<8x8xf32>
    %415 = vector.extract_strided_slice %347 {offsets = [0, 24], sizes = [8, 8], strides = [1, 1]} : vector<8x32xf32> to vector<8x8xf32>
    %416 = vector.extract_strided_slice %348 {offsets = [0, 24], sizes = [8, 8], strides = [1, 1]} : vector<8x32xf32> to vector<8x8xf32>
    %cst_161 = arith.constant dense<0.000000e+00> : vector<8x8xf32>
    %417 = tpu.matmul %414, %415, %cst_161 {dimension_numbers = #tpu.dot_dimension_numbers<[1], [1], [0], [0], [0, 0, 1, 0], [], []>} : vector<8x8xf32>, vector<8x8xf32>, vector<8x8xf32> -> vector<8x8xf32>
    %c0_i32_162 = arith.constant 0 : i32
    %418 = vector.broadcast %c0_i32_162 : i32 to vector<8x8xi32>
    %419 = arith.cmpi eq, %10, %418 : vector<8x8xi32>
    %cst_163 = arith.constant -1.000000e+09 : f32
    %420 = vector.broadcast %cst_163 : f32 to vector<8x8xf32>
    %421 = arith.select %419, %420, %417 : vector<8x8xi1>, vector<8x8xf32>
    %cst_164 = arith.constant dense<0xFF800000> : vector<8xf32>
    %422 = vector.multi_reduction <maximumf>, %421, %cst_164 [1] : vector<8x8xf32> to vector<8xf32>
    %423 = vector.shape_cast %422 : vector<8xf32> to vector<8x1xf32>
    %424 = vector.broadcast %423 : vector<8x1xf32> to vector<8x8xf32>
    %425 = arith.subf %421, %424 : vector<8x8xf32>
    %426 = math.exp %425 : vector<8x8xf32>
    %cst_165 = arith.constant dense<0.000000e+00> : vector<8xf32>
    %427 = vector.multi_reduction <add>, %426, %cst_165 [1] : vector<8x8xf32> to vector<8xf32>
    %428 = vector.shape_cast %427 : vector<8xf32> to vector<8x1xf32>
    %429 = tpu.reciprocal %428 {approx = true} : vector<8x1xf32> -> vector<8x1xf32>
    %430 = vector.broadcast %429 : vector<8x1xf32> to vector<8x8xf32>
    %431 = arith.mulf %426, %430 : vector<8x8xf32>
    %cst_166 = arith.constant dense<0.000000e+00> : vector<8x8xf32>
    %432 = tpu.matmul %431, %416, %cst_166 {dimension_numbers = #tpu.dot_dimension_numbers<[1], [0], [0], [1], [0, 0, 1, 1], [], []>} : vector<8x8xf32>, vector<8x8xf32>, vector<8x8xf32> -> vector<8x8xf32>
    %433 = vector.extract_strided_slice %337 {offsets = [24, 0], sizes = [8, 32], strides = [1, 1]} : vector<32x32xf32> to vector<8x32xf32>
    %cst_167 = arith.constant dense<0.000000e+00> : vector<8x32xf32>
    %434 = tpu.matmul %432, %433, %cst_167 {dimension_numbers = #tpu.dot_dimension_numbers<[1], [0], [0], [1], [0, 0, 1, 1], [], []>} : vector<8x8xf32>, vector<8x32xf32>, vector<8x32xf32> -> vector<8x32xf32>
    %435 = arith.addf %413, %434 : vector<8x32xf32>
    %436 = arith.addf %435, %333 : vector<8x32xf32>
    %cst_168 = arith.constant dense<0.000000e+00> : vector<8xf32>
    %437 = vector.multi_reduction <add>, %436, %cst_168 [1] : vector<8x32xf32> to vector<8xf32>
    %438 = vector.shape_cast %437 : vector<8xf32> to vector<8x1xf32>
    %cst_169 = arith.constant 3.200000e+01 : f32
    %439 = vector.broadcast %cst_169 : f32 to vector<8x1xf32>
    %440 = arith.divf %438, %439 : vector<8x1xf32>
    %441 = vector.broadcast %440 : vector<8x1xf32> to vector<8x32xf32>
    %442 = arith.subf %436, %441 : vector<8x32xf32>
    %443 = arith.mulf %442, %442 : vector<8x32xf32>
    %cst_170 = arith.constant dense<0.000000e+00> : vector<8xf32>
    %444 = vector.multi_reduction <add>, %443, %cst_170 [1] : vector<8x32xf32> to vector<8xf32>
    %445 = vector.shape_cast %444 : vector<8xf32> to vector<8x1xf32>
    %cst_171 = arith.constant 3.200000e+01 : f32
    %446 = vector.broadcast %cst_171 : f32 to vector<8x1xf32>
    %447 = arith.divf %445, %446 : vector<8x1xf32>
    %448 = vector.broadcast %440 : vector<8x1xf32> to vector<8x32xf32>
    %449 = arith.subf %436, %448 : vector<8x32xf32>
    %cst_172 = arith.constant 9.99999997E-7 : f32
    %450 = vector.broadcast %cst_172 : f32 to vector<8x1xf32>
    %451 = arith.addf %447, %450 : vector<8x1xf32>
    %452 = math.rsqrt %451 : vector<8x1xf32>
    %453 = vector.broadcast %452 : vector<8x1xf32> to vector<8x32xf32>
    %454 = arith.mulf %449, %453 : vector<8x32xf32>
    %455 = vector.broadcast %339 : vector<1x32xf32> to vector<8x32xf32>
    %456 = arith.mulf %454, %455 : vector<8x32xf32>
    %457 = vector.broadcast %341 : vector<1x32xf32> to vector<8x32xf32>
    %458 = arith.addf %456, %457 : vector<8x32xf32>
    %459 = vector.extract_strided_slice %46 {offsets = [1, 0, 0], sizes = [1, 32, 96], strides = [1, 1, 1]} : vector<2x32x96xf32> to vector<1x32x96xf32>
    %460 = vector.shape_cast %459 : vector<1x32x96xf32> to vector<32x96xf32>
    %461 = vector.extract_strided_slice %47 {offsets = [1, 0, 0], sizes = [1, 32, 32], strides = [1, 1, 1]} : vector<2x32x32xf32> to vector<1x32x32xf32>
    %462 = vector.shape_cast %461 : vector<1x32x32xf32> to vector<32x32xf32>
    %463 = vector.extract_strided_slice %48 {offsets = [1, 0, 0], sizes = [1, 1, 32], strides = [1, 1, 1]} : vector<2x1x32xf32> to vector<1x1x32xf32>
    %464 = vector.shape_cast %463 : vector<1x1x32xf32> to vector<1x32xf32>
    %465 = vector.extract_strided_slice %49 {offsets = [1, 0, 0], sizes = [1, 1, 32], strides = [1, 1, 1]} : vector<2x1x32xf32> to vector<1x1x32xf32>
    %466 = vector.shape_cast %465 : vector<1x1x32xf32> to vector<1x32xf32>
    %467 = vector.extract_strided_slice %460 {offsets = [0, 0], sizes = [32, 32], strides = [1, 1]} : vector<32x96xf32> to vector<32x32xf32>
    %cst_173 = arith.constant dense<0.000000e+00> : vector<8x32xf32>
    %468 = tpu.matmul %458, %467, %cst_173 {dimension_numbers = #tpu.dot_dimension_numbers<[1], [0], [0], [1], [0, 0, 1, 1], [], []>} : vector<8x32xf32>, vector<32x32xf32>, vector<8x32xf32> -> vector<8x32xf32>
    %cst_174 = arith.constant 0.353553385 : f32
    %469 = vector.broadcast %cst_174 : f32 to vector<8x32xf32>
    %470 = arith.mulf %468, %469 : vector<8x32xf32>
    %471 = vector.extract_strided_slice %460 {offsets = [0, 32], sizes = [32, 64], strides = [1, 1]} : vector<32x96xf32> to vector<32x64xf32>
    %cst_175 = arith.constant dense<0.000000e+00> : vector<49x64xf32>
    %472 = tpu.matmul %8, %471, %cst_175 {dimension_numbers = #tpu.dot_dimension_numbers<[1], [0], [0], [1], [0, 0, 1, 1], [], []>} : vector<49x32xf32>, vector<32x64xf32>, vector<49x64xf32> -> vector<49x64xf32>
    %473 = vector.extract_strided_slice %472 {offsets = [0, 0], sizes = [49, 32], strides = [1, 1]} : vector<49x64xf32> to vector<49x32xf32>
    %474 = vector.extract_strided_slice %472 {offsets = [0, 32], sizes = [49, 32], strides = [1, 1]} : vector<49x64xf32> to vector<49x32xf32>
    %475 = vector.extract_strided_slice %470 {offsets = [0, 0], sizes = [8, 8], strides = [1, 1]} : vector<8x32xf32> to vector<8x8xf32>
    %476 = vector.extract_strided_slice %473 {offsets = [0, 0], sizes = [49, 8], strides = [1, 1]} : vector<49x32xf32> to vector<49x8xf32>
    %477 = vector.extract_strided_slice %474 {offsets = [0, 0], sizes = [49, 8], strides = [1, 1]} : vector<49x32xf32> to vector<49x8xf32>
    %cst_176 = arith.constant dense<0.000000e+00> : vector<8x49xf32>
    %478 = tpu.matmul %475, %476, %cst_176 {dimension_numbers = #tpu.dot_dimension_numbers<[1], [1], [0], [0], [0, 0, 1, 0], [], []>} : vector<8x8xf32>, vector<49x8xf32>, vector<8x49xf32> -> vector<8x49xf32>
    %cst_177 = arith.constant dense<0xFF800000> : vector<8xf32>
    %479 = vector.multi_reduction <maximumf>, %478, %cst_177 [1] : vector<8x49xf32> to vector<8xf32>
    %480 = vector.shape_cast %479 : vector<8xf32> to vector<8x1xf32>
    %481 = vector.broadcast %480 : vector<8x1xf32> to vector<8x49xf32>
    %482 = arith.subf %478, %481 : vector<8x49xf32>
    %483 = math.exp %482 : vector<8x49xf32>
    %cst_178 = arith.constant dense<0.000000e+00> : vector<8xf32>
    %484 = vector.multi_reduction <add>, %483, %cst_178 [1] : vector<8x49xf32> to vector<8xf32>
    %485 = vector.shape_cast %484 : vector<8xf32> to vector<8x1xf32>
    %486 = tpu.reciprocal %485 {approx = true} : vector<8x1xf32> -> vector<8x1xf32>
    %487 = vector.broadcast %486 : vector<8x1xf32> to vector<8x49xf32>
    %488 = arith.mulf %483, %487 : vector<8x49xf32>
    %cst_179 = arith.constant dense<0.000000e+00> : vector<8x8xf32>
    %489 = tpu.matmul %488, %477, %cst_179 {dimension_numbers = #tpu.dot_dimension_numbers<[1], [0], [0], [1], [0, 0, 1, 1], [], []>} : vector<8x49xf32>, vector<49x8xf32>, vector<8x8xf32> -> vector<8x8xf32>
    %490 = vector.extract_strided_slice %462 {offsets = [0, 0], sizes = [8, 32], strides = [1, 1]} : vector<32x32xf32> to vector<8x32xf32>
    %cst_180 = arith.constant dense<0.000000e+00> : vector<8x32xf32>
    %491 = tpu.matmul %489, %490, %cst_180 {dimension_numbers = #tpu.dot_dimension_numbers<[1], [0], [0], [1], [0, 0, 1, 1], [], []>} : vector<8x8xf32>, vector<8x32xf32>, vector<8x32xf32> -> vector<8x32xf32>
    %492 = vector.extract_strided_slice %470 {offsets = [0, 8], sizes = [8, 8], strides = [1, 1]} : vector<8x32xf32> to vector<8x8xf32>
    %493 = vector.extract_strided_slice %473 {offsets = [0, 8], sizes = [49, 8], strides = [1, 1]} : vector<49x32xf32> to vector<49x8xf32>
    %494 = vector.extract_strided_slice %474 {offsets = [0, 8], sizes = [49, 8], strides = [1, 1]} : vector<49x32xf32> to vector<49x8xf32>
    %cst_181 = arith.constant dense<0.000000e+00> : vector<8x49xf32>
    %495 = tpu.matmul %492, %493, %cst_181 {dimension_numbers = #tpu.dot_dimension_numbers<[1], [1], [0], [0], [0, 0, 1, 0], [], []>} : vector<8x8xf32>, vector<49x8xf32>, vector<8x49xf32> -> vector<8x49xf32>
    %cst_182 = arith.constant dense<0xFF800000> : vector<8xf32>
    %496 = vector.multi_reduction <maximumf>, %495, %cst_182 [1] : vector<8x49xf32> to vector<8xf32>
    %497 = vector.shape_cast %496 : vector<8xf32> to vector<8x1xf32>
    %498 = vector.broadcast %497 : vector<8x1xf32> to vector<8x49xf32>
    %499 = arith.subf %495, %498 : vector<8x49xf32>
    %500 = math.exp %499 : vector<8x49xf32>
    %cst_183 = arith.constant dense<0.000000e+00> : vector<8xf32>
    %501 = vector.multi_reduction <add>, %500, %cst_183 [1] : vector<8x49xf32> to vector<8xf32>
    %502 = vector.shape_cast %501 : vector<8xf32> to vector<8x1xf32>
    %503 = tpu.reciprocal %502 {approx = true} : vector<8x1xf32> -> vector<8x1xf32>
    %504 = vector.broadcast %503 : vector<8x1xf32> to vector<8x49xf32>
    %505 = arith.mulf %500, %504 : vector<8x49xf32>
    %cst_184 = arith.constant dense<0.000000e+00> : vector<8x8xf32>
    %506 = tpu.matmul %505, %494, %cst_184 {dimension_numbers = #tpu.dot_dimension_numbers<[1], [0], [0], [1], [0, 0, 1, 1], [], []>} : vector<8x49xf32>, vector<49x8xf32>, vector<8x8xf32> -> vector<8x8xf32>
    %507 = vector.extract_strided_slice %462 {offsets = [8, 0], sizes = [8, 32], strides = [1, 1]} : vector<32x32xf32> to vector<8x32xf32>
    %cst_185 = arith.constant dense<0.000000e+00> : vector<8x32xf32>
    %508 = tpu.matmul %506, %507, %cst_185 {dimension_numbers = #tpu.dot_dimension_numbers<[1], [0], [0], [1], [0, 0, 1, 1], [], []>} : vector<8x8xf32>, vector<8x32xf32>, vector<8x32xf32> -> vector<8x32xf32>
    %509 = arith.addf %491, %508 : vector<8x32xf32>
    %510 = vector.extract_strided_slice %470 {offsets = [0, 16], sizes = [8, 8], strides = [1, 1]} : vector<8x32xf32> to vector<8x8xf32>
    %511 = vector.extract_strided_slice %473 {offsets = [0, 16], sizes = [49, 8], strides = [1, 1]} : vector<49x32xf32> to vector<49x8xf32>
    %512 = vector.extract_strided_slice %474 {offsets = [0, 16], sizes = [49, 8], strides = [1, 1]} : vector<49x32xf32> to vector<49x8xf32>
    %cst_186 = arith.constant dense<0.000000e+00> : vector<8x49xf32>
    %513 = tpu.matmul %510, %511, %cst_186 {dimension_numbers = #tpu.dot_dimension_numbers<[1], [1], [0], [0], [0, 0, 1, 0], [], []>} : vector<8x8xf32>, vector<49x8xf32>, vector<8x49xf32> -> vector<8x49xf32>
    %cst_187 = arith.constant dense<0xFF800000> : vector<8xf32>
    %514 = vector.multi_reduction <maximumf>, %513, %cst_187 [1] : vector<8x49xf32> to vector<8xf32>
    %515 = vector.shape_cast %514 : vector<8xf32> to vector<8x1xf32>
    %516 = vector.broadcast %515 : vector<8x1xf32> to vector<8x49xf32>
    %517 = arith.subf %513, %516 : vector<8x49xf32>
    %518 = math.exp %517 : vector<8x49xf32>
    %cst_188 = arith.constant dense<0.000000e+00> : vector<8xf32>
    %519 = vector.multi_reduction <add>, %518, %cst_188 [1] : vector<8x49xf32> to vector<8xf32>
    %520 = vector.shape_cast %519 : vector<8xf32> to vector<8x1xf32>
    %521 = tpu.reciprocal %520 {approx = true} : vector<8x1xf32> -> vector<8x1xf32>
    %522 = vector.broadcast %521 : vector<8x1xf32> to vector<8x49xf32>
    %523 = arith.mulf %518, %522 : vector<8x49xf32>
    %cst_189 = arith.constant dense<0.000000e+00> : vector<8x8xf32>
    %524 = tpu.matmul %523, %512, %cst_189 {dimension_numbers = #tpu.dot_dimension_numbers<[1], [0], [0], [1], [0, 0, 1, 1], [], []>} : vector<8x49xf32>, vector<49x8xf32>, vector<8x8xf32> -> vector<8x8xf32>
    %525 = vector.extract_strided_slice %462 {offsets = [16, 0], sizes = [8, 32], strides = [1, 1]} : vector<32x32xf32> to vector<8x32xf32>
    %cst_190 = arith.constant dense<0.000000e+00> : vector<8x32xf32>
    %526 = tpu.matmul %524, %525, %cst_190 {dimension_numbers = #tpu.dot_dimension_numbers<[1], [0], [0], [1], [0, 0, 1, 1], [], []>} : vector<8x8xf32>, vector<8x32xf32>, vector<8x32xf32> -> vector<8x32xf32>
    %527 = arith.addf %509, %526 : vector<8x32xf32>
    %528 = vector.extract_strided_slice %470 {offsets = [0, 24], sizes = [8, 8], strides = [1, 1]} : vector<8x32xf32> to vector<8x8xf32>
    %529 = vector.extract_strided_slice %473 {offsets = [0, 24], sizes = [49, 8], strides = [1, 1]} : vector<49x32xf32> to vector<49x8xf32>
    %530 = vector.extract_strided_slice %474 {offsets = [0, 24], sizes = [49, 8], strides = [1, 1]} : vector<49x32xf32> to vector<49x8xf32>
    %cst_191 = arith.constant dense<0.000000e+00> : vector<8x49xf32>
    %531 = tpu.matmul %528, %529, %cst_191 {dimension_numbers = #tpu.dot_dimension_numbers<[1], [1], [0], [0], [0, 0, 1, 0], [], []>} : vector<8x8xf32>, vector<49x8xf32>, vector<8x49xf32> -> vector<8x49xf32>
    %cst_192 = arith.constant dense<0xFF800000> : vector<8xf32>
    %532 = vector.multi_reduction <maximumf>, %531, %cst_192 [1] : vector<8x49xf32> to vector<8xf32>
    %533 = vector.shape_cast %532 : vector<8xf32> to vector<8x1xf32>
    %534 = vector.broadcast %533 : vector<8x1xf32> to vector<8x49xf32>
    %535 = arith.subf %531, %534 : vector<8x49xf32>
    %536 = math.exp %535 : vector<8x49xf32>
    %cst_193 = arith.constant dense<0.000000e+00> : vector<8xf32>
    %537 = vector.multi_reduction <add>, %536, %cst_193 [1] : vector<8x49xf32> to vector<8xf32>
    %538 = vector.shape_cast %537 : vector<8xf32> to vector<8x1xf32>
    %539 = tpu.reciprocal %538 {approx = true} : vector<8x1xf32> -> vector<8x1xf32>
    %540 = vector.broadcast %539 : vector<8x1xf32> to vector<8x49xf32>
    %541 = arith.mulf %536, %540 : vector<8x49xf32>
    %cst_194 = arith.constant dense<0.000000e+00> : vector<8x8xf32>
    %542 = tpu.matmul %541, %530, %cst_194 {dimension_numbers = #tpu.dot_dimension_numbers<[1], [0], [0], [1], [0, 0, 1, 1], [], []>} : vector<8x49xf32>, vector<49x8xf32>, vector<8x8xf32> -> vector<8x8xf32>
    %543 = vector.extract_strided_slice %462 {offsets = [24, 0], sizes = [8, 32], strides = [1, 1]} : vector<32x32xf32> to vector<8x32xf32>
    %cst_195 = arith.constant dense<0.000000e+00> : vector<8x32xf32>
    %544 = tpu.matmul %542, %543, %cst_195 {dimension_numbers = #tpu.dot_dimension_numbers<[1], [0], [0], [1], [0, 0, 1, 1], [], []>} : vector<8x8xf32>, vector<8x32xf32>, vector<8x32xf32> -> vector<8x32xf32>
    %545 = arith.addf %527, %544 : vector<8x32xf32>
    %546 = arith.addf %545, %458 : vector<8x32xf32>
    %cst_196 = arith.constant dense<0.000000e+00> : vector<8xf32>
    %547 = vector.multi_reduction <add>, %546, %cst_196 [1] : vector<8x32xf32> to vector<8xf32>
    %548 = vector.shape_cast %547 : vector<8xf32> to vector<8x1xf32>
    %cst_197 = arith.constant 3.200000e+01 : f32
    %549 = vector.broadcast %cst_197 : f32 to vector<8x1xf32>
    %550 = arith.divf %548, %549 : vector<8x1xf32>
    %551 = vector.broadcast %550 : vector<8x1xf32> to vector<8x32xf32>
    %552 = arith.subf %546, %551 : vector<8x32xf32>
    %553 = arith.mulf %552, %552 : vector<8x32xf32>
    %cst_198 = arith.constant dense<0.000000e+00> : vector<8xf32>
    %554 = vector.multi_reduction <add>, %553, %cst_198 [1] : vector<8x32xf32> to vector<8xf32>
    %555 = vector.shape_cast %554 : vector<8xf32> to vector<8x1xf32>
    %cst_199 = arith.constant 3.200000e+01 : f32
    %556 = vector.broadcast %cst_199 : f32 to vector<8x1xf32>
    %557 = arith.divf %555, %556 : vector<8x1xf32>
    %558 = vector.broadcast %550 : vector<8x1xf32> to vector<8x32xf32>
    %559 = arith.subf %546, %558 : vector<8x32xf32>
    %cst_200 = arith.constant 9.99999997E-7 : f32
    %560 = vector.broadcast %cst_200 : f32 to vector<8x1xf32>
    %561 = arith.addf %557, %560 : vector<8x1xf32>
    %562 = math.rsqrt %561 : vector<8x1xf32>
    %563 = vector.broadcast %562 : vector<8x1xf32> to vector<8x32xf32>
    %564 = arith.mulf %559, %563 : vector<8x32xf32>
    %565 = vector.broadcast %464 : vector<1x32xf32> to vector<8x32xf32>
    %566 = arith.mulf %564, %565 : vector<8x32xf32>
    %567 = vector.broadcast %466 : vector<1x32xf32> to vector<8x32xf32>
    %568 = arith.addf %566, %567 : vector<8x32xf32>
    %569 = vector.extract_strided_slice %50 {offsets = [1, 0, 0], sizes = [1, 32, 64], strides = [1, 1, 1]} : vector<2x32x64xf32> to vector<1x32x64xf32>
    %570 = vector.shape_cast %569 : vector<1x32x64xf32> to vector<32x64xf32>
    %cst_201 = arith.constant dense<0.000000e+00> : vector<8x64xf32>
    %571 = tpu.matmul %568, %570, %cst_201 {dimension_numbers = #tpu.dot_dimension_numbers<[1], [0], [0], [1], [0, 0, 1, 1], [], []>} : vector<8x32xf32>, vector<32x64xf32>, vector<8x64xf32> -> vector<8x64xf32>
    %572 = vector.extract_strided_slice %51 {offsets = [1, 0, 0], sizes = [1, 1, 64], strides = [1, 1, 1]} : vector<2x1x64xf32> to vector<1x1x64xf32>
    %573 = vector.shape_cast %572 : vector<1x1x64xf32> to vector<1x64xf32>
    %574 = vector.broadcast %573 : vector<1x64xf32> to vector<8x64xf32>
    %575 = arith.addf %571, %574 : vector<8x64xf32>
    %cst_202 = arith.constant 0.000000e+00 : f32
    %576 = vector.broadcast %cst_202 : f32 to vector<8x64xf32>
    %577 = arith.maximumf %575, %576 : vector<8x64xf32>
    %578 = vector.extract_strided_slice %52 {offsets = [1, 0, 0], sizes = [1, 64, 32], strides = [1, 1, 1]} : vector<2x64x32xf32> to vector<1x64x32xf32>
    %579 = vector.shape_cast %578 : vector<1x64x32xf32> to vector<64x32xf32>
    %cst_203 = arith.constant dense<0.000000e+00> : vector<8x32xf32>
    %580 = tpu.matmul %577, %579, %cst_203 {dimension_numbers = #tpu.dot_dimension_numbers<[1], [0], [0], [1], [0, 0, 1, 1], [], []>} : vector<8x64xf32>, vector<64x32xf32>, vector<8x32xf32> -> vector<8x32xf32>
    %581 = vector.extract_strided_slice %53 {offsets = [1, 0, 0], sizes = [1, 1, 32], strides = [1, 1, 1]} : vector<2x1x32xf32> to vector<1x1x32xf32>
    %582 = vector.shape_cast %581 : vector<1x1x32xf32> to vector<1x32xf32>
    %583 = vector.broadcast %582 : vector<1x32xf32> to vector<8x32xf32>
    %584 = arith.addf %580, %583 : vector<8x32xf32>
    %585 = arith.addf %584, %568 : vector<8x32xf32>
    %586 = vector.extract_strided_slice %54 {offsets = [1, 0, 0], sizes = [1, 1, 32], strides = [1, 1, 1]} : vector<2x1x32xf32> to vector<1x1x32xf32>
    %587 = vector.shape_cast %586 : vector<1x1x32xf32> to vector<1x32xf32>
    %588 = vector.extract_strided_slice %55 {offsets = [1, 0, 0], sizes = [1, 1, 32], strides = [1, 1, 1]} : vector<2x1x32xf32> to vector<1x1x32xf32>
    %589 = vector.shape_cast %588 : vector<1x1x32xf32> to vector<1x32xf32>
    %cst_204 = arith.constant dense<0.000000e+00> : vector<8xf32>
    %590 = vector.multi_reduction <add>, %585, %cst_204 [1] : vector<8x32xf32> to vector<8xf32>
    %591 = vector.shape_cast %590 : vector<8xf32> to vector<8x1xf32>
    %cst_205 = arith.constant 3.200000e+01 : f32
    %592 = vector.broadcast %cst_205 : f32 to vector<8x1xf32>
    %593 = arith.divf %591, %592 : vector<8x1xf32>
    %594 = vector.broadcast %593 : vector<8x1xf32> to vector<8x32xf32>
    %595 = arith.subf %585, %594 : vector<8x32xf32>
    %596 = arith.mulf %595, %595 : vector<8x32xf32>
    %cst_206 = arith.constant dense<0.000000e+00> : vector<8xf32>
    %597 = vector.multi_reduction <add>, %596, %cst_206 [1] : vector<8x32xf32> to vector<8xf32>
    %598 = vector.shape_cast %597 : vector<8xf32> to vector<8x1xf32>
    %cst_207 = arith.constant 3.200000e+01 : f32
    %599 = vector.broadcast %cst_207 : f32 to vector<8x1xf32>
    %600 = arith.divf %598, %599 : vector<8x1xf32>
    %601 = vector.broadcast %593 : vector<8x1xf32> to vector<8x32xf32>
    %602 = arith.subf %585, %601 : vector<8x32xf32>
    %cst_208 = arith.constant 9.99999997E-7 : f32
    %603 = vector.broadcast %cst_208 : f32 to vector<8x1xf32>
    %604 = arith.addf %600, %603 : vector<8x1xf32>
    %605 = math.rsqrt %604 : vector<8x1xf32>
    %606 = vector.broadcast %605 : vector<8x1xf32> to vector<8x32xf32>
    %607 = arith.mulf %602, %606 : vector<8x32xf32>
    %608 = vector.broadcast %587 : vector<1x32xf32> to vector<8x32xf32>
    %609 = arith.mulf %607, %608 : vector<8x32xf32>
    %610 = vector.broadcast %589 : vector<1x32xf32> to vector<8x32xf32>
    %611 = arith.addf %609, %610 : vector<8x32xf32>
    %c0_209 = arith.constant 0 : index
    %c0_210 = arith.constant 0 : index
    %612 = vector.load %arg23[%c0_209, %c0_210] : memref<32x128xf32, #tpu.memory_space<vmem>>, vector<32x128xf32>
    %cst_211 = arith.constant dense<0.000000e+00> : vector<8x128xf32>
    %613 = tpu.matmul %611, %612, %cst_211 {dimension_numbers = #tpu.dot_dimension_numbers<[1], [0], [0], [1], [0, 0, 1, 1], [], []>} : vector<8x32xf32>, vector<32x128xf32>, vector<8x128xf32> -> vector<8x128xf32>
    %c0_212 = arith.constant 0 : index
    %c0_213 = arith.constant 0 : index
    %c0_214 = arith.constant 0 : index
    %614 = vector.load %arg24[%c0_212, %c0_213, %c0_214] : memref<1x8x128xf32, #tpu.memory_space<vmem>>, vector<1x8x128xf32>
    %615 = vector.shape_cast %614 : vector<1x8x128xf32> to vector<8x128xf32>
    %616 = vector.shape_cast %613 : vector<8x128xf32> to vector<1x8x128xf32>
    tpu.vector_store %arg24[%c0_212, %c0_213, %c0_214], %616 {strides = array<i32>} : memref<1x8x128xf32, #tpu.memory_space<vmem>>, vector<1x8x128xf32>,
    return
  }
  func.func @transform_0(%arg0: i32) -> (i32, i32, i32) {
    %c0_i32 = arith.constant 0 : i32
    %c0_i32_0 = arith.constant 0 : i32
    %c0_i32_1 = arith.constant 0 : i32
    return %arg0, %c0_i32, %c0_i32_0 : i32, i32, i32
  }
  func.func @transform_1(%arg0: i32) -> (i32, i32) {
    %c0_i32 = arith.constant 0 : i32
    %c0_i32_0 = arith.constant 0 : i32
    %c0_i32_1 = arith.constant 0 : i32
    return %c0_i32, %c0_i32_0 : i32, i32
  }
  func.func @transform_2(%arg0: i32) -> (i32, i32) {
    %c0_i32 = arith.constant 0 : i32
    %c0_i32_0 = arith.constant 0 : i32
    %c0_i32_1 = arith.constant 0 : i32
    return %c0_i32, %c0_i32_0 : i32, i32
  }
  func.func @transform_3(%arg0: i32) -> (i32, i32, i32) {
    %c0_i32 = arith.constant 0 : i32
    %c0_i32_0 = arith.constant 0 : i32
    %c0_i32_1 = arith.constant 0 : i32
    return %arg0, %c0_i32, %c0_i32_0 : i32, i32, i32
  }
  func.func @transform_4(%arg0: i32) -> (i32, i32, i32) {
    %c0_i32 = arith.constant 0 : i32
    %c0_i32_0 = arith.constant 0 : i32
    %c0_i32_1 = arith.constant 0 : i32
    %c0_i32_2 = arith.constant 0 : i32
    return %c0_i32, %c0_i32_0, %c0_i32_1 : i32, i32, i32
  }
  func.func @transform_5(%arg0: i32) -> (i32, i32, i32) {
    %c0_i32 = arith.constant 0 : i32
    %c0_i32_0 = arith.constant 0 : i32
    %c0_i32_1 = arith.constant 0 : i32
    return %arg0, %c0_i32, %c0_i32_0 : i32, i32, i32
  }
  func.func @transform_6(%arg0: i32) -> (i32, i32) {
    %c0_i32 = arith.constant 0 : i32
    %c0_i32_0 = arith.constant 0 : i32
    %c0_i32_1 = arith.constant 0 : i32
    return %c0_i32, %c0_i32_0 : i32, i32
  }
  func.func @transform_7(%arg0: i32) -> (i32, i32) {
    %c0_i32 = arith.constant 0 : i32
    %c0_i32_0 = arith.constant 0 : i32
    %c0_i32_1 = arith.constant 0 : i32
    return %c0_i32, %c0_i32_0 : i32, i32
  }
  func.func @transform_8(%arg0: i32) -> (i32, i32, i32) {
    %c0_i32 = arith.constant 0 : i32
    %c0_i32_0 = arith.constant 0 : i32
    %c0_i32_1 = arith.constant 0 : i32
    %c0_i32_2 = arith.constant 0 : i32
    return %c0_i32, %c0_i32_0, %c0_i32_1 : i32, i32, i32
  }
  func.func @transform_9(%arg0: i32) -> (i32, i32, i32) {
    %c0_i32 = arith.constant 0 : i32
    %c0_i32_0 = arith.constant 0 : i32
    %c0_i32_1 = arith.constant 0 : i32
    %c0_i32_2 = arith.constant 0 : i32
    return %c0_i32, %c0_i32_0, %c0_i32_1 : i32, i32, i32
  }
  func.func @transform_10(%arg0: i32) -> (i32, i32, i32) {
    %c0_i32 = arith.constant 0 : i32
    %c0_i32_0 = arith.constant 0 : i32
    %c0_i32_1 = arith.constant 0 : i32
    %c0_i32_2 = arith.constant 0 : i32
    return %c0_i32, %c0_i32_0, %c0_i32_1 : i32, i32, i32
  }
  func.func @transform_11(%arg0: i32) -> (i32, i32, i32) {
    %c0_i32 = arith.constant 0 : i32
    %c0_i32_0 = arith.constant 0 : i32
    %c0_i32_1 = arith.constant 0 : i32
    %c0_i32_2 = arith.constant 0 : i32
    return %c0_i32, %c0_i32_0, %c0_i32_1 : i32, i32, i32
  }
  func.func @transform_12(%arg0: i32) -> (i32, i32, i32) {
    %c0_i32 = arith.constant 0 : i32
    %c0_i32_0 = arith.constant 0 : i32
    %c0_i32_1 = arith.constant 0 : i32
    %c0_i32_2 = arith.constant 0 : i32
    return %c0_i32, %c0_i32_0, %c0_i32_1 : i32, i32, i32
  }
  func.func @transform_13(%arg0: i32) -> (i32, i32, i32) {
    %c0_i32 = arith.constant 0 : i32
    %c0_i32_0 = arith.constant 0 : i32
    %c0_i32_1 = arith.constant 0 : i32
    %c0_i32_2 = arith.constant 0 : i32
    return %c0_i32, %c0_i32_0, %c0_i32_1 : i32, i32, i32
  }
  func.func @transform_14(%arg0: i32) -> (i32, i32, i32) {
    %c0_i32 = arith.constant 0 : i32
    %c0_i32_0 = arith.constant 0 : i32
    %c0_i32_1 = arith.constant 0 : i32
    %c0_i32_2 = arith.constant 0 : i32
    return %c0_i32, %c0_i32_0, %c0_i32_1 : i32, i32, i32
  }
  func.func @transform_15(%arg0: i32) -> (i32, i32, i32) {
    %c0_i32 = arith.constant 0 : i32
    %c0_i32_0 = arith.constant 0 : i32
    %c0_i32_1 = arith.constant 0 : i32
    %c0_i32_2 = arith.constant 0 : i32
    return %c0_i32, %c0_i32_0, %c0_i32_1 : i32, i32, i32
  }
  func.func @transform_16(%arg0: i32) -> (i32, i32, i32) {
    %c0_i32 = arith.constant 0 : i32
    %c0_i32_0 = arith.constant 0 : i32
    %c0_i32_1 = arith.constant 0 : i32
    %c0_i32_2 = arith.constant 0 : i32
    return %c0_i32, %c0_i32_0, %c0_i32_1 : i32, i32, i32
  }
  func.func @transform_17(%arg0: i32) -> (i32, i32, i32) {
    %c0_i32 = arith.constant 0 : i32
    %c0_i32_0 = arith.constant 0 : i32
    %c0_i32_1 = arith.constant 0 : i32
    %c0_i32_2 = arith.constant 0 : i32
    return %c0_i32, %c0_i32_0, %c0_i32_1 : i32, i32, i32
  }
  func.func @transform_18(%arg0: i32) -> (i32, i32, i32) {
    %c0_i32 = arith.constant 0 : i32
    %c0_i32_0 = arith.constant 0 : i32
    %c0_i32_1 = arith.constant 0 : i32
    %c0_i32_2 = arith.constant 0 : i32
    return %c0_i32, %c0_i32_0, %c0_i32_1 : i32, i32, i32
  }
  func.func @transform_19(%arg0: i32) -> (i32, i32, i32) {
    %c0_i32 = arith.constant 0 : i32
    %c0_i32_0 = arith.constant 0 : i32
    %c0_i32_1 = arith.constant 0 : i32
    %c0_i32_2 = arith.constant 0 : i32
    return %c0_i32, %c0_i32_0, %c0_i32_1 : i32, i32, i32
  }
  func.func @transform_20(%arg0: i32) -> (i32, i32, i32) {
    %c0_i32 = arith.constant 0 : i32
    %c0_i32_0 = arith.constant 0 : i32
    %c0_i32_1 = arith.constant 0 : i32
    %c0_i32_2 = arith.constant 0 : i32
    return %c0_i32, %c0_i32_0, %c0_i32_1 : i32, i32, i32
  }
  func.func @transform_21(%arg0: i32) -> (i32, i32, i32) {
    %c0_i32 = arith.constant 0 : i32
    %c0_i32_0 = arith.constant 0 : i32
    %c0_i32_1 = arith.constant 0 : i32
    %c0_i32_2 = arith.constant 0 : i32
    return %c0_i32, %c0_i32_0, %c0_i32_1 : i32, i32, i32
  }
  func.func @transform_22(%arg0: i32) -> (i32, i32) {
    %c0_i32 = arith.constant 0 : i32
    %c0_i32_0 = arith.constant 0 : i32
    %c0_i32_1 = arith.constant 0 : i32
    return %c0_i32, %c0_i32_0 : i32, i32
  }
  func.func @transform_23(%arg0: i32) -> (i32, i32, i32) {
    %c0_i32 = arith.constant 0 : i32
    %c0_i32_0 = arith.constant 0 : i32
    %c0_i32_1 = arith.constant 0 : i32
    return %arg0, %c0_i32, %c0_i32_0 : i32, i32, i32
  }
}

</mosaic_0001>

<bundles_post_ra>
// kernel: pallas_forward.1
= control target key start
LH: loop header
LB: loop body
LE: loop exit
PB: predicated region body
PF: predicated region fallthrough
CT: control target
= control target key end

     0   :  { %s12207_s0 = inlined_call_operand.vmem [shape: bf16[2,49,2048], index: 0, kind: input, shape index: {}]   ;;  %s12208_s1 = inlined_call_operand.vmem [shape: bf16[2048,32], index: 1, kind: input, shape index: {}]   ;;  %s12209_s2 = inlined_call_operand.vmem [shape: f32[1,32], index: 2, kind: input, shape index: {}]   ;;  %s12210_s3 = inlined_call_operand.vmem [shape: f32[2,8,32], index: 3, kind: input, shape index: {}]   ;;  %s12211_s4 = inlined_call_operand.vmem [shape: f32[1,8,32], index: 4, kind: input, shape index: {}]   ;;  %s12212_s5 = inlined_call_operand.vmem [shape: s32[2,8,8], index: 5, kind: input, shape index: {}]   ;;  %s12213_s6 = inlined_call_operand.vmem [shape: f32[1,32], index: 6, kind: input, shape index: {}]   ;;  %s12214_s7 = inlined_call_operand.vmem [shape: f32[1,32], index: 7, kind: input, shape index: {}]   ;;  %s12215_s8 = inlined_call_operand.vmem [shape: f32[2,32,96], index: 8, kind: input, shape index: {}]   ;;  %s12216_s9 = inlined_call_operand.vmem [shape: f32[2,32,32], index: 9, kind: input, shape index: {}]   ;;  %s12217_s10 = inlined_call_operand.vmem [shape: f32[2,1,32], index: 10, kind: input, shape index: {}]   ;;  %s12218_s11 = inlined_call_operand.vmem [shape: f32[2,1,32], index: 11, kind: input, shape index: {}]   ;;  %s12219_s12 = inlined_call_operand.vmem [shape: f32[2,32,96], index: 12, kind: input, shape index: {}]   ;;  %s12220_s13 = inlined_call_operand.vmem [shape: f32[2,32,32], index: 13, kind: input, shape index: {}]   ;;  %s12221_s14 = inlined_call_operand.vmem [shape: f32[2,1,32], index: 14, kind: input, shape index: {}]   ;;  %s12222_s15 = inlined_call_operand.vmem [shape: f32[2,1,32], index: 15, kind: input, shape index: {}]   ;;  %s12223_s16 = inlined_call_operand.vmem [shape: f32[2,32,64], index: 16, kind: input, shape index: {}]   ;;  %s12224_s17 = inlined_call_operand.vmem [shape: f32[2,1,64], index: 17, kind: input, shape index: {}]   ;;  %s12225_s18 = inlined_call_operand.vmem [shape: f32[2,64,32], index: 18, kind: input, shape index: {}]   ;;  %s12226_s19 = inlined_call_operand.vmem [shape: f32[2,1,32], index: 19, kind: input, shape index: {}]   ;;  %s12227_s20 = inlined_call_operand.vmem [shape: f32[2,1,32], index: 20, kind: input, shape index: {}]   ;;  %s12228_s21 = inlined_call_operand.vmem [shape: f32[2,1,32], index: 21, kind: input, shape index: {}]   ;;  %s12229_s22 = inlined_call_operand.vmem [shape: f32[32,128], index: 22, kind: input, shape index: {}]   ;;  %s12230_s23 = inlined_call_operand.hbm [shape: f32[2,8,128], index: 23, kind: output, shape index: {}]  }
   0x1   :  { %12256 = sst [smem:[#allocation13_spill]] %s12207_s0 }
   0x2   :  { %12257 = sst [smem:[#allocation14_spill]] %s12208_s1 }
   0x3   :  { %12258 = sst [smem:[#allocation15_spill]] %s12209_s2 }
   0x4   :  { %12259 = sst [smem:[#allocation16_spill]] %s12210_s3 }
   0x5   :  { %12260 = sst [smem:[#allocation17_spill]] %s12211_s4 }
   0x6   :  { %12261 = sst [smem:[#allocation18_spill]] %s12212_s5 }
   0x7   :  { %12262 = sst [smem:[#allocation19_spill]] %s12213_s6 }
   0x8   :  { %12263 = sst [smem:[#allocation20_spill]] %s12214_s7 }
   0x9   :  { %12264 = sst [smem:[#allocation21_spill]] %s12230_s23 }
   0xa   :  { %28 = vsyncpa [#allocation3], 0 }
   0xb   :  { %30 = vsyncpa [#allocation3 + $0x1], 0  ;;  %s10630_s4 = smov 0   ;;  %s10632_s30 = smov 0  }
   0xc   :  { %s10634_s24 = smov 0   ;;  %s10636_s25 = smov 0  }
   0xd LB: > { %12265 = sst [smem:[#allocation5_spill]] %s10481_s4  ;;  %s10651_s5 = sadd.s32 4294967295, %s10493_s25   ;;  %s10493_s25 = sphi %s10636_s25, %s12300_s25   ;;  %s10489_s24 = sphi %s10634_s24, %s12302_s24   ;;  %s10485_s30 = sphi %s10632_s30, %s12304_s30   ;;  %s10481_s4 = sphi %s10630_s4, %s12303_s4  }
   0xe   : > { %12266 = sst [smem:[#allocation6_spill]] %s10489_s24  ;;  %s8121_s1 = sadd.s32 4294967294, %s10493_s25  }
   0xf   : > { %12267 = sst [smem:[#allocation7_spill]] %s10493_s25  ;;  %s10655_s26 = sadd.s32 1, %s10493_s25  }
  0x10   : > { %12268 = sst [smem:[#allocation8_spill]] %s10651_s5  ;;  %s541_s2 = sadd.s32 1, %s10489_s24 }
  0x11   : > { %12269 = sst [smem:[#allocation9_spill]] %s10655_s26  ;;  %s538_s6 = ssub.s32 %s10493_s25, %s10655_s26 }
  0x12   : > { %p551_p0 = scmp.ne.s32.totalorder %s10489_s24, %s10485_s30  ;;  %p539_p1 = scmp.eq.s32.totalorder %s538_s6, 0 }
  0x13   : > { %p552_p2 = scmp.eq.s32.totalorder %s10651_s5, 1  ;;  %p557_p3 = scmp.ne.s32.totalorder %s10485_s30, %s10481_s4 }
  0x14   : > { %p558_p4 = scmp.eq.s32.totalorder %s8121_s1, 1  ;;  %p8124_p7 = scmp.ge.s32.totalorder %s10493_s25, 1 }
  0x15   : > { %s10666_s27 = scalar_select %p539_p1, %s10489_s24, %s541_s2  }
  0x16   : > { %p10668_p5 = por %p552_p2, %p551_p0  ;;  %p10672_p6 = por %p558_p4, %p557_p3 }
  0x17   : > { %12270 = sst [smem:[#allocation10_spill]] %s10666_s27  ;;  %p658_p8 = scmp.lt.s32.totalorder %s10493_s25, 3 }
  0x18   : > { %s12271_s7 = scalar_select %p10668_p5, 1, 0 }
  0x19   : > { %s12273_s28 = scalar_select %p10672_p6, 1, 0 }
  0x1a   : > { %12272 = sst [smem:[#allocation11_spill]] %s12271_s7  ;;  %p659_p9 = pnand %p8124_p7, %p658_p8 }
  0x1b   : > { %12274 = sst [smem:[#allocation12_spill]] %s12273_s28  ;;  %p730_p10 = scmp.lt.s32.totalorder (!%p659_p9), %s10651_s5, 1  ;;  %vm2653_vm0 = vcmask (!%p659_p9), 261120   ;;  %vm10496_vm1 = vmmov (!%p659_p9), 0   ;;  %vm2831_vm2 = vcmask (!%p659_p9), 64512   ;;  %vm4121_vm5 = vcmask (!%p659_p9), 400384  }
  0x1c   : > { %662 = sbr.rel (%p659_p9) target bundleno = 14095 (0x370f), region = 112  ;;  %s12275_s0 = sld [smem:[#allocation14_spill]] (!%p659_p9)  ;;  %vm11405_vm4 = vmpackc.low (!%p659_p9), %vm2831_vm2, %vm2831_vm2  ;;  %vm4156_vm6 = vcmask (!%p659_p9), 1040384   ;;  %vm5261_vm7 = vcmask (!%p659_p9), 523264  }
  0x1d   : > { %s12276_s7 = sld [smem:[#allocation16_spill]] (!%p659_p9)  ;;  %s12277_s27 = sld [smem:[#allocation17_spill]] (!%p659_p9) }
  0x1e   : > { %s12278_s24 = sld [smem:[#allocation13_spill]] (!%p659_p9)  ;;  %s12279_s23 = sld [smem:[#allocation15_spill]] (!%p659_p9) }
  0x1f   : > { %s12280_s3 = sld [smem:[#allocation19_spill]] (!%p659_p9)  ;;  %s10499_s6 = smov (!%p659_p9), 120  }
  0x20   : > { %s12243_s29 = smov (!%p659_p9), 48  }
  0x22   : > { %v10209_v0 = vld [vmem:[%s12275_s0 + $0x40] sm:$0xff] (!%p659_p9)   ;;  %v10213_v4 = vld [vmem:[%s12275_s0 + $0x48] sm:$0xff] (!%p659_p9)   ;;  %v10217_v12 = vld [vmem:[%s12275_s0 + $0x50] sm:$0xff] (!%p659_p9)  }
  0x23   : > { %s10683_s1 = scalar_select %p730_p10, %s10651_s5, 1  ;;  %8487 = vmatprep.subr.bf16.mxu0 %v10209_v0  ;;  %v10210_v1 = vld [vmem:[%s12275_s0] sm:$0xff]   ;;  %v10214_v7 = vld [vmem:[%s12275_s0 + $0x8] sm:$0xff]   ;;  %v10218_v14 = vld [vmem:[%s12275_s0 + $0x10] sm:$0xff]  }
  0x24   : > { %v10211_v2 = vld [vmem:[%s12275_s0 + $0xc0] sm:$0xff]   ;;  %8488 = vmatpush3.bf16.msra.mxu0 %v10210_v1  ;;  %v10215_v9 = vld [vmem:[%s12275_s0 + $0xc8] sm:$0xff]   ;;  %v10219_v15 = vld [vmem:[%s12275_s0 + $0xd0] sm:$0xff]   ;;  %s12281_s5 = sld [smem:[#allocation20_spill]] }
  0x25   : > { %s8127_s26 = sshll.u32 %s10683_s1, 3  ;;  %v10212_v3 = vld [vmem:[%s12275_s0 + $0x80] sm:$0xff]   ;;  %8527 = vmatprep.subr.bf16.mxu1 %v10211_v2  ;;  %8489 = vmatprep.subr.bf16.mxu0 %v10213_v4  ;;  %v10216_v11 = vld [vmem:[%s12275_s0 + $0x88] sm:$0xff]   ;;  %v10220_v16 = vld [vmem:[%s12275_s0 + $0x90] sm:$0xff]  }
  0x26   : > { %s738_s2 = scalar_lea.vmem %s12276_s7, %s8127_s26  ;;  %v2649_v6 = vld [vmem:[%s12277_s27] sm:$0xff]  ;;  %8528 = vmatpush3.bf16.msra.mxu1 %v10212_v3  ;;  %v10221_v17 = vld [vmem:[%s12275_s0 + $0x58] sm:$0xff]   ;;  %v10229_v25 = vld [vmem:[%s12275_s0 + $0x68] sm:$0xff]   ;;  %s9925_s27 = smul.u32 448, %s10683_s1 }
  0x27   : > { %v2647_v5 = vld [vmem:[%s738_s2] sm:$0xff]  ;;  %8529 = vmatprep.subr.bf16.mxu1 %v10215_v9  ;;  %v10222_v18 = vld [vmem:[%s12275_s0 + $0x18] sm:$0xff]   ;;  %v10230_v26 = vld [vmem:[%s12275_s0 + $0x28] sm:$0xff]   ;;  %s10498_s2 = smov 96   ;;  %s12245_s1 = smov 64  }
  0x28   : > { %v2648_v8 = vmul.f32 5.656854, %v2647_v5  ;;  %8490 = vmatpush3.bf16.msra.mxu0 %v10214_v7  ;;  %v10223_v19 = vld [vmem:[%s12275_s0 + $0xd8] sm:$0xff]   ;;  %v10225_v21 = vld [vmem:[%s12275_s0 + $0x60] sm:$0xff]   ;;  %v10231_v27 = vld [vmem:[%s12275_s0 + $0xe8] sm:$0xff]   ;;  %s10780_s4 = scalar_lea.vmem %s12278_s24, %s9925_s27  ;;  %s12254_s24 = smov 88  }
  0x29   : > { %8491 = vmatprep.subr.bf16.mxu0 %v10217_v12  ;;  %v10224_v20 = vld [vmem:[%s12275_s0 + $0x98] sm:$0xff]   ;;  %v10226_v22 = vld [vmem:[%s12275_s0 + $0x20] sm:$0xff]   ;;  %v10232_v28 = vld [vmem:[%s12275_s0 + $0xa8] sm:$0xff]   ;;  %s12252_s7 = smov 80   ;;  %s12290_s27 = smov 48  }
  0x2a   : > { %v10712_v10 = vadd.f32 %v2649_v6, %v2648_v8  ;;  %8530 = vmatpush3.bf16.msra.mxu1 %v10216_v11  ;;  %v10227_v23 = vld [vmem:[%s12275_s0 + $0xe0] sm:$0xff]   ;;  %v10233_v29 = vld [vmem:[%s12275_s0 + $0x70] sm:$0xff]   ;;  %v10237_v33 = vld [vmem:[%s12275_s0 + $0x78] sm:$0xff]  }
  0x2b   : > { %8531 = vmatprep.subr.bf16.mxu1 %v10219_v15  ;;  %v10228_v24 = vld [vmem:[%s12275_s0 + $0xa0] sm:$0xff]   ;;  %v10234_v30 = vld [vmem:[%s12275_s0 + $0x30] sm:$0xff]   ;;  %v10238_v34 = vld [vmem:[%s12275_s0 + $0x38] sm:$0xff]  }
  0x2c   : > { %v2654_v13 = vsel %vm2653_vm0, %v10712_v10, 0.0  ;;  %8492 = vmatpush3.bf16.msra.mxu0 %v10218_v14  ;;  %v10235_v31 = vld [vmem:[%s12275_s0 + $0xf0] sm:$0xff]   ;;  %v10239_v35 = vld [vmem:[%s12275_s0 + $0xf8] sm:$0xff]   ;;  %v744_v36 = vld [vmem:[%s10780_s4] sm:$0xff] }
  0x2d   : > { %2655 = vadd.xlane.f32.xlu0 %v2654_v13  ;;  %8493 = vmatprep.subr.bf16.mxu0 %v10221_v17  ;;  %v10236_v32 = vld [vmem:[%s12275_s0 + $0xb0] sm:$0xff]   ;;  %v752_v37 = vld [vmem:[%s10780_s4 + $0x40] sm:$0xff]  ;;  %v10240_v40 = vld [vmem:[%s12275_s0 + $0xb8] sm:$0xff]  }
  0x2e   : > { %8532 = vmatpush3.bf16.msra.mxu1 %v10220_v16  ;;  %v8130_v38 = vcombine.low %v744_v36, %v752_v37  ;;  %v8131_v39 = vcombine.high %v744_v36, %v752_v37  ;;  %v10241_v41 = vld [vmem:[%s12275_s0 + $0x140] sm:$0xff]   ;;  %v745_v42 = vld [vmem:[%s10780_s4 + $0x8] sm:$0xff]  ;;  %v10249_v57 = vld [vmem:[%s12275_s0 + $0x150] sm:$0xff]  }
  0x2f   : > { %8533 = vmatprep.subr.bf16.mxu1 %v10223_v19  ;;  %v753_v43 = vld [vmem:[%s10780_s4 + $0x48] sm:$0xff]  ;;  %v10242_v46 = vld [vmem:[%s12275_s0 + $0x100] sm:$0xff]   ;;  %v10250_v61 = vld [vmem:[%s12275_s0 + $0x110] sm:$0xff]  }
  0x30   : > { %8494 = vmatpush3.bf16.msra.mxu0 %v10222_v18  ;;  %2159 = vmatprep.mubr.bf16.mxu0 %v8131_v39  ;;  %v8132_v44 = vcombine.low %v745_v42, %v753_v43  ;;  %v8133_v45 = vcombine.high %v745_v42, %v753_v43  ;;  %v10243_v47 = vld [vmem:[%s12275_s0 + $0x1c0] sm:$0xff]   ;;  %v10245_v49 = vld [vmem:[%s12275_s0 + $0x148] sm:$0xff]   ;;  %v10251_v63 = vld [vmem:[%s12275_s0 + $0x1d0] sm:$0xff]  }
  0x31   : > { %8495 = vmatprep.subr.bf16.mxu0 %v10225_v21  ;;  %v10244_v48 = vld [vmem:[%s12275_s0 + $0x180] sm:$0xff]   ;;  %v10246_v50 = vld [vmem:[%s12275_s0 + $0x108] sm:$0xff]   ;;  %v10252_v0 = vld [vmem:[%s12275_s0 + $0x190] sm:$0xff]  }
  0x32   : > { %8534 = vmatpush3.bf16.msra.mxu1 %v10224_v20  ;;  %2223 = vmatprep.mubr.bf16.mxu1 %v8133_v45  ;;  %v10247_v51 = vld [vmem:[%s12275_s0 + $0x1c8] sm:$0xff]   ;;  %v760_v52 = vld [vmem:[%s10780_s4 + $0x80] sm:$0xff]  ;;  %v10253_v1 = vld [vmem:[%s12275_s0 + $0x158] sm:$0xff]  }
  0x33   : > { %8535 = vmatprep.subr.bf16.mxu1 %v10227_v23  ;;  %v768_v53 = vld [vmem:[%s10780_s4 + $0xc0] sm:$0xff]  ;;  %v10248_v55 = vld [vmem:[%s12275_s0 + $0x188] sm:$0xff]   ;;  %v10254_v2 = vld [vmem:[%s12275_s0 + $0x118] sm:$0xff]  }
  0x34   : > { %8496 = vmatpush3.bf16.msra.mxu0 %v10226_v22  ;;  %v8147_v54 = vcombine.high %v760_v52, %v768_v53  ;;  %v8146_v56 = vcombine.low %v760_v52, %v768_v53  ;;  %v761_v58 = vld [vmem:[%s10780_s4 + $0x88] sm:$0xff]  ;;  %v10255_v3 = vld [vmem:[%s12275_s0 + $0x1d8] sm:$0xff]   ;;  %v776_v4 = vld [vmem:[%s10780_s4 + $0x100] sm:$0xff] }
  0x35   : > { %8497 = vmatprep.subr.bf16.mxu0 %v10229_v25  ;;  %v769_v59 = vld [vmem:[%s10780_s4 + $0xc8] sm:$0xff]  ;;  %v784_v5 = vld [vmem:[%s10780_s4 + $0x140] sm:$0xff]  ;;  %v10256_v7 = vld [vmem:[%s12275_s0 + $0x198] sm:$0xff]  }
  0x36   : > { %8536 = vmatpush3.bf16.msra.mxu1 %v10228_v24  ;;  %v8149_v60 = vcombine.high %v761_v58, %v769_v59  ;;  %v8148_v62 = vcombine.low %v761_v58, %v769_v59  ;;  %v8163_v6 = vcombine.high %v776_v4, %v784_v5  ;;  %v8162_v8 = vcombine.low %v776_v4, %v784_v5  ;;  %v10257_v9 = vld [vmem:[%s12275_s0 + $0x160] sm:$0xff]   ;;  %v777_v11 = vld [vmem:[%s10780_s4 + $0x108] sm:$0xff]  ;;  %v10267_v25 = vld [vmem:[%s12275_s0 + $0x170] sm:$0xff]  }
  0x37   : > { %8537 = vmatprep.subr.bf16.mxu1 %v10231_v27  ;;  %v785_v12 = vld [vmem:[%s10780_s4 + $0x148] sm:$0xff]  ;;  %v10258_v14 = vld [vmem:[%s12275_s0 + $0x120] sm:$0xff]   ;;  %v754_v36 = vld [vmem:[%s10780_s4 + $0x50] sm:$0xff] }
  0x38   : > { %8498 = vmatpush3.bf16.msra.mxu0 %v10230_v26  ;;  %v8165_v13 = vcombine.high %v777_v11, %v785_v12  ;;  %v8164_v15 = vcombine.low %v777_v11, %v785_v12  ;;  %v10259_v16 = vld [vmem:[%s12275_s0 + $0x1e0] sm:$0xff]   ;;  %v10261_v18 = vld [vmem:[%s12275_s0 + $0x168] sm:$0xff]   ;;  %v10276_v39 = vld [vmem:[%s12275_s0 + $0x1b8] sm:$0xff]  }
  0x39   : > { %8499 = vmatprep.subr.bf16.mxu0 %v10233_v29  ;;  %v10260_v17 = vld [vmem:[%s12275_s0 + $0x1a0] sm:$0xff]   ;;  %v10262_v19 = vld [vmem:[%s12275_s0 + $0x128] sm:$0xff]   ;;  %v755_v42 = vld [vmem:[%s10780_s4 + $0x58] sm:$0xff] }
  0x3a   : > { %8538 = vmatpush3.bf16.msra.mxu1 %v10232_v28  ;;  %v10263_v20 = vld [vmem:[%s12275_s0 + $0x1e8] sm:$0xff]   ;;  %v792_v21 = vld [vmem:[%s10780_s4 + $0x180] sm:$0x11]  ;;  %v10269_v28 = vld [vmem:[%s12275_s0 + $0x130] sm:$0xff]  }
  0x3b   : > { %8539 = vmatprep.subr.bf16.mxu1 %v10235_v31  ;;  %v8179_v22 = vcombine.high %v792_v21, %v792_v21  ;;  %v10265_v23 = vld [vmem:[%s12275_s0 + $0x1a8] sm:$0xff]   ;;  %v8178_v24 = vcombine.low %v792_v21, %v792_v21  ;;  %v10272_v31 = vld [vmem:[%s12275_s0 + $0x1b0] sm:$0xff]   ;;  %v10278_v45 = vld [vmem:[%s12275_s0 + $0x200] sm:$0xff]  }
  0x3c   : > { %8500 = vmatpush3.bf16.msra.mxu0 %v10234_v30  ;;  %v793_v26 = vld [vmem:[%s10780_s4 + $0x188] sm:$0x11]  ;;  %v10271_v30 = vld [vmem:[%s12275_s0 + $0x1f0] sm:$0xff]   ;;  %v771_v58 = vld [vmem:[%s10780_s4 + $0xd8] sm:$0xff] }
  0x3d   : > { %8501 = vmatprep.subr.bf16.mxu0 %v10237_v33  ;;  %v8181_v27 = vcombine.high %v793_v26, %v793_v26  ;;  %v8180_v29 = vcombine.low %v793_v26, %v793_v26  ;;  %v10274_v33 = vld [vmem:[%s12275_s0 + $0x138] sm:$0xff]   ;;  %v770_v52 = vld [vmem:[%s10780_s4 + $0xd0] sm:$0xff] }
  0x3e   : > { %8540 = vmatpush3.bf16.msra.mxu1 %v10236_v32  ;;  %v10273_v32 = vld [vmem:[%s12275_s0 + $0x178] sm:$0xff]   ;;  %v786_v4 = vld [vmem:[%s10780_s4 + $0x150] sm:$0xff] }
  0x3f   : > { %8541 = vmatprep.subr.bf16.mxu1 %v10239_v35  ;;  %v746_v35 = vld [vmem:[%s10780_s4 + $0x10] sm:$0xff]  ;;  %v787_v11 = vld [vmem:[%s10780_s4 + $0x158] sm:$0xff] }
  0x40   : > { %8502 = vmatpush3.bf16.msra.mxu0 %v10238_v34  ;;  %v10275_v34 = vld [vmem:[%s12275_s0 + $0x1f8] sm:$0xff]   ;;  %v8134_v37 = vcombine.low %v746_v35, %v754_v36 }
  0x41   : > { %8567 = vmatprep.subr.bf16.mxu0 %v10241_v41  ;;  %v747_v41 = vld [vmem:[%s10780_s4 + $0x18] sm:$0xff] }
  0x42   : > { %8542 = vmatpush3.bf16.msra.mxu1 %v10240_v40  ;;  %v10277_v40 = vld [vmem:[%s12275_s0 + $0x240] sm:$0xff]   ;;  %v8136_v43 = vcombine.low %v747_v41, %v755_v42 }
  0x43   : > { %2160 = vmatmul.mubr.bf16.vlgmr.msra.gmra.mrb[0].mxu0 %v8130_v38  ;;  %8607 = vmatprep.subr.bf16.mxu1 %v10243_v47  ;;  %v8135_v38 = vcombine.high %v746_v35, %v754_v36  ;;  %v10280_v47 = vld [vmem:[%s12275_s0 + $0x280] sm:$0xff]  }
  0x44   : > { %8568 = vmatpush3.bf16.msra.mxu0 %v10242_v46  ;;  %2167 = vmatprep.mubr.bf16.mxu0 %v8147_v54  ;;  %v10279_v46 = vld [vmem:[%s12275_s0 + $0x2c0] sm:$0xff]   ;;  %v10284_v54 = vld [vmem:[%s12275_s0 + $0x288] sm:$0xff]  }
  0x45   : > { %2224 = vmatmul.mubr.bf16.vlgmr.msra.gmra.mrb[0].mxu1 %v8132_v44  ;;  %8569 = vmatprep.subr.bf16.mxu0 %v10245_v49  ;;  %v8137_v44 = vcombine.high %v747_v41, %v755_v42  ;;  %v10282_v49 = vld [vmem:[%s12275_s0 + $0x208] sm:$0xff]   ;;  %v756_v35 = vld [vmem:[%s10780_s4 + $0x60] sm:$0xff] }
  0x46   : > { %8608 = vmatpush3.bf16.msra.mxu1 %v10244_v48  ;;  %2231 = vmatprep.mubr.bf16.mxu1 %v8149_v60  ;;  %v10281_v48 = vld [vmem:[%s12275_s0 + $0x248] sm:$0xff]   ;;  %v10286_v60 = vld [vmem:[%s12275_s0 + $0x210] sm:$0xff]  }
  0x47   : > { %8609 = vmatprep.subr.bf16.mxu1 %v10247_v51  ;;  %v762_v51 = vld [vmem:[%s10780_s4 + $0x90] sm:$0xff]  ;;  %v757_v41 = vld [vmem:[%s10780_s4 + $0x68] sm:$0xff] }
  0x48   : > { %8570 = vmatpush3.bf16.msra.mxu0 %v10246_v50  ;;  %v10283_v50 = vld [vmem:[%s12275_s0 + $0x2c8] sm:$0xff]   ;;  %v8151_v53 = vcombine.high %v762_v51, %v770_v52 }
  0x49   : > { %8571 = vmatprep.subr.bf16.mxu0 %v10249_v57  ;;  %v763_v57 = vld [vmem:[%s10780_s4 + $0x98] sm:$0xff] }
  0x4a   : > { %8610 = vmatpush3.bf16.msra.mxu1 %v10248_v55  ;;  %v8150_v55 = vcombine.low %v762_v51, %v770_v52  ;;  %v8153_v59 = vcombine.high %v763_v57, %v771_v58  ;;  %v772_v51 = vld [vmem:[%s10780_s4 + $0xe0] sm:$0xff] }
  0x4b   : > { %2168 = vmatmul.mubr.bf16.gmra.mrb[4].mxu0 %v8146_v56  ;;  %8611 = vmatprep.subr.bf16.mxu1 %v10251_v63  ;;  %v10285_v56 = vld [vmem:[%s12275_s0 + $0x250] sm:$0xff]  }
  0x4c   : > { %8572 = vmatpush3.bf16.msra.mxu0 %v10250_v61  ;;  %2175 = vmatprep.mubr.bf16.mxu0 %v8163_v6  ;;  %v8152_v61 = vcombine.low %v763_v57, %v771_v58  ;;  %v10288_v63 = vld [vmem:[%s12275_s0 + $0x290] sm:$0xff]   ;;  %v10292_v6 = vld [vmem:[%s12275_s0 + $0x298] sm:$0xff]   ;;  %v773_v57 = vld [vmem:[%s10780_s4 + $0xe8] sm:$0xff] }
  0x4d   : > { %2232 = vmatmul.mubr.bf16.gmra.mrb[4].mxu1 %v8148_v62  ;;  %8573 = vmatprep.subr.bf16.mxu0 %v10253_v1  ;;  %v10287_v62 = vld [vmem:[%s12275_s0 + $0x2d0] sm:$0xff]   ;;  %v10290_v1 = vld [vmem:[%s12275_s0 + $0x218] sm:$0xff]  }
  0x4e   : > { %8612 = vmatpush3.bf16.msra.mxu1 %v10252_v0  ;;  %2239 = vmatprep.mubr.bf16.mxu1 %v8165_v13  ;;  %v10289_v0 = vld [vmem:[%s12275_s0 + $0x258] sm:$0xff]   ;;  %v10294_v13 = vld [vmem:[%s12275_s0 + $0x220] sm:$0xff]  }
  0x4f   : > { %8613 = vmatprep.subr.bf16.mxu1 %v10255_v3  ;;  %v778_v3 = vld [vmem:[%s10780_s4 + $0x110] sm:$0xff] }
  0x50   : > { %8574 = vmatpush3.bf16.msra.mxu0 %v10254_v2  ;;  %v10291_v2 = vld [vmem:[%s12275_s0 + $0x2d8] sm:$0xff]   ;;  %v8167_v5 = vcombine.high %v778_v3, %v786_v4 }
  0x51   : > { %8575 = vmatprep.subr.bf16.mxu0 %v10257_v9  ;;  %v779_v9 = vld [vmem:[%s10780_s4 + $0x118] sm:$0xff] }
  0x52   : > { %8614 = vmatpush3.bf16.msra.mxu1 %v10256_v7  ;;  %v8166_v7 = vcombine.low %v778_v3, %v786_v4  ;;  %v8169_v12 = vcombine.high %v779_v9, %v787_v11  ;;  %v788_v3 = vld [vmem:[%s10780_s4 + $0x160] sm:$0xff] }
  0x53   : > { %2176 = vmatmul.mubr.bf16.gmra.mrb[8].mxu0 %v8162_v8  ;;  %8615 = vmatprep.subr.bf16.mxu1 %v10259_v16  ;;  %v10293_v8 = vld [vmem:[%s12275_s0 + $0x260] sm:$0xff]  }
  0x54   : > { %8576 = vmatpush3.bf16.msra.mxu0 %v10258_v14  ;;  %2183 = vmatprep.mubr.bf16.mxu0 %v8179_v22  ;;  %v8168_v14 = vcombine.low %v779_v9, %v787_v11  ;;  %v10296_v16 = vld [vmem:[%s12275_s0 + $0x2a0] sm:$0xff]   ;;  %v10301_v22 = vld [vmem:[%s12275_s0 + $0x2a8] sm:$0xff]  }
  0x55   : > { %2240 = vmatmul.mubr.bf16.gmra.mrb[8].mxu1 %v8164_v15  ;;  %8577 = vmatprep.subr.bf16.mxu0 %v10261_v18  ;;  %v10295_v15 = vld [vmem:[%s12275_s0 + $0x2e0] sm:$0xff]   ;;  %v10298_v18 = vld [vmem:[%s12275_s0 + $0x228] sm:$0xff]  }
  0x56   : > { %8616 = vmatpush3.bf16.msra.mxu1 %v10260_v17  ;;  %2247 = vmatprep.mubr.bf16.mxu1 %v8181_v27  ;;  %v10297_v17 = vld [vmem:[%s12275_s0 + $0x268] sm:$0xff]   ;;  %v10305_v27 = vld [vmem:[%s12275_s0 + $0x230] sm:$0xff]  }
  0x57   : > { %8617 = vmatprep.subr.bf16.mxu1 %v10263_v20  ;;  %v794_v20 = vld [vmem:[%s10780_s4 + $0x190] sm:$0x11]  ;;  %v789_v9 = vld [vmem:[%s10780_s4 + $0x168] sm:$0xff] }
  0x58   : > { %8578 = vmatpush3.bf16.msra.mxu0 %v10262_v19  ;;  %v10299_v19 = vld [vmem:[%s12275_s0 + $0x2e8] sm:$0xff]   ;;  %v8183_v21 = vcombine.high %v794_v20, %v794_v20 }
  0x59   : > { %8579 = vmatprep.subr.bf16.mxu0 %v10267_v25  ;;  %v795_v25 = vld [vmem:[%s10780_s4 + $0x198] sm:$0x11] }
  0x5a   : > { %8618 = vmatpush3.bf16.msra.mxu1 %v10265_v23  ;;  %v8182_v23 = vcombine.low %v794_v20, %v794_v20  ;;  %v8185_v26 = vcombine.high %v795_v25, %v795_v25 }
  0x5b   : > { %2184 = vmatmul.mubr.bf16.gmra.mrb[12].mxu0 %v8178_v24  ;;  %8619 = vmatprep.subr.bf16.mxu1 %v10271_v30  ;;  %v10303_v24 = vld [vmem:[%s12275_s0 + $0x270] sm:$0xff]  }
  0x5c   : > { %8580 = vmatpush3.bf16.msra.mxu0 %v10269_v28  ;;  %2287 = vmatprep.mubr.bf16.mxu0 %v8135_v38  ;;  %v8184_v28 = vcombine.low %v795_v25, %v795_v25  ;;  %v10308_v30 = vld [vmem:[%s12275_s0 + $0x2b0] sm:$0xff]   ;;  %v10312_v38 = vld [vmem:[%s12275_s0 + $0x2b8] sm:$0xff]  }
  0x5d   : > { %2248 = vmatmul.mubr.bf16.gmra.mrb[12].mxu1 %v8180_v29  ;;  %8581 = vmatprep.subr.bf16.mxu0 %v10273_v32  ;;  %v10307_v29 = vld [vmem:[%s12275_s0 + $0x2f0] sm:$0xff]   ;;  %v10310_v32 = vld [vmem:[%s12275_s0 + $0x238] sm:$0xff]  }
  0x5e   : > { %8620 = vmatpush3.bf16.msra.mxu1 %v10272_v31  ;;  %2351 = vmatprep.mubr.bf16.mxu1 %v8137_v44  ;;  %v10309_v31 = vld [vmem:[%s12275_s0 + $0x278] sm:$0xff]   ;;  %v10314_v44 = vld [vmem:[%s12275_s0 + $0x300] sm:$0xff]  }
  0x5f   : > { %8621 = vmatprep.subr.bf16.mxu1 %v10275_v34  ;;  %v748_v34 = vld [vmem:[%s10780_s4 + $0x20] sm:$0xff] }
  0x60   : > { %8582 = vmatpush3.bf16.msra.mxu0 %v10274_v33  ;;  %v10311_v33 = vld [vmem:[%s12275_s0 + $0x2f8] sm:$0xff]   ;;  %v8138_v36 = vcombine.low %v748_v34, %v756_v35 }
  0x61   : > { %8647 = vmatprep.subr.bf16.mxu0 %v10277_v40  ;;  %v749_v40 = vld [vmem:[%s10780_s4 + $0x28] sm:$0xff] }
  0x62   : > { %8622 = vmatpush3.bf16.msra.mxu1 %v10276_v39  ;;  %v10313_v39 = vld [vmem:[%s12275_s0 + $0x340] sm:$0xff]   ;;  %v8140_v42 = vcombine.low %v749_v40, %v757_v41 }
  0x63   : > { %2288 = vmatmul.mubr.bf16.vlgmr.msra.gmra.mrb[16].mxu0 %v8134_v37  ;;  %8687 = vmatprep.subr.bf16.mxu1 %v10279_v46  ;;  %v8139_v37 = vcombine.high %v748_v34, %v756_v35  ;;  %v10316_v46 = vld [vmem:[%s12275_s0 + $0x380] sm:$0xff]   ;;  %v758_v34 = vld [vmem:[%s10780_s4 + $0x70] sm:$0xff] }
  0x64   : > { %8648 = vmatpush3.bf16.msra.mxu0 %v10278_v45  ;;  %2295 = vmatprep.mubr.bf16.mxu0 %v8151_v53  ;;  %v10315_v45 = vld [vmem:[%s12275_s0 + $0x3c0] sm:$0xff]   ;;  %v10320_v53 = vld [vmem:[%s12275_s0 + $0x388] sm:$0xff]  }
  0x65   : > { %2352 = vmatmul.mubr.bf16.vlgmr.msra.gmra.mrb[16].mxu1 %v8136_v43  ;;  %8649 = vmatprep.subr.bf16.mxu0 %v10281_v48  ;;  %v8141_v43 = vcombine.high %v749_v40, %v757_v41  ;;  %v10318_v48 = vld [vmem:[%s12275_s0 + $0x308] sm:$0xff]   ;;  %v766_v40 = vld [vmem:[%s10780_s4 + $0xb0] sm:$0xff] }
  0x66   : > { %8688 = vmatpush3.bf16.msra.mxu1 %v10280_v47  ;;  %2359 = vmatprep.mubr.bf16.mxu1 %v8153_v59  ;;  %v10317_v47 = vld [vmem:[%s12275_s0 + $0x348] sm:$0xff]   ;;  %v10322_v59 = vld [vmem:[%s12275_s0 + $0x310] sm:$0xff]  }
  0x67   : > { %8689 = vmatprep.subr.bf16.mxu1 %v10283_v50  ;;  %v764_v50 = vld [vmem:[%s10780_s4 + $0xa0] sm:$0xff] }
  0x68   : > { %8650 = vmatpush3.bf16.msra.mxu0 %v10282_v49  ;;  %v10319_v49 = vld [vmem:[%s12275_s0 + $0x3c8] sm:$0xff]   ;;  %v8155_v52 = vcombine.high %v764_v50, %v772_v51 }
  0x69   : > { %8651 = vmatprep.subr.bf16.mxu0 %v10285_v56  ;;  %v765_v56 = vld [vmem:[%s10780_s4 + $0xa8] sm:$0xff] }
  0x6a   : > { %8690 = vmatpush3.bf16.msra.mxu1 %v10284_v54  ;;  %v8154_v54 = vcombine.low %v764_v50, %v772_v51  ;;  %v8157_v58 = vcombine.high %v765_v56, %v773_v57  ;;  %v783_v51 = vld [vmem:[%s10780_s4 + $0x138] sm:$0xff] }
  0x6b   : > { %2296 = vmatmul.mubr.bf16.gmra.mrb[20].mxu0 %v8150_v55  ;;  %8691 = vmatprep.subr.bf16.mxu1 %v10287_v62  ;;  %v10321_v55 = vld [vmem:[%s12275_s0 + $0x350] sm:$0xff]  }
  0x6c   : > { %8652 = vmatpush3.bf16.msra.mxu0 %v10286_v60  ;;  %2303 = vmatprep.mubr.bf16.mxu0 %v8167_v5  ;;  %v8156_v60 = vcombine.low %v765_v56, %v773_v57  ;;  %v10324_v62 = vld [vmem:[%s12275_s0 + $0x390] sm:$0xff]   ;;  %v10328_v5 = vld [vmem:[%s12275_s0 + $0x398] sm:$0xff]  }
  0x6d   : > { %2360 = vmatmul.mubr.bf16.gmra.mrb[20].mxu1 %v8152_v61  ;;  %8653 = vmatprep.subr.bf16.mxu0 %v10289_v0  ;;  %v10323_v61 = vld [vmem:[%s12275_s0 + $0x3d0] sm:$0xff]   ;;  %v10326_v0 = vld [vmem:[%s12275_s0 + $0x318] sm:$0xff]  }
  0x6e   : > { %8692 = vmatpush3.bf16.msra.mxu1 %v10288_v63  ;;  %2367 = vmatprep.mubr.bf16.mxu1 %v8169_v12  ;;  %v10325_v63 = vld [vmem:[%s12275_s0 + $0x358] sm:$0xff]   ;;  %v10330_v12 = vld [vmem:[%s12275_s0 + $0x320] sm:$0xff]  }
  0x6f   : > { %8693 = vmatprep.subr.bf16.mxu1 %v10291_v2  ;;  %v780_v2 = vld [vmem:[%s10780_s4 + $0x120] sm:$0xff] }
  0x70   : > { %8654 = vmatpush3.bf16.msra.mxu0 %v10290_v1  ;;  %v10327_v1 = vld [vmem:[%s12275_s0 + $0x3d8] sm:$0xff]   ;;  %v8171_v4 = vcombine.high %v780_v2, %v788_v3 }
  0x71   : > { %8655 = vmatprep.subr.bf16.mxu0 %v10293_v8  ;;  %v781_v8 = vld [vmem:[%s10780_s4 + $0x128] sm:$0xff] }
  0x72   : > { %8694 = vmatpush3.bf16.msra.mxu1 %v10292_v6  ;;  %v8170_v6 = vcombine.low %v780_v2, %v788_v3  ;;  %v8173_v11 = vcombine.high %v781_v8, %v789_v9 }
  0x73   : > { %2304 = vmatmul.mubr.bf16.gmra.mrb[24].mxu0 %v8166_v7  ;;  %8695 = vmatprep.subr.bf16.mxu1 %v10295_v15  ;;  %v10329_v7 = vld [vmem:[%s12275_s0 + $0x360] sm:$0xff]  }
  0x74   : > { %8656 = vmatpush3.bf16.msra.mxu0 %v10294_v13  ;;  %2311 = vmatprep.mubr.bf16.mxu0 %v8183_v21  ;;  %v8172_v13 = vcombine.low %v781_v8, %v789_v9  ;;  %v10332_v15 = vld [vmem:[%s12275_s0 + $0x3a0] sm:$0xff]   ;;  %v10337_v21 = vld [vmem:[%s12275_s0 + $0x3a8] sm:$0xff]   ;;  %v2684_v8 = vld [vmem:[%s12215_s8 + $0x10] sm:$0xff] }
  0x75   : > { %2368 = vmatmul.mubr.bf16.gmra.mrb[24].mxu1 %v8168_v14  ;;  %8657 = vmatprep.subr.bf16.mxu0 %v10297_v17  ;;  %v10331_v14 = vld [vmem:[%s12275_s0 + $0x3e0] sm:$0xff]   ;;  %v10334_v17 = vld [vmem:[%s12275_s0 + $0x328] sm:$0xff]   ;;  %v2685_v9 = vld [vmem:[%s12215_s8 + $0x18] sm:$0xff] }
  0x76   : > { %8696 = vmatpush3.bf16.msra.mxu1 %v10296_v16  ;;  %2375 = vmatprep.mubr.bf16.mxu1 %v8185_v26  ;;  %v10333_v16 = vld [vmem:[%s12275_s0 + $0x368] sm:$0xff]   ;;  %v10341_v26 = vld [vmem:[%s12275_s0 + $0x330] sm:$0xff]  }
  0x77   : > { %8697 = vmatprep.subr.bf16.mxu1 %v10299_v19  ;;  %v796_v19 = vld [vmem:[%s10780_s4 + $0x1a0] sm:$0x11] }
  0x78   : > { %8658 = vmatpush3.bf16.msra.mxu0 %v10298_v18  ;;  %v10335_v18 = vld [vmem:[%s12275_s0 + $0x3e8] sm:$0xff]   ;;  %v8187_v20 = vcombine.high %v796_v19, %v796_v19 }
  0x79   : > { %8659 = vmatprep.subr.bf16.mxu0 %v10303_v24  ;;  %v797_v24 = vld [vmem:[%s10780_s4 + $0x1a8] sm:$0x11] }
  0x7a   : > { %8698 = vmatpush3.bf16.msra.mxu1 %v10301_v22  ;;  %v8186_v22 = vcombine.low %v796_v19, %v796_v19  ;;  %v8189_v25 = vcombine.high %v797_v24, %v797_v24 }
  0x7b   : > { %2312 = vmatmul.mubr.bf16.gmra.mrb[28].mxu0 %v8182_v23  ;;  %8699 = vmatprep.subr.bf16.mxu1 %v10307_v29  ;;  %v10339_v23 = vld [vmem:[%s12275_s0 + $0x370] sm:$0xff]  }
  0x7c   : > { %8660 = vmatpush3.bf16.msra.mxu0 %v10305_v27  ;;  %2415 = vmatprep.mubr.bf16.mxu0 %v8139_v37  ;;  %v8188_v27 = vcombine.low %v797_v24, %v797_v24  ;;  %v10344_v29 = vld [vmem:[%s12275_s0 + $0x3b0] sm:$0xff]   ;;  %v10348_v37 = vld [vmem:[%s12275_s0 + $0x3b8] sm:$0xff]  }
  0x7d   : > { %2376 = vmatmul.mubr.bf16.gmra.mrb[28].mxu1 %v8184_v28  ;;  %8661 = vmatprep.subr.bf16.mxu0 %v10309_v31  ;;  %v10343_v28 = vld [vmem:[%s12275_s0 + $0x3f0] sm:$0xff]   ;;  %v10346_v31 = vld [vmem:[%s12275_s0 + $0x338] sm:$0xff]  }
  0x7e   : > { %8700 = vmatpush3.bf16.msra.mxu1 %v10308_v30  ;;  %2479 = vmatprep.mubr.bf16.mxu1 %v8141_v43  ;;  %v10345_v30 = vld [vmem:[%s12275_s0 + $0x378] sm:$0xff]   ;;  %v774_v43 = vld [vmem:[%s10780_s4 + $0xf0] sm:$0xff] }
  0x7f   : > { %8701 = vmatprep.subr.bf16.mxu1 %v10311_v33  ;;  %v750_v33 = vld [vmem:[%s10780_s4 + $0x30] sm:$0xff]  ;;  %v8158_v50 = vcombine.low %v766_v40, %v774_v43 }
  0x80   : > { %8662 = vmatpush3.bf16.msra.mxu0 %v10310_v32  ;;  %v10347_v32 = vld [vmem:[%s12275_s0 + $0x3f8] sm:$0xff]   ;;  %v8142_v35 = vcombine.low %v750_v33, %v758_v34 }
  0x81   : > { %8727 = vmatprep.subr.bf16.mxu0 %v10313_v39  ;;  %v759_v39 = vld [vmem:[%s10780_s4 + $0x78] sm:$0xff] }
  0x82   : > { %8702 = vmatpush3.bf16.msra.mxu1 %v10312_v38  ;;  %v751_v38 = vld [vmem:[%s10780_s4 + $0x38] sm:$0xff] }
  0x83   : > { %2416 = vmatmul.mubr.bf16.vlgmr.msra.gmra.mrb[32].mxu0 %v8138_v36  ;;  %8767 = vmatprep.subr.bf16.mxu1 %v10315_v45  ;;  %v8143_v36 = vcombine.high %v750_v33, %v758_v34  ;;  %v8144_v41 = vcombine.low %v751_v38, %v759_v39  ;;  %v775_v45 = vld [vmem:[%s10780_s4 + $0xf8] sm:$0xff] }
  0x84   : > { %8728 = vmatpush3.bf16.msra.mxu0 %v10314_v44  ;;  %2423 = vmatprep.mubr.bf16.mxu0 %v8155_v52  ;;  %v767_v44 = vld [vmem:[%s10780_s4 + $0xb8] sm:$0xff] }
  0x85   : > { %2480 = vmatmul.mubr.bf16.vlgmr.msra.gmra.mrb[32].mxu1 %v8140_v42  ;;  %8729 = vmatprep.subr.bf16.mxu0 %v10317_v47  ;;  %v8145_v42 = vcombine.high %v751_v38, %v759_v39  ;;  %v8161_v47 = vcombine.high %v767_v44, %v775_v45  ;;  %v791_v52 = vld [vmem:[%s10780_s4 + $0x178] sm:$0xff] }
  0x86   : > { %8768 = vmatpush3.bf16.msra.mxu1 %v10316_v46  ;;  %2487 = vmatprep.mubr.bf16.mxu1 %v8157_v58  ;;  %v8159_v46 = vcombine.high %v766_v40, %v774_v43  ;;  %v8177_v56 = vcombine.high %v783_v51, %v791_v52 }
  0x87   : > { %8769 = vmatprep.subr.bf16.mxu1 %v10319_v49  ;;  %v790_v49 = vld [vmem:[%s10780_s4 + $0x170] sm:$0xff] }
  0x88   : > { %8730 = vmatpush3.bf16.msra.mxu0 %v10318_v48  ;;  %v782_v48 = vld [vmem:[%s10780_s4 + $0x130] sm:$0xff] }
  0x89   : > { %8731 = vmatprep.subr.bf16.mxu0 %v10321_v55 }
  0x8a   : > { %8770 = vmatpush3.bf16.msra.mxu1 %v10320_v53  ;;  %v8175_v53 = vcombine.high %v782_v48, %v790_v49 }
  0x8b   : > { %2424 = vmatmul.mubr.bf16.gmra.mrb[36].mxu0 %v8154_v54  ;;  %8771 = vmatprep.subr.bf16.mxu1 %v10323_v61  ;;  %v8160_v54 = vcombine.low %v767_v44, %v775_v45  ;;  %v8174_v61 = vcombine.low %v782_v48, %v790_v49 }
  0x8c   : > { %8732 = vmatpush3.bf16.msra.mxu0 %v10322_v59  ;;  %2431 = vmatprep.mubr.bf16.mxu0 %v8171_v4  ;;  %v798_v59 = vld [vmem:[%s10780_s4 + $0x1b0] sm:$0x11]  ;;  %v2682_v4 = vld [vmem:[%s12215_s8] sm:$0xff] }
  0x8d   : > { %2488 = vmatmul.mubr.bf16.gmra.mrb[36].mxu1 %v8156_v60  ;;  %8733 = vmatprep.subr.bf16.mxu0 %v10325_v63  ;;  %v8191_v63 = vcombine.high %v798_v59, %v798_v59 }
  0x8e   : > { %8772 = vmatpush3.bf16.msra.mxu1 %v10324_v62  ;;  %2495 = vmatprep.mubr.bf16.mxu1 %v8173_v11  ;;  %v799_v62 = vld [vmem:[%s10780_s4 + $0x1b8] sm:$0x11]  ;;  %v9683_v11 = vpack.c.bf16 %v2685_v9, %v2684_v8  ;;  %s12292_s4 = smov 40  }
  0x8f   : > { %8773 = vmatprep.subr.bf16.mxu1 %v10327_v1  ;;  %v8176_v1 = vcombine.low %v783_v51, %v791_v52  ;;  %v8193_v2 = vcombine.high %v799_v62, %v799_v62  ;;  %v8192_v3 = vcombine.low %v799_v62, %v799_v62 }
  0x90   : > { %8734 = vmatpush3.bf16.msra.mxu0 %v10326_v0 }
  0x91   : > { %8735 = vmatprep.subr.bf16.mxu0 %v10329_v7  ;;  %v10495_v7 = vmov 0.0|0.0  }
  0x92   : > { %8774 = vmatpush3.bf16.msra.mxu1 %v10328_v5  ;;  %v2683_v5 = vld [vmem:[%s12215_s8 + $0x8] sm:$0xff] }
  0x93   : > { %2432 = vmatmul.mubr.bf16.gmra.mrb[40].mxu0 %v8170_v6  ;;  %8775 = vmatprep.subr.bf16.mxu1 %v10331_v14  ;;  %v9680_v6 = vpack.c.bf16 %v2683_v5, %v2682_v4  ;;  %v8129_v14 = vld [vmem:[%s12279_s23] ss:$0 sm:$0xff]  ;;  %s12282_s23 = sld [smem:[#allocation18_spill]] }
  0x94   : > { %8736 = vmatpush3.bf16.msra.mxu0 %v10330_v12  ;;  %2439 = vmatprep.mubr.bf16.mxu0 %v8187_v20  ;;  %v10497_v12 = vmov 0.0  }
  0x95   : > { %2496 = vmatmul.mubr.bf16.gmra.mrb[40].mxu1 %v8172_v13  ;;  %8737 = vmatprep.subr.bf16.mxu0 %v10333_v16 }
  0x96   : > { %8776 = vmatpush3.bf16.msra.mxu1 %v10332_v15  ;;  %2503 = vmatprep.mubr.bf16.mxu1 %v8189_v25 }
  0x97   : > { %8777 = vmatprep.subr.bf16.mxu1 %v10335_v18 }
  0x98   : > { %8738 = vmatpush3.bf16.msra.mxu0 %v10334_v17 }
  0x99   : > { %8739 = vmatprep.subr.bf16.mxu0 %v10339_v23  ;;  %s742_s25 = scalar_lea.vmem %s12282_s23, %s8127_s26  ;;  %s12244_s26 = smov 56  }
  0x9a   : > { %8778 = vmatpush3.bf16.msra.mxu1 %v10337_v21  ;;  %s12248_s23 = smov 104  }
  0x9b   : > { %2440 = vmatmul.mubr.bf16.gmra.mrb[44].mxu0 %v8186_v22  ;;  %8779 = vmatprep.subr.bf16.mxu1 %v10343_v28 }
  0x9c   : > { %8740 = vmatpush3.bf16.msra.mxu0 %v10341_v26  ;;  %2543 = vmatprep.mubr.bf16.mxu0 %v8143_v36 }
  0x9d   : > { %2504 = vmatmul.mubr.bf16.gmra.mrb[44].mxu1 %v8188_v27  ;;  %8741 = vmatprep.subr.bf16.mxu0 %v10345_v30 }
  0x9e   : > { %8780 = vmatpush3.bf16.msra.mxu1 %v10344_v29  ;;  %2607 = vmatprep.mubr.bf16.mxu1 %v8145_v42 }
  0x9f   : > { %8781 = vmatprep.subr.bf16.mxu1 %v10347_v32 }
  0xa0   : > { %8742 = vmatpush3.bf16.msra.mxu0 %v10346_v31 }
  0xa1   : > { %9679 = vmatprep.subr.bf16.mxu0 %v10495_v7 }
  0xa2   : > { %8782 = vmatpush3.bf16.msra.mxu1 %v10348_v37 }
  0xa3   : > { %2544 = vmatmul.mubr.bf16.vlgmr.msra.gmra.mrb[48].mxu0 %v8142_v35  ;;  %9085 = vmatprep.subr.mxu1 %v10497_v12 }
  0xa4   : > { %2551 = vmatprep.mubr.bf16.mxu0 %v8159_v46  ;;  %9681 = vmatpush3.bf16.msra.mxu0 %v9680_v6 }
  0xa5   : > { %2608 = vmatmul.mubr.bf16.vlgmr.msra.gmra.mrb[48].mxu1 %v8144_v41  ;;  %9682 = vmatprep.subr.bf16.mxu0 %v10495_v7 }
  0xa6   : > { %2615 = vmatprep.mubr.bf16.mxu1 %v8161_v47 }
  0xa8   : > { %9684 = vmatpush3.bf16.msra.mxu0 %v9683_v11 }
  0xa9   : > { %9090 = vmatprep.subr.mxu0 %v10497_v12 }
  0xab   : > { %2552 = vmatmul.mubr.bf16.gmra.mrb[52].mxu0 %v8158_v50 }
  0xac   : > { %2559 = vmatprep.mubr.bf16.mxu0 %v8175_v53 }
  0xad   : > { %2616 = vmatmul.mubr.bf16.gmra.mrb[52].mxu1 %v8160_v54 }
  0xae   : > { %2623 = vmatprep.mubr.bf16.mxu1 %v8177_v56 }
  0xb3   : > { %2560 = vmatmul.mubr.bf16.gmra.mrb[56].mxu0 %v8174_v61 }
  0xb4   : > { %2567 = vmatprep.mubr.bf16.mxu0 %v8191_v63 }
  0xb5   : > { %2624 = vmatmul.mubr.bf16.gmra.mrb[56].mxu1 %v8176_v1 }
  0xb6   : > { %2631 = vmatprep.mubr.bf16.mxu1 %v8193_v2 }
  0xba   : > { %v2656_v55 = vpop.xlane.xlu0 %2655 }
  0xbb   : > { %v2658_v57 = vmul.f32 0.03125, %v2656_v55 }
  0xbd   : > { %v11140_v58 = vsub.f32 %v10712_v10, %v2658_v57  ;;  %v8190_v10 = vcombine.low %v798_v59, %v798_v59  ;;  %2632 = vmatmul.mubr.bf16.gmra.mrb[60].mxu1 %v8192_v3 }
  0xbe   : > { %9087 = vmatprep.mubr.msk.f32.mxu1 %vm10496_vm1, %v10497_v12 }
  0xbf   : > { %v2660_v60 = vmul.f32 %v11140_v58, %v11140_v58  ;;  %2568 = vmatmul.mubr.bf16.gmra.mrb[60].mxu0 %v8190_v10 }
  0xc0   : > { %9082 = vmatprep.mubr.msk.f32.mxu0 %vm10496_vm1, %v10497_v12 }
  0xc1   : > { %v2661_v0 = vsel %vm2653_vm0, %v2660_v60, 0.0 }
  0xc2   : > { %2662 = vadd.xlane.f32.xlu0 %v2661_v0 }
 0x116   : > { %v8503_v13 = vpop.f32.mrb[0].mxu0 }
 0x117   : > { %v8504_v15 = vpop.f32.mrb[1].mxu0 }
 0x118   : > { %v8505_v16 = vadd.f32 %v8504_v15, %v8503_v13  ;;  %v8506_v17 = vpop.f32.mrb[2].mxu0  ;;  %v8543_v18 = vpop.f32.mrb[0].mxu1 }
 0x119   : > { %v8507_v19 = vpop.f32.mrb[3].mxu0  ;;  %v8544_v22 = vpop.f32.mrb[1].mxu1 }
 0x11a   : > { %v2162_v20 = vadd.f32 %v8505_v16, %v8129_v14  ;;  %v8508_v21 = vadd.f32 %v8507_v19, %v8506_v17  ;;  %v8545_v23 = vadd.f32 %v8544_v22, %v8543_v18  ;;  %v8546_v24 = vpop.f32.mrb[2].mxu1 }
 0x11b   : > { %v8547_v26 = vpop.f32.mrb[3].mxu1 }
 0x11c   : > { %v2165_v25 = vadd.f32 %v8508_v21, %v8129_v14  ;;  %v2226_v27 = vadd.f32 %v8545_v23, %v2162_v20  ;;  %v8548_v28 = vadd.f32 %v8547_v26, %v8546_v24 }
 0x11e   : > { %v2229_v29 = vadd.f32 %v8548_v28, %v2165_v25  ;;  %v8509_v30 = vpop.f32.mrb[4].mxu0 }
 0x11f   : > { %v8510_v31 = vpop.f32.mrb[5].mxu0 }
 0x120   : > { %v8511_v32 = vadd.f32 %v8510_v31, %v8509_v30  ;;  %v8512_v33 = vpop.f32.mrb[6].mxu0  ;;  %v8549_v34 = vpop.f32.mrb[4].mxu1 }
 0x121   : > { %v8513_v35 = vpop.f32.mrb[7].mxu0  ;;  %v8550_v36 = vpop.f32.mrb[5].mxu1 }
 0x122   : > { %v2170_v37 = vadd.f32 %v8511_v32, %v8129_v14  ;;  %v8514_v38 = vadd.f32 %v8513_v35, %v8512_v33  ;;  %v8551_v39 = vadd.f32 %v8550_v36, %v8549_v34  ;;  %v8552_v40 = vpop.f32.mrb[6].mxu1 }
 0x123   : > { %v8553_v41 = vpop.f32.mrb[7].mxu1 }
 0x124   : > { %v2173_v42 = vadd.f32 %v8514_v38, %v8129_v14  ;;  %v2234_v43 = vadd.f32 %v8551_v39, %v2170_v37  ;;  %v8554_v44 = vadd.f32 %v8553_v41, %v8552_v40 }
 0x126   : > { %v2237_v45 = vadd.f32 %v8554_v44, %v2173_v42  ;;  %v8515_v46 = vpop.f32.mrb[8].mxu0 }
 0x127   : > { %v8516_v47 = vpop.f32.mrb[9].mxu0 }
 0x128   : > { %v8517_v48 = vadd.f32 %v8516_v47, %v8515_v46  ;;  %v8518_v49 = vpop.f32.mrb[10].mxu0  ;;  %v8555_v50 = vpop.f32.mrb[8].mxu1 }
 0x129   : > { %v8519_v51 = vpop.f32.mrb[11].mxu0  ;;  %v8556_v54 = vpop.f32.mrb[9].mxu1 }
 0x12a   : > { %v2178_v52 = vadd.f32 %v8517_v48, %v8129_v14  ;;  %v8520_v53 = vadd.f32 %v8519_v51, %v8518_v49  ;;  %v8557_v55 = vadd.f32 %v8556_v54, %v8555_v50  ;;  %v8558_v56 = vpop.f32.mrb[10].mxu1 }
 0x12b   : > { %v8559_v59 = vpop.f32.mrb[11].mxu1 }
 0x12c   : > { %v2181_v57 = vadd.f32 %v8520_v53, %v8129_v14  ;;  %v2242_v60 = vadd.f32 %v8557_v55, %v2178_v52  ;;  %v8560_v61 = vadd.f32 %v8559_v59, %v8558_v56 }
 0x12e   : > { %v8521_v62 = vpop.f32.mrb[12].mxu0  ;;  %v2245_v63 = vadd.f32 %v8560_v61, %v2181_v57 }
 0x12f   : > { %v8522_v0 = vpop.f32.mrb[13].mxu0 }
 0x130   : > { %v8523_v1 = vadd.f32 %v8522_v0, %v8521_v62  ;;  %v8524_v2 = vpop.f32.mrb[14].mxu0  ;;  %v8561_v10 = vpop.f32.mrb[12].mxu1 }
 0x131   : > { %v8525_v3 = vpop.f32.mrb[15].mxu0  ;;  %v8562_v4 = vpop.f32.mrb[13].mxu1 }
 0x132   : > { %v2186_v5 = vadd.f32 %v8523_v1, %v8129_v14  ;;  %v8563_v6 = vadd.f32 %v8562_v4, %v8561_v10  ;;  %v8564_v8 = vpop.f32.mrb[14].mxu1 }
 0x133   : > { %v8565_v9 = vpop.f32.mrb[15].mxu1 }
 0x134   : > { %v2250_v11 = vadd.f32 %v8563_v6, %v2186_v5 }
 0x136   : > { %v8583_v13 = vpop.f32.mrb[16].mxu0 }
 0x137   : > { %v8584_v15 = vpop.f32.mrb[17].mxu0 }
 0x138   : > { %v8585_v16 = vadd.f32 %v8584_v15, %v8583_v13  ;;  %v8586_v17 = vpop.f32.mrb[18].mxu0  ;;  %v8623_v18 = vpop.f32.mrb[16].mxu1 }
 0x139   : > { %v8587_v19 = vpop.f32.mrb[19].mxu0  ;;  %v8624_v22 = vpop.f32.mrb[17].mxu1 }
 0x13a   : > { %v2290_v20 = vadd.f32 %v8585_v16, %v2226_v27  ;;  %v8588_v21 = vadd.f32 %v8587_v19, %v8586_v17  ;;  %v8625_v23 = vadd.f32 %v8624_v22, %v8623_v18  ;;  %v8626_v24 = vpop.f32.mrb[18].mxu1  ;;  %v8322_v17 = vld [vmem:[%s12280_s3] ss:$0 sm:$0xff]  ;;  %s12250_s3 = smov 112  }
 0x13b   : > { %v8627_v26 = vpop.f32.mrb[19].mxu1 }
 0x13c   : > { %v2293_v25 = vadd.f32 %v8588_v21, %v2229_v29  ;;  %v11170_v28 = vadd.f32 %v8625_v23, %v2290_v20  ;;  %v8628_v14 = vadd.f32 %v8627_v26, %v8626_v24  ;;  %v8323_v20 = vld [vmem:[%s12281_s5] ss:$0 sm:$0xff]  ;;  %s12242_s5 = smov 40  }
 0x13e   : > { %v8589_v30 = vpop.f32.mrb[20].mxu0  ;;  %v11172_v31 = vadd.f32 %v8628_v14, %v2293_v25 }
 0x13f   : > { %v8590_v32 = vpop.f32.mrb[21].mxu0 }
 0x140   : > { %v8591_v33 = vadd.f32 %v8590_v32, %v8589_v30  ;;  %v8592_v34 = vpop.f32.mrb[22].mxu0  ;;  %v8629_v35 = vpop.f32.mrb[20].mxu1 }
 0x141   : > { %v8593_v36 = vpop.f32.mrb[23].mxu0  ;;  %v8630_v27 = vpop.f32.mrb[21].mxu1 }
 0x142   : > { %v2298_v37 = vadd.f32 %v8591_v33, %v2234_v43  ;;  %v8594_v38 = vadd.f32 %v8593_v36, %v8592_v34  ;;  %v8631_v39 = vadd.f32 %v8630_v27, %v8629_v35  ;;  %v8632_v40 = vpop.f32.mrb[22].mxu1 }
 0x143   : > { %v8633_v42 = vpop.f32.mrb[23].mxu1 }
 0x144   : > { %v2301_v41 = vadd.f32 %v8594_v38, %v2237_v45  ;;  %v11174_v29 = vadd.f32 %v8631_v39, %v2298_v37  ;;  %v8634_v44 = vadd.f32 %v8633_v42, %v8632_v40 }
 0x146   : > { %v11176_v47 = vadd.f32 %v8634_v44, %v2301_v41  ;;  %v8595_v49 = vpop.f32.mrb[24].mxu0 }
 0x147   : > { %v8596_v50 = vpop.f32.mrb[25].mxu0 }
 0x148   : > { %v8597_v52 = vadd.f32 %v8596_v50, %v8595_v49  ;;  %v8598_v53 = vpop.f32.mrb[26].mxu0  ;;  %v8635_v54 = vpop.f32.mrb[24].mxu1 }
 0x149   : > { %v8599_v43 = vpop.f32.mrb[27].mxu0  ;;  %v8636_v55 = vpop.f32.mrb[25].mxu1 }
 0x14a   : > { %v2306_v56 = vadd.f32 %v8597_v52, %v2242_v60  ;;  %v8600_v57 = vadd.f32 %v8599_v43, %v8598_v53  ;;  %v8637_v45 = vadd.f32 %v8636_v55, %v8635_v54  ;;  %v8638_v59 = vpop.f32.mrb[26].mxu1 }
 0x14b   : > { %v8639_v61 = vpop.f32.mrb[27].mxu1 }
 0x14c   : > { %v2309_v62 = vadd.f32 %v8600_v57, %v2245_v63  ;;  %v2370_v0 = vadd.f32 %v8637_v45, %v2306_v56  ;;  %v8640_v1 = vadd.f32 %v8639_v61, %v8638_v59 }
 0x14e   : > { %v11178_v2 = vadd.f32 %v8640_v1, %v2309_v62  ;;  %v8601_v10 = vpop.f32.mrb[28].mxu0 }
 0x14f   : > { %v2663_v46 = vpop.xlane.xlu0 %2662  ;;  %v8602_v3 = vpop.f32.mrb[29].mxu0 }
 0x150   : > { %v2664_v48 = vmul.f32 0.03125, %v2663_v46  ;;  %v8603_v4 = vadd.f32 %v8602_v3, %v8601_v10  ;;  %v8604_v5 = vpop.f32.mrb[30].mxu0  ;;  %v8641_v6 = vpop.f32.mrb[28].mxu1 }
 0x151   : > { %v8605_v8 = vpop.f32.mrb[31].mxu0  ;;  %v8642_v9 = vpop.f32.mrb[29].mxu1 }
 0x152   : > { %v2665_v51 = vadd.f32 1e-06, %v2664_v48  ;;  %v2314_v13 = vadd.f32 %v8603_v4, %v2250_v11  ;;  %v8643_v15 = vadd.f32 %v8642_v9, %v8641_v6  ;;  %v8644_v16 = vpop.f32.mrb[30].mxu1 }
 0x153   : > { %v8645_v63 = vpop.f32.mrb[31].mxu1 }
 0x154   : > { %10353 = vrsqrt.f32 %v2665_v51  ;;  %v2378_v19 = vadd.f32 %v8643_v15, %v2314_v13 }
 0x156   : > { %v8663_v22 = vpop.f32.mrb[32].mxu0 }
 0x157   : > { %v8664_v11 = vpop.f32.mrb[33].mxu0 }
 0x158   : > { %v8665_v24 = vadd.f32 %v8664_v11, %v8663_v22  ;;  %v8666_v25 = vpop.f32.mrb[34].mxu0  ;;  %v8703_v26 = vpop.f32.mrb[32].mxu1 }
 0x159   : > { %v8667_v14 = vpop.f32.mrb[35].mxu0  ;;  %v8704_v30 = vpop.f32.mrb[33].mxu1 }
 0x15a   : > { %v8668_v32 = vadd.f32 %v8667_v14, %v8666_v25  ;;  %v8705_v33 = vadd.f32 %v8704_v30, %v8703_v26  ;;  %v8706_v34 = vpop.f32.mrb[34].mxu1 }
 0x15b   : > { %v8707_v35 = vpop.f32.mrb[35].mxu1 }
 0x15c   : > { %v2421_v36 = vadd.f32 %v8668_v32, %v11172_v31  ;;  %v8708_v38 = vadd.f32 %v8707_v35, %v8706_v34 }
 0x15e   : > { %v10354_v60 = vpop.eup %10353  ;;  %v2485_v27 = vadd.f32 %v8708_v38, %v2421_v36  ;;  %v8669_v39 = vpop.f32.mrb[36].mxu0 }
 0x15f   : > { %v2667_v18 = vmul.f32 %v10354_v60, %v11140_v58  ;;  %v2418_v58 = vadd.f32 %v8665_v24, %v11170_v28  ;;  %v8670_v40 = vpop.f32.mrb[37].mxu0 }
 0x160   : > { %v8671_v41 = vadd.f32 %v8670_v40, %v8669_v39  ;;  %v8672_v42 = vpop.f32.mrb[38].mxu0  ;;  %v8709_v44 = vpop.f32.mrb[36].mxu1 }
 0x161   : > { %v2674_v21 = vmul.f32 %v8322_v17, %v2667_v18  ;;  %v2482_v37 = vadd.f32 %v8705_v33, %v2418_v58  ;;  %v8673_v46 = vpop.f32.mrb[39].mxu0  ;;  %v8710_v49 = vpop.f32.mrb[37].mxu1 }
 0x162   : > { %v2426_v28 = vadd.f32 %v8671_v41, %v11174_v29  ;;  %v8674_v48 = vadd.f32 %v8673_v46, %v8672_v42  ;;  %v8711_v50 = vadd.f32 %v8710_v49, %v8709_v44  ;;  %v8712_v51 = vpop.f32.mrb[38].mxu1 }
 0x163   : > { %v11187_v23 = vadd.f32 %v8323_v20, %v2674_v21  ;;  %v8713_v53 = vpop.f32.mrb[39].mxu1 }
 0x164   : > { %v2429_v52 = vadd.f32 %v8674_v48, %v11176_v47  ;;  %v2490_v54 = vadd.f32 %v8711_v50, %v2426_v28  ;;  %v8714_v31 = vadd.f32 %v8713_v53, %v8712_v51 }
 0x165   : > { %9083 = vmatmul.mubr.msk.f32.vlgmr.msra.gmra.mrb[64].mxu0 %vm2653_vm0, %v11187_v23 }
 0x166   : > { %9092 = vmatprep.mubr.msk.f32.mxu0 %vm10496_vm1, %v10497_v12  ;;  %v8675_v43 = vpop.f32.mrb[40].mxu0  ;;  %v2493_v55 = vadd.f32 %v8714_v31, %v2429_v52 }
 0x167   : > { %v8676_v56 = vpop.f32.mrb[41].mxu0 }
 0x168   : > { %v8677_v57 = vadd.f32 %v8676_v56, %v8675_v43  ;;  %v8678_v45 = vpop.f32.mrb[42].mxu0  ;;  %v8715_v59 = vpop.f32.mrb[40].mxu1 }
 0x169   : > { %v8679_v61 = vpop.f32.mrb[43].mxu0  ;;  %v8716_v10 = vpop.f32.mrb[41].mxu1 }
 0x16a   : > { %v2434_v62 = vadd.f32 %v8677_v57, %v2370_v0  ;;  %v8680_v1 = vadd.f32 %v8679_v61, %v8678_v45  ;;  %v8717_v29 = vadd.f32 %v8716_v10, %v8715_v59  ;;  %v8718_v3 = vpop.f32.mrb[42].mxu1 }
 0x16b   : > { %v8719_v5 = vpop.f32.mrb[43].mxu1 }
 0x16c   : > { %v2437_v4 = vadd.f32 %v8680_v1, %v11178_v2  ;;  %v2498_v6 = vadd.f32 %v8717_v29, %v2434_v62  ;;  %v8720_v47 = vadd.f32 %v8719_v5, %v8718_v3 }
 0x16e   : > { %v8681_v8 = vpop.f32.mrb[44].mxu0  ;;  %v2501_v9 = vadd.f32 %v8720_v47, %v2437_v4 }
 0x16f   : > { %v8682_v13 = vpop.f32.mrb[45].mxu0 }
 0x170   : > { %v8683_v15 = vadd.f32 %v8682_v13, %v8681_v8  ;;  %v8684_v16 = vpop.f32.mrb[46].mxu0  ;;  %v8721_v60 = vpop.f32.mrb[44].mxu1 }
 0x171   : > { %v8685_v17 = vpop.f32.mrb[47].mxu0  ;;  %v8722_v18 = vpop.f32.mrb[45].mxu1 }
 0x172   : > { %v2442_v63 = vadd.f32 %v8683_v15, %v2378_v19  ;;  %v8723_v20 = vadd.f32 %v8722_v18, %v8721_v60  ;;  %v8724_v0 = vpop.f32.mrb[46].mxu1 }
 0x173   : > { %v8725_v21 = vpop.f32.mrb[47].mxu1 }
 0x174   : > { %v2506_v22 = vadd.f32 %v8723_v20, %v2442_v63 }
 0x176   : > { %v8743_v11 = vpop.f32.mrb[48].mxu0 }
 0x177   : > { %v8744_v24 = vpop.f32.mrb[49].mxu0 }
 0x178   : > { %v8745_v25 = vadd.f32 %v8744_v24, %v8743_v11  ;;  %v8746_v2 = vpop.f32.mrb[50].mxu0  ;;  %v8783_v26 = vpop.f32.mrb[48].mxu1 }
 0x179   : > { %v8747_v14 = vpop.f32.mrb[51].mxu0  ;;  %v8784_v30 = vpop.f32.mrb[49].mxu1 }
 0x17a   : > { %v2546_v58 = vadd.f32 %v8745_v25, %v2482_v37  ;;  %v8748_v32 = vadd.f32 %v8747_v14, %v8746_v2  ;;  %v8785_v33 = vadd.f32 %v8784_v30, %v8783_v26  ;;  %v8786_v34 = vpop.f32.mrb[50].mxu1  ;;  %v11239_v14 = vld [vmem:[%s742_s25] sm:$0xff]  ;;  %s12246_s25 = smov 72  }
 0x17b   : > { %v8787_v35 = vpop.f32.mrb[51].mxu1  ;;  %vm2907_vm3 = vcmp.eq.s32.totalorder %v11239_v14, 0 }
 0x17c   : > { %v2549_v36 = vadd.f32 %v8748_v32, %v2485_v27  ;;  %v11198_v38 = vadd.f32 %v8785_v33, %v2546_v58  ;;  %v8788_v19 = vadd.f32 %v8787_v35, %v8786_v34 }
 0x17e   : > { %v11200_v39 = vadd.f32 %v8788_v19, %v2549_v36  ;;  %v8749_v40 = vpop.f32.mrb[52].mxu0 }
 0x17f   : > { %v8750_v41 = vpop.f32.mrb[53].mxu0 }
 0x180   : > { %v8751_v42 = vadd.f32 %v8750_v41, %v8749_v40  ;;  %v8752_v44 = vpop.f32.mrb[54].mxu0  ;;  %v8789_v46 = vpop.f32.mrb[52].mxu1 }
 0x181   : > { %v8753_v28 = vpop.f32.mrb[55].mxu0  ;;  %v8790_v48 = vpop.f32.mrb[53].mxu1 }
 0x182   : > { %v2554_v49 = vadd.f32 %v8751_v42, %v2490_v54  ;;  %v8754_v50 = vadd.f32 %v8753_v28, %v8752_v44  ;;  %v8791_v37 = vadd.f32 %v8790_v48, %v8789_v46  ;;  %v8792_v51 = vpop.f32.mrb[54].mxu1 }
 0x183   : > { %v8793_v52 = vpop.f32.mrb[55].mxu1 }
 0x184   : > { %v2557_v53 = vadd.f32 %v8754_v50, %v2493_v55  ;;  %v11202_v31 = vadd.f32 %v8791_v37, %v2554_v49  ;;  %v8794_v27 = vadd.f32 %v8793_v52, %v8792_v51  ;;  %v2691_v51 = vld [vmem:[%s12216_s9 + $0x8] sm:$0xff] }
 0x186   : > { %v11204_v43 = vadd.f32 %v8794_v27, %v2557_v53  ;;  %v8755_v56 = vpop.f32.mrb[56].mxu0 }
 0x187   : > { %v8756_v57 = vpop.f32.mrb[57].mxu0 }
 0x188   : > { %v8757_v45 = vadd.f32 %v8756_v57, %v8755_v56  ;;  %v8758_v59 = vpop.f32.mrb[58].mxu0  ;;  %v8795_v61 = vpop.f32.mrb[56].mxu1 }
 0x189   : > { %v8759_v62 = vpop.f32.mrb[59].mxu0  ;;  %v8796_v1 = vpop.f32.mrb[57].mxu1 }
 0x18a   : > { %v2562_v10 = vadd.f32 %v8757_v45, %v2498_v6  ;;  %v8760_v29 = vadd.f32 %v8759_v62, %v8758_v59  ;;  %v8797_v54 = vadd.f32 %v8796_v1, %v8795_v61  ;;  %v8798_v3 = vpop.f32.mrb[58].mxu1  ;;  %v2690_v62 = vld [vmem:[%s12216_s9] sm:$0xff] }
 0x18b   : > { %v8799_v4 = vpop.f32.mrb[59].mxu1 }
 0x18c   : > { %v2565_v5 = vadd.f32 %v8760_v29, %v2501_v9  ;;  %v11206_v47 = vadd.f32 %v8797_v54, %v2562_v10  ;;  %v8800_v55 = vadd.f32 %v8799_v4, %v8798_v3 }
 0x18e   : > { %v11208_v8 = vadd.f32 %v8800_v55, %v2565_v5 }
 0x190   : > { %v8801_v60 = vpop.f32.mrb[60].mxu1 }
 0x191   : > { %v8802_v63 = vpop.f32.mrb[61].mxu1 }
 0x192   : > { %v8761_v13 = vpop.f32.mrb[60].mxu0  ;;  %v8803_v0 = vadd.f32 %v8802_v63, %v8801_v60  ;;  %v8804_v6 = vpop.f32.mrb[62].mxu1 }
 0x193   : > { %v8762_v15 = vpop.f32.mrb[61].mxu0  ;;  %v8805_v21 = vpop.f32.mrb[63].mxu1 }
 0x194   : > { %v8763_v16 = vadd.f32 %v8762_v15, %v8761_v13  ;;  %v8764_v17 = vpop.f32.mrb[62].mxu0 }
 0x195   : > { %v8765_v18 = vpop.f32.mrb[63].mxu0 }
 0x196   : > { %v2570_v20 = vadd.f32 %v8763_v16, %v2506_v22 }
 0x198   : > { %v11210_v11 = vadd.f32 %v8803_v0, %v2570_v20 }
 0x238   : > { %v11212_v24 = vpop.f32.mrb[64].mxu0 }
 0x239   : > { %2829 = vrot.lane.b32.xlu1 %v11212_v24, %s10498_s2  ;;  %v9084_v9 = vpop.f32.mrb[65].mxu0  ;;  %v11217_v25 = vmul.f32 0.35355338, %v11212_v24 }
 0x23b   : > { %2996 = vrot.lane.b32.xlu0 %v11217_v25, %s10499_s6 }
 0x23d   : > { %2998 = vrot.lane.b32.xlu1 %v11212_v24, %s12254_s24 }
 0x2ab   : > { %v2830_v22 = vpop.permute.xlu1 %2829 }
 0x2ac   : > { %9086 = vmatpush3.xpose.msk.msra.mxu1 %vm2831_vm2, %v2830_v22 }
 0x2ad   : > { %9095 = vmatprep.subr.mxu1 %v10497_v12  ;;  %v2997_v26 = vpop.permute.xlu0 %2996 }
 0x2af   : > { %v2999_v2 = vpop.permute.xlu1 %2998  ;;  %9088 = vmatmul.mubr.msk.f32.vlgmr.msra.gmra.mrb[64].mxu1 %vm2831_vm2, %v11217_v25 }
 0x2b0   : > { %9096 = vmatpush3.xpose.msk.msra.mxu1 %vm2831_vm2, %v2999_v2  ;;  %9097 = vmatprep.mubr.msk.f32.mxu1 %vm10496_vm1, %v10497_v12 }
 0x2b1   : > { %9105 = vmatprep.subr.mxu1 %v10497_v12 }
 0x2b3   : > { %9098 = vmatmul.mubr.msk.f32.vlgmr.msra.gmra.mrb[66].mxu1 %vm2831_vm2, %v2997_v26 }
 0x2b4   : > { %9107 = vmatprep.mubr.msk.f32.mxu1 %vm10496_vm1, %v10497_v12  ;;  %9106 = vmatpush3.msra.mxu1 %v2691_v51 }
 0x2b5   : > { %9115 = vmatprep.subr.mxu1 %v10497_v12 }
 0x382   : > { %v2903_v30 = vpop.f32.mrb[64].mxu1 }
 0x383   : > { %v2908_v58 = vsel %vm2907_vm3, -1e+09, %v2903_v30  ;;  %v9089_v32 = vpop.f32.mrb[65].mxu1 }
 0x384   : > { %v2909_v33 = vsel %vm2831_vm2, %v2908_v58, -inf  ;;  %v2692_v32 = vld [vmem:[%s12216_s9 + $0x10] sm:$0xff] }
 0x385   : > { %2910 = vmax.xlane.f32.xlu1 %v2909_v33 }
 0x386   : > { %v3070_v34 = vpop.f32.mrb[66].mxu1 }
 0x387   : > { %v3074_v35 = vsel %vm2907_vm3, -1e+09, %v3070_v34  ;;  %v9099_v36 = vpop.f32.mrb[67].mxu1 }
 0x388   : > { %v3075_v19 = vsel %vm2831_vm2, %v3074_v35, -inf }
 0x389   : > { %3076 = vmax.xlane.f32.xlu0 %v3075_v19 }
 0x39f   : > { %3086 = vrot.lane.b32.xlu0 %v11212_v24, %s12244_s26  ;;  %s12285_s26 = smov 72  }
 0x412   : > { %v2911_v40 = vpop.xlane.xlu1 %2910 }
 0x413   : > { %v2912_v41 = vsub.f32 %v2908_v58, %v2911_v40 }
 0x415   : > { %v2913_v42 = vmul.f32 1.442695, %v2912_v41 }
 0x416   : > { %v3077_v44 = vpop.xlane.xlu0 %3076 }
 0x417   : > { %10355 = vpow2.f32 %v2913_v42  ;;  %v3078_v46 = vsub.f32 %v3074_v35, %v3077_v44 }
 0x419   : > { %v3079_v28 = vmul.f32 1.442695, %v3078_v46 }
 0x41a   : > { %v3087_v45 = vpop.permute.xlu0 %3086 }
 0x41b   : > { %10357 = vpow2.f32 %v3079_v28 }
 0x421   : > { %v10356_v48 = vpop.eup %10355 }
 0x422   : > { %v2915_v49 = vsel %vm2831_vm2, %v10356_v48, 0.0 }
 0x423   : > { %2916 = vadd.xlane.f32.xlu1 %v2915_v49 }
 0x425   : > { %v10358_v50 = vpop.eup %10357 }
 0x426   : > { %v3081_v37 = vsel %vm2831_vm2, %v10358_v50, 0.0 }
 0x427   : > { %3082 = vadd.xlane.f32.xlu1 %v3081_v37 }
 0x438   : > { %2920 = vrot.lane.b32.xlu1 %v11212_v24, %s12245_s1  ;;  %s12291_s1 = smov 104  }
 0x43c   : > { %3310 = vrot.lane.b32.xlu1 %v11212_v24, %s12252_s7 }
 0x440   : > { %3308 = vrot.lane.b32.xlu1 %v11217_v25, %s12250_s3 }
 0x4b0   : > { %v2917_v52 = vpop.xlane.xlu1 %2916 }
 0x4b1   : > { %10359 = vrcp.f32 %v2917_v52 }
 0x4b4   : > { %v3083_v53 = vpop.xlane.xlu1 %3082 }
 0x4b5   : > { %10361 = vrcp.f32 %v3083_v53 }
 0x4b8   : > { %v2921_v27 = vpop.permute.xlu1 %2920 }
 0x4b9   : > { %9091 = vmatpush3.msra.mxu0 %v2921_v27 }
 0x4ba   : > { %9100 = vmatprep.subr.mxu0 %v10497_v12 }
 0x4bb   : > { %v10360_v56 = vpop.eup %10359 }
 0x4bc   : > { %v2919_v57 = vmul.f32 %v10360_v56, %v10356_v48  ;;  %v3311_v29 = vpop.permute.xlu1 %3310 }
 0x4be   : > { %9093 = vmatmul.mubr.msk.f32.vlgmr.msra.gmra.mrb[66].mxu0 %vm2831_vm2, %v2919_v57  ;;  %v2702_v57 = vld [vmem:[%s12219_s12] sm:$0xff] }
 0x4bf   : > { %v10362_v59 = vpop.eup %10361  ;;  %9101 = vmatpush3.msra.mxu0 %v3087_v45  ;;  %9102 = vmatprep.mubr.msk.f32.mxu0 %vm10496_vm1, %v10497_v12  ;;  %v2703_v45 = vld [vmem:[%s12219_s12 + $0x8] sm:$0xff] }
 0x4c0   : > { %v3085_v61 = vmul.f32 %v10362_v59, %v10358_v50  ;;  %9110 = vmatprep.subr.mxu0 %v10497_v12  ;;  %v3309_v4 = vpop.permute.xlu1 %3308  ;;  %v9979_v59 = vpack.i.bf16 %v2703_v45, %v2702_v57 }
 0x4c2   : > { %9103 = vmatmul.mubr.msk.f32.vlgmr.msra.gmra.mrb[68].mxu0 %vm2831_vm2, %v3085_v61  ;;  %v9686_v61 = vpack.c.bf16 %v2703_v45, %v2702_v57 }
 0x4c3   : > { %9112 = vmatprep.mubr.msk.f32.mxu0 %vm10496_vm1, %v10497_v12  ;;  %9111 = vmatpush3.msra.mxu0 %v2690_v62  ;;  %v2704_v62 = vld [vmem:[%s12219_s12 + $0x10] sm:$0xff] }
 0x4c4   : > { %9120 = vmatprep.subr.mxu0 %v10497_v12 }
 0x591   : > { %v2992_v1 = vpop.f32.mrb[66].mxu0 }
 0x592   : > { %v9094_v10 = vpop.f32.mrb[67].mxu0  ;;  %9113 = vmatmul.mubr.msk.f32.vlgmr.msra.gmra.mrb[70].mxu0 %vm2831_vm2, %v2992_v1  ;;  %v2705_v1 = vld [vmem:[%s12219_s12 + $0x18] sm:$0xff] }
 0x593   : > { %9122 = vmatprep.mubr.msk.f32.mxu0 %vm10496_vm1, %v10497_v12  ;;  %v9984_v10 = vpack.i.bf16 %v2705_v1, %v2704_v62 }
 0x595   : > { %v3158_v54 = vpop.f32.mrb[68].mxu0 }
 0x596   : > { %v9104_v3 = vpop.f32.mrb[69].mxu0  ;;  %9108 = vmatmul.mubr.msk.f32.vlgmr.msra.gmra.mrb[68].mxu1 %vm2831_vm2, %v3158_v54 }
 0x597   : > { %9116 = vmatpush3.xpose.msk.msra.mxu1 %vm2831_vm2, %v3311_v29  ;;  %9117 = vmatprep.mubr.msk.f32.mxu1 %vm10496_vm1, %v10497_v12  ;;  %v9689_v29 = vpack.c.bf16 %v2705_v1, %v2704_v62 }
 0x598   : > { %9125 = vmatprep.subr.mxu1 %v10497_v12 }
 0x59a   : > { %9118 = vmatmul.mubr.msk.f32.vlgmr.msra.gmra.mrb[70].mxu1 %vm2831_vm2, %v3309_v4 }
 0x59b   : > { %9127 = vmatprep.mubr.msk.f32.mxu1 %vm10496_vm1, %v10497_v12  ;;  %9126 = vmatpush3.msra.mxu1 %v2692_v32  ;;  %v2645_v32 = vmax.f32 %v11210_v11, 0.0 }
 0x59c   : > { %9135 = vmatprep.subr.mxu1 %v10497_v12 }
 0x665   : > { %v3304_v5 = vpop.f32.mrb[70].mxu0 }
 0x666   : > { %v9114_v55 = vpop.f32.mrb[71].mxu0 }
 0x669   : > { %v3231_v13 = vpop.f32.mrb[68].mxu1 }
 0x66a   : > { %v3305_v15 = vadd.f32 %v3304_v5, %v3231_v13  ;;  %v9109_v16 = vpop.f32.mrb[69].mxu1 }
 0x66d   : > { %v3382_v60 = vpop.f32.mrb[70].mxu1 }
 0x66e   : > { %v3386_v17 = vsel %vm2907_vm3, -1e+09, %v3382_v60  ;;  %v9119_v63 = vpop.f32.mrb[71].mxu1 }
 0x66f   : > { %v3387_v18 = vsel %vm2831_vm2, %v3386_v17, -inf }
 0x670   : > { %3388 = vmax.xlane.f32.xlu1 %v3387_v18 }
 0x681   : > { %3398 = vrot.lane.b32.xlu1 %v11212_v24, %s12243_s29  ;;  %s12286_s29 = smov 64  }
 0x685   : > { %3548 = vrot.lane.b32.xlu1 %v11217_v25, %s12248_s23 }
 0x6fd   : > { %v3389_v20 = vpop.xlane.xlu1 %3388 }
 0x6fe   : > { %v3390_v0 = vsub.f32 %v3386_v17, %v3389_v20 }
 0x700   : > { %v3391_v6 = vmul.f32 1.442695, %v3390_v0 }
 0x701   : > { %v3399_v21 = vpop.permute.xlu1 %3398 }
 0x702   : > { %10363 = vpow2.f32 %v3391_v6  ;;  %9121 = vmatpush3.msra.mxu0 %v3399_v21 }
 0x703   : > { %9130 = vmatprep.subr.mxu0 %v10497_v12 }
 0x705   : > { %v3549_v58 = vpop.permute.xlu1 %3548 }
 0x70c   : > { %v10364_v9 = vpop.eup %10363 }
 0x70d   : > { %v3393_v22 = vsel %vm2831_vm2, %v10364_v9, 0.0 }
 0x70e   : > { %3394 = vadd.xlane.f32.xlu0 %v3393_v22  ;;  %v2639_v22 = vmax.f32 %v11198_v38, 0.0 }
 0x724   : > { %3550 = vrot.lane.b32.xlu0 %v11212_v24, %s12246_s25  ;;  %s12288_s25 = smov 112  }
 0x79b   : > { %v3395_v2 = vpop.xlane.xlu0 %3394 }
 0x79c   : > { %10365 = vrcp.f32 %v3395_v2  ;;  %v2640_v2 = vmax.f32 %v11200_v39, 0.0 }
 0x79f   : > { %v3551_v30 = vpop.permute.xlu0 %3550 }
 0x7a6   : > { %v10366_v26 = vpop.eup %10365 }
 0x7a7   : > { %v3397_v25 = vmul.f32 %v10366_v26, %v10364_v9  ;;  %v2641_v26 = vmax.f32 %v11202_v31, 0.0 }
 0x7a9   : > { %9123 = vmatmul.mubr.msk.f32.vlgmr.msra.gmra.mrb[72].mxu0 %vm2831_vm2, %v3397_v25  ;;  %v2642_v25 = vmax.f32 %v11204_v43, 0.0 }
 0x7aa   : > { %9131 = vmatpush3.xpose.msk.msra.mxu0 %vm2831_vm2, %v3551_v30  ;;  %9132 = vmatprep.mubr.msk.f32.mxu0 %vm10496_vm1, %v10497_v12  ;;  %v2643_v30 = vmax.f32 %v11206_v47, 0.0  ;;  %v8420_v47 = vld [vmem:[%s12217_s10 + $0x1] ss:$0 sm:$0xff] }
 0x7ab   : > { %9140 = vmatprep.subr.mxu0 %v10497_v12 }
 0x7ad   : > { %9133 = vmatmul.mubr.msk.f32.vlgmr.msra.gmra.mrb[74].mxu0 %vm2831_vm2, %v3549_v58  ;;  %v2644_v58 = vmax.f32 %v11208_v8, 0.0 }
 0x7ae   : > { %9142 = vmatprep.mubr.msk.f32.mxu0 %vm10496_vm1, %v10497_v12 }
 0x87c   : > { %v3470_v33 = vpop.f32.mrb[72].mxu0 }
 0x87d   : > { %v9124_v34 = vpop.f32.mrb[73].mxu0  ;;  %9128 = vmatmul.mubr.msk.f32.vlgmr.msra.gmra.mrb[72].mxu1 %vm2831_vm2, %v3470_v33 }
 0x87e   : > { %9137 = vmatprep.mubr.msk.f32.mxu1 %vm10496_vm1, %v10497_v12 }
 0x880   : > { %v3622_v35 = vpop.f32.mrb[74].mxu0 }
 0x881   : > { %v3626_v36 = vsel %vm2907_vm3, -1e+09, %v3622_v35  ;;  %v9134_v19 = vpop.f32.mrb[75].mxu0 }
 0x882   : > { %v3627_v40 = vsel %vm2831_vm2, %v3626_v36, -inf  ;;  %v8341_v19 = vld [vmem:[%s12217_s10] ss:$0 sm:$0xff] }
 0x883   : > { %3628 = vmax.xlane.f32.xlu1 %v3627_v40 }
 0x910   : > { %v3629_v41 = vpop.xlane.xlu1 %3628 }
 0x911   : > { %v3630_v42 = vsub.f32 %v3626_v36, %v3629_v41  ;;  %v8342_v41 = vld [vmem:[%s12218_s11] ss:$0 sm:$0xff] }
 0x913   : > { %v3631_v44 = vmul.f32 1.442695, %v3630_v42 }
 0x915   : > { %10367 = vpow2.f32 %v3631_v44 }
 0x91f   : > { %v10368_v46 = vpop.eup %10367 }
 0x920   : > { %v3633_v28 = vsel %vm2831_vm2, %v10368_v46, 0.0 }
 0x921   : > { %3634 = vadd.xlane.f32.xlu0 %v3633_v28 }
 0x937   : > { %3638 = vrot.lane.b32.xlu0 %v11212_v24, %s12242_s5  ;;  %v2693_v24 = vld [vmem:[%s12216_s9 + $0x18] sm:$0xff]  ;;  %s12289_s5 = smov 56  }
 0x938   : > { %9141 = vmatpush3.msra.mxu0 %v2693_v24 }
 0x939   : > { %9691 = vmatprep.subr.bf16.mxu0 %v10495_v7 }
 0x93b   : > { %9985 = vrot.lane.b32.xlu0 %v9984_v10, %s10498_s2 }
 0x950   : > { %v3543_v48 = vpop.f32.mrb[72].mxu1 }
 0x951   : > { %v3547_v49 = vadd.f32 %v3543_v48, %v3305_v15  ;;  %v9129_v50 = vpop.f32.mrb[73].mxu1 }
 0x9ae   : > { %v3635_v37 = vpop.xlane.xlu0 %3634 }
 0x9af   : > { %10369 = vrcp.f32 %v3635_v37 }
 0x9b2   : > { %v3639_v51 = vpop.permute.xlu0 %3638 }
 0x9b3   : > { %9136 = vmatpush3.msra.mxu1 %v3639_v51 }
 0x9b4   : > { %9685 = vmatprep.subr.bf16.mxu1 %v10495_v7 }
 0x9b6   : > { %v9986_v16 = vpop.permute.xlu0 %9985 }
 0x9b7   : > { %v9988_v63 = vunpack.i.h.bf16 %v9986_v16  ;;  %v9987_v0 = vunpack.i.l.bf16 %v9986_v16 }
 0x9b9   : > { %v10370_v52 = vpop.eup %10369 }
 0x9ba   : > { %v3637_v53 = vmul.f32 %v10370_v52, %v10368_v46 }
 0x9bc   : > { %9138 = vmatmul.mubr.msk.f32.vlgmr.msra.gmra.mrb[74].mxu1 %vm2831_vm2, %v3637_v53 }
 0x9bd   : > { %9153 = vmatprep.mubr.msk.f32.mxu1 %vm10496_vm1, %v10497_v12  ;;  %9687 = vmatpush3.bf16.msra.mxu1 %v9686_v61 }
 0x9be   : > { %9688 = vmatprep.subr.bf16.mxu1 %v10495_v7 }
 0x9c1   : > { %9690 = vmatpush3.bf16.msra.mxu1 %v9689_v29 }
 0x9c2   : > { %9697 = vmatprep.subr.bf16.mxu1 %v10495_v7 }
 0xa8f   : > { %v3710_v27 = vpop.f32.mrb[74].mxu1 }
 0xa90   : > { %v9139_v56 = vpop.f32.mrb[75].mxu1  ;;  %9143 = vmatmul.mubr.msk.f32.vlgmr.msra.gmra.mrb[76].mxu0 %vm2831_vm2, %v3710_v27 }
 0xa91   : > { %9164 = vmatprep.mubr.msk.f32.mxu0 %vm10496_vm1, %v10497_v12 }
 0xb63   : > { %v3783_v54 = vpop.f32.mrb[76].mxu0 }
 0xb64   : > { %v3787_v3 = vadd.f32 %v3783_v54, %v3547_v49  ;;  %v9144_v4 = vpop.f32.mrb[77].mxu0 }
 0xb66   : > { %v3788_v5 = vadd.f32 %v3787_v3, %v11187_v23  ;;  %v9695_v23 = vpack.c.bf16 %v9988_v63, %v9987_v0 }
 0xb68   : > { %v3789_v55 = vsel %vm2653_vm0, %v3788_v5, 0.0 }
 0xb69   : > { %3790 = vadd.xlane.f32.xlu1 %v3789_v55 }
 0xb7a   : > { %9980 = vrot.lane.b32.xlu1 %v9979_v59, %s10498_s2 }
 0xbf6   : > { %v3791_v13 = vpop.xlane.xlu1 %3790 }
 0xbf7   : > { %v3792_v15 = vmul.f32 0.03125, %v3791_v13 }
 0xbf9   : > { %v3793_v60 = vsub.f32 %v3788_v5, %v3792_v15 }
 0xbfa   : > { %v9981_v17 = vpop.permute.xlu1 %9980 }
 0xbfb   : > { %v9983_v18 = vunpack.i.h.bf16 %v9981_v17  ;;  %v9982_v20 = vunpack.i.l.bf16 %v9981_v17  ;;  %v3794_v6 = vmul.f32 %v3793_v60, %v3793_v60 }
 0xbfd   : > { %v9692_v21 = vpack.c.bf16 %v9983_v18, %v9982_v20  ;;  %v3795_v9 = vsel %vm2653_vm0, %v3794_v6, 0.0 }
 0xbfe   : > { %3796 = vadd.xlane.f32.xlu1 %v3795_v9 }
 0xbff   : > { %9693 = vmatpush3.bf16.msra.mxu0 %v9692_v21 }
 0xc00   : > { %9694 = vmatprep.subr.bf16.mxu0 %v10495_v7 }
 0xc03   : > { %9696 = vmatpush3.bf16.msra.mxu0 %v9695_v23 }
 0xc04   : > { %9709 = vmatprep.subr.bf16.mxu0 %v10495_v7 }
 0xc06   : > { %9165 = vmatmul.mubr.msk.f32.vlgmr.msra.gmra.mrb[78].mxu0 %vm2653_vm0, %v2639_v22 }
 0xc07   : > { %9167 = vmatprep.mubr.msk.f32.mxu0 %vm10496_vm1, %v10497_v12 }
 0xc0a   : > { %9168 = vmatmul.mubr.msk.f32.gmra.mrb[80].mxu0 %vm2653_vm0, %v2640_v2 }
 0xc0b   : > { %9170 = vmatprep.mubr.msk.f32.mxu0 %vm10496_vm1, %v10497_v12 }
 0xc0e   : > { %9171 = vmatmul.mubr.msk.f32.gmra.mrb[82].mxu0 %vm2653_vm0, %v2641_v26 }
 0xc0f   : > { %9173 = vmatprep.mubr.msk.f32.mxu0 %vm10496_vm1, %v10497_v12 }
 0xc12   : > { %9174 = vmatmul.mubr.msk.f32.gmra.mrb[84].mxu0 %vm2653_vm0, %v2642_v25 }
 0xc13   : > { %9176 = vmatprep.mubr.msk.f32.mxu0 %vm10496_vm1, %v10497_v12 }
 0xc16   : > { %9177 = vmatmul.mubr.msk.f32.gmra.mrb[86].mxu0 %vm2653_vm0, %v2643_v30 }
 0xc17   : > { %9179 = vmatprep.mubr.msk.f32.mxu0 %vm10496_vm1, %v10497_v12 }
 0xc1a   : > { %9180 = vmatmul.mubr.msk.f32.gmra.mrb[88].mxu0 %vm2653_vm0, %v2644_v58 }
 0xc1b   : > { %9182 = vmatprep.mubr.msk.f32.mxu0 %vm10496_vm1, %v10497_v12 }
 0xc1e   : > { %9183 = vmatmul.mubr.msk.f32.gmra.mrb[90].mxu0 %vm2653_vm0, %v2645_v32 }
 0xc1f   : > { %9216 = vmatprep.mubr.msk.f32.mxu0 %vm10496_vm1, %v10497_v12 }
 0xc8b   : > { %v3797_v33 = vpop.xlane.xlu1 %3796 }
 0xc8c   : > { %v3798_v34 = vmul.f32 0.03125, %v3797_v33 }
 0xc8e   : > { %v3799_v35 = vadd.f32 1e-06, %v3798_v34 }
 0xc90   : > { %10371 = vrsqrt.f32 %v3799_v35 }
 0xc9a   : > { %v10372_v36 = vpop.eup %10371 }
 0xc9b   : > { %v3801_v40 = vmul.f32 %v10372_v36, %v3793_v60 }
 0xc9d   : > { %v3808_v42 = vmul.f32 %v8341_v19, %v3801_v40 }
 0xc9f   : > { %v11397_v44 = vadd.f32 %v8342_v41, %v3808_v42 }
 0xca1   : > { %9154 = vmatmul.mubr.msk.f32.vlgmr.msra.gmra.mrb[76].mxu1 %vm2653_vm0, %v11397_v44 }
 0xca2   : > { %9199 = vmatprep.mubr.msk.f32.mxu1 %vm10496_vm1, %v10497_v12 }
 0xcd9   : > { %v3993_v46 = vpop.f32.mrb[78].mxu0 }
 0xcda   : > { %v9166_v28 = vpop.f32.mrb[79].mxu0 }
 0xcdd   : > { %v3998_v48 = vpop.f32.mrb[80].mxu0 }
 0xcde   : > { %v9169_v50 = vpop.f32.mrb[81].mxu0  ;;  %v11409_v37 = vpack.i.bf16 %v3998_v48, %v3993_v46  ;;  %v9698_v51 = vpack.c.bf16 %v3998_v48, %v3993_v46 }
 0xce0   : > { %9990 = vrot.lane.b32.xlu0 %v11409_v37, %s10499_s6  ;;  %9700 = vmatpush3.bf16.xpose.msk.msra.mxu1 %vm11405_vm4, %v9698_v51 }
 0xce1   : > { %v4003_v52 = vpop.f32.mrb[82].mxu0  ;;  %9701 = vmatprep.subr.bf16.mxu1 %v10495_v7 }
 0xce2   : > { %v9172_v53 = vpop.f32.mrb[83].mxu0 }
 0xce5   : > { %v4008_v24 = vpop.f32.mrb[84].mxu0 }
 0xce6   : > { %v9175_v27 = vpop.f32.mrb[85].mxu0  ;;  %v11416_v56 = vpack.i.bf16 %v4008_v24, %v4003_v52  ;;  %v9702_v57 = vpack.c.bf16 %v4008_v24, %v4003_v52 }
 0xce8   : > { %9995 = vrot.lane.b32.xlu0 %v11416_v56, %s10499_s6  ;;  %9704 = vmatpush3.bf16.xpose.msk.msra.mxu1 %vm11405_vm4, %v9702_v57 }
 0xce9   : > { %v4013_v45 = vpop.f32.mrb[86].mxu0  ;;  %9705 = vmatprep.subr.bf16.mxu1 %v10495_v7 }
 0xcea   : > { %v9178_v59 = vpop.f32.mrb[87].mxu0 }
 0xced   : > { %v4018_v61 = vpop.f32.mrb[88].mxu0 }
 0xcee   : > { %v9181_v62 = vpop.f32.mrb[89].mxu0  ;;  %v11423_v1 = vpack.i.bf16 %v4018_v61, %v4013_v45  ;;  %v9706_v10 = vpack.c.bf16 %v4018_v61, %v4013_v45 }
 0xcf0   : > { %10000 = vrot.lane.b32.xlu0 %v11423_v1, %s10499_s6  ;;  %9708 = vmatpush3.bf16.xpose.msk.msra.mxu1 %vm11405_vm4, %v9706_v10 }
 0xcf1   : > { %v11429_v29 = vpop.f32.mrb[90].mxu0  ;;  %9197 = vmatprep.subr.mxu1 %v10497_v12 }
 0xcf2   : > { %v9184_v54 = vpop.f32.mrb[91].mxu0 }
 0xcf4   : > { %4243 = vrot.lane.b32.xlu0 %v11429_v29, %s10499_s6 }
 0xcf8   : > { %9198 = vmatpush3.xpose.msk.msra.mxu1 %vm2831_vm2, %v11429_v29 }
 0xcf9   : > { %9718 = vmatprep.subr.bf16.mxu1 %v10495_v7 }
 0xd52   : > { %v9991_v3 = vpop.permute.xlu0 %9990 }
 0xd53   : > { %v9993_v4 = vunpack.i.h.bf16 %v9991_v3  ;;  %v9992_v5 = vunpack.i.l.bf16 %v9991_v3 }
 0xd55   : > { %v9719_v16 = vpack.c.bf16 %v9993_v4, %v9992_v5 }
 0xd5a   : > { %v9996_v60 = vpop.permute.xlu0 %9995 }
 0xd5b   : > { %v9998_v17 = vunpack.i.h.bf16 %v9996_v60  ;;  %v9997_v63 = vunpack.i.l.bf16 %v9996_v60 }
 0xd5d   : > { %v9723_v18 = vpack.c.bf16 %v9998_v17, %v9997_v63 }
 0xd62   : > { %v10001_v20 = vpop.permute.xlu0 %10000 }
 0xd63   : > { %v10003_v0 = vunpack.i.h.bf16 %v10001_v20  ;;  %v10002_v6 = vunpack.i.l.bf16 %v10001_v20 }
 0xd65   : > { %v9727_v21 = vpack.c.bf16 %v10003_v0, %v10002_v6 }
 0xd66   : > { %v4244_v9 = vpop.permute.xlu0 %4243 }
 0xd74   : > { %v3885_v55 = vpop.f32.mrb[76].mxu1 }
 0xd75   : > { %v11437_v13 = vmul.f32 0.35355338, %v3885_v55  ;;  %v9155_v15 = vpop.f32.mrb[77].mxu1 }
 0xd77   : > { %4229 = vrot.lane.b32.xlu0 %v11437_v13, %s10499_s6  ;;  %9200 = vmatmul.mubr.msk.f32.vlgmr.msra.gmra.mrb[78].mxu1 %vm2831_vm2, %v11437_v13 }
 0xd78   : > { %9721 = vmatpush3.bf16.xpose.msk.msra.mxu1 %vm11405_vm4, %v9719_v16  ;;  %9233 = vmatprep.mubr.msk.f32.mxu1 %vm10496_vm1, %v10497_v12 }
 0xd79   : > { %9722 = vmatprep.subr.bf16.mxu1 %v10495_v7 }
 0xd80   : > { %9725 = vmatpush3.bf16.xpose.msk.msra.mxu1 %vm11405_vm4, %v9723_v18 }
 0xd81   : > { %9726 = vmatprep.subr.bf16.mxu1 %v10495_v7 }
 0xd88   : > { %9729 = vmatpush3.bf16.xpose.msk.msra.mxu1 %vm11405_vm4, %v9727_v21 }
 0xd89   : > { %9231 = vmatprep.subr.mxu1 %v10497_v12 }
 0xd90   : > { %9232 = vmatpush3.xpose.msk.msra.mxu1 %vm2831_vm2, %v4244_v9 }
 0xd91   : > { %9751 = vmatprep.subr.bf16.mxu1 %v10495_v7 }
 0xde9   : > { %v4230_v23 = vpop.permute.xlu0 %4229 }
 0xdea   : > { %9234 = vmatmul.mubr.msk.f32.vlgmr.msra.gmra.mrb[80].mxu1 %vm2831_vm2, %v4230_v23 }
 0xdeb   : > { %9294 = vmatprep.mubr.msk.f32.mxu1 %vm10496_vm1, %v10497_v12 }
 0xe4a   : > { %v4117_v33 = vpop.f32.mrb[78].mxu1 }
 0xe4b   : > { %v9201_v34 = vpop.f32.mrb[79].mxu1  ;;  %v4122_v35 = vsel %vm4121_vm5, %v4117_v33, -inf }
 0xe4c   : > { %4123 = vmax.xlane.f32.xlu0 %v4122_v35 }
 0xe62   : > { %10010 = vrot.lane.b32.xlu0 %v11416_v56, %s10498_s2 }
 0xebd   : > { %v4327_v36 = vpop.f32.mrb[80].mxu1 }
 0xebe   : > { %v9235_v19 = vpop.f32.mrb[81].mxu1  ;;  %v4331_v40 = vsel %vm4121_vm5, %v4327_v36, -inf }
 0xebf   : > { %4332 = vmax.xlane.f32.xlu1 %v4331_v40 }
 0xed0   : > { %10005 = vrot.lane.b32.xlu1 %v11409_v37, %s10498_s2 }
 0xed4   : > { %10015 = vrot.lane.b32.xlu1 %v11423_v1, %s10498_s2 }
 0xed8   : > { %4145 = vrot.lane.b32.xlu1 %v11429_v29, %s10498_s2 }
 0xed9   : > { %v4124_v41 = vpop.xlane.xlu0 %4123 }
 0xeda   : > { %v4125_v42 = vsub.f32 %v4117_v33, %v4124_v41 }
 0xedc   : > { %10020 = vrot.lane.b32.xlu1 %v11409_v37, %s12254_s24  ;;  %v4126_v46 = vmul.f32 1.442695, %v4125_v42 }
 0xedd   : > { %v10011_v53 = vpop.permute.xlu0 %10010 }
 0xede   : > { %10373 = vpow2.f32 %v4126_v46  ;;  %v10013_v45 = vunpack.i.h.bf16 %v10011_v53  ;;  %v10012_v59 = vunpack.i.l.bf16 %v10011_v53  ;;  %v2711_v46 = vld [vmem:[%s12220_s13 + $0x8] sm:$0xff] }
 0xee0   : > { %10025 = vrot.lane.b32.xlu1 %v11416_v56, %s12254_s24  ;;  %v9713_v10 = vpack.c.bf16 %v10013_v45, %v10012_v59 }
 0xee8   : > { %v10374_v28 = vpop.eup %10373 }
 0xee9   : > { %v4128_v48 = vsel %vm4121_vm5, %v10374_v28, 0.0 }
 0xf04   : > { %4129 = vadd.xlane.f32.xlu1 %v4128_v48 }
 0xf15   : > { %10030 = vrot.lane.b32.xlu1 %v11423_v1, %s12254_s24 }
 0xf19   : > { %10035 = vrot.lane.b32.xlu1 %v11409_v37, %s12250_s3 }
 0xf1d   : > { %10045 = vrot.lane.b32.xlu1 %v11423_v1, %s12250_s3 }
 0xf21   : > { %4583 = vrot.lane.b32.xlu1 %v11437_v13, %s12250_s3 }
 0xf25   : > { %10055 = vrot.lane.b32.xlu1 %v11416_v56, %s12252_s7 }
 0xf4c   : > { %v4333_v50 = vpop.xlane.xlu1 %4332 }
 0xf4d   : > { %v4334_v51 = vsub.f32 %v4327_v36, %v4333_v50  ;;  %v2710_v50 = vld [vmem:[%s12220_s13] sm:$0xff] }
 0xf4f   : > { %v4335_v52 = vmul.f32 1.442695, %v4334_v51 }
 0xf50   : > { %v10006_v24 = vpop.permute.xlu1 %10005 }
 0xf51   : > { %10375 = vpow2.f32 %v4335_v52  ;;  %v10008_v27 = vunpack.i.h.bf16 %v10006_v24  ;;  %v10007_v57 = vunpack.i.l.bf16 %v10006_v24 }
 0xf53   : > { %v9710_v61 = vpack.c.bf16 %v10008_v27, %v10007_v57 }
 0xf54   : > { %v10016_v62 = vpop.permute.xlu1 %10015 }
 0xf55   : > { %9711 = vmatpush3.bf16.msra.mxu0 %v9710_v61  ;;  %v10018_v54 = vunpack.i.h.bf16 %v10016_v62  ;;  %v10017_v3 = vunpack.i.l.bf16 %v10016_v62 }
 0xf56   : > { %9712 = vmatprep.subr.bf16.mxu0 %v10495_v7 }
 0xf57   : > { %v9716_v5 = vpack.c.bf16 %v10018_v54, %v10017_v3 }
 0xf58   : > { %v4146_v15 = vpop.permute.xlu1 %4145 }
 0xf59   : > { %9714 = vmatpush3.bf16.msra.mxu0 %v9713_v10 }
 0xf5a   : > { %9715 = vmatprep.subr.bf16.mxu0 %v10495_v7 }
 0xf5b   : > { %v10376_v4 = vpop.eup %10375 }
 0xf5c   : > { %v4337_v55 = vsel %vm4121_vm5, %v10376_v4, 0.0  ;;  %v10021_v16 = vpop.permute.xlu1 %10020 }
 0xf5d   : > { %4338 = vadd.xlane.f32.xlu0 %v4337_v55  ;;  %9717 = vmatpush3.bf16.msra.mxu0 %v9716_v5  ;;  %v10023_v63 = vunpack.i.h.bf16 %v10021_v16  ;;  %v10022_v18 = vunpack.i.l.bf16 %v10021_v16 }
 0xf5e   : > { %9214 = vmatprep.subr.mxu0 %v10497_v12 }
 0xf5f   : > { %v9731_v6 = vpack.c.bf16 %v10023_v63, %v10022_v18 }
 0xf60   : > { %v10026_v60 = vpop.permute.xlu1 %10025 }
 0xf61   : > { %9215 = vmatpush3.msk.msra.mxu0 %vm4156_vm6, %v4146_v15  ;;  %v10028_v21 = vunpack.i.h.bf16 %v10026_v60  ;;  %v10027_v9 = vunpack.i.l.bf16 %v10026_v60 }
 0xf62   : > { %9730 = vmatprep.subr.bf16.mxu0 %v10495_v7 }
 0xf63   : > { %v9734_v33 = vpack.c.bf16 %v10028_v21, %v10027_v9 }
 0xf73   : > { %4354 = vrot.lane.b32.xlu0 %v11429_v29, %s12254_s24 }
 0xf77   : > { %10040 = vrot.lane.b32.xlu0 %v11416_v56, %s12250_s3 }
 0xf7b   : > { %4597 = vrot.lane.b32.xlu0 %v11429_v29, %s12250_s3 }
 0xf91   : > { %v4130_v17 = vpop.xlane.xlu1 %4129 }
 0xf92   : > { %10377 = vrcp.f32 %v4130_v17 }
 0xf95   : > { %v10031_v23 = vpop.permute.xlu1 %10030 }
 0xf96   : > { %v10033_v34 = vunpack.i.h.bf16 %v10031_v23  ;;  %v10032_v35 = vunpack.i.l.bf16 %v10031_v23 }
 0xf98   : > { %v9737_v36 = vpack.c.bf16 %v10033_v34, %v10032_v35 }
 0xf99   : > { %v10036_v51 = vpop.permute.xlu1 %10035 }
 0xf9a   : > { %v10038_v24 = vunpack.i.h.bf16 %v10036_v51  ;;  %v10037_v27 = vunpack.i.l.bf16 %v10036_v51 }
 0xf9c   : > { %v10378_v20 = vpop.eup %10377  ;;  %v9740_v57 = vpack.c.bf16 %v10038_v24, %v10037_v27 }
 0xf9d   : > { %v4132_v0 = vmul.f32 %v10378_v20, %v10374_v28  ;;  %v10046_v10 = vpop.permute.xlu1 %10045 }
 0xf9e   : > { %v10048_v54 = vunpack.i.h.bf16 %v10046_v10  ;;  %v10047_v3 = vunpack.i.l.bf16 %v10046_v10  ;;  %v2712_v10 = vld [vmem:[%s12220_s13 + $0x10] sm:$0xff] }
 0xf9f   : > { %9217 = vmatmul.mubr.msk.f32.vlgmr.msra.gmra.mrb[92].mxu0 %vm4121_vm5, %v4132_v0 }
 0xfa0   : > { %9732 = vmatpush3.bf16.msra.mxu0 %v9731_v6  ;;  %9250 = vmatprep.mubr.msk.f32.mxu0 %vm10496_vm1, %v10497_v12 }
 0xfa1   : > { %9733 = vmatprep.subr.bf16.mxu0 %v10495_v7  ;;  %v4584_v55 = vpop.permute.xlu1 %4583 }
 0xfa4   : > { %9735 = vmatpush3.bf16.msra.mxu0 %v9734_v33 }
 0xfa5   : > { %9736 = vmatprep.subr.bf16.mxu0 %v10495_v7  ;;  %v10056_v23 = vpop.permute.xlu1 %10055 }
 0xfa8   : > { %9738 = vmatpush3.bf16.msra.mxu0 %v9737_v36  ;;  %v10058_v36 = vunpack.i.h.bf16 %v10056_v23 }
 0xfa9   : > { %9248 = vmatprep.subr.mxu0 %v10497_v12 }
 0xfea   : > { %v4339_v19 = vpop.xlane.xlu0 %4338 }
 0xfeb   : > { %10379 = vrcp.f32 %v4339_v19  ;;  %v10057_v19 = vunpack.i.l.bf16 %v10056_v23 }
 0xfee   : > { %v4355_v40 = vpop.permute.xlu0 %4354 }
 0xfef   : > { %9249 = vmatpush3.msk.msra.mxu0 %vm4156_vm6, %v4355_v40 }
 0xff0   : > { %9253 = vmatprep.subr.mxu0 %v10497_v12 }
 0xff2   : > { %v10041_v45 = vpop.permute.xlu0 %10040 }
 0xff3   : > { %v10043_v59 = vunpack.i.h.bf16 %v10041_v45  ;;  %v10042_v61 = vunpack.i.l.bf16 %v10041_v45 }
 0xff5   : > { %v10380_v41 = vpop.eup %10379  ;;  %v9744_v62 = vpack.c.bf16 %v10043_v59, %v10042_v61 }
 0xff6   : > { %v4341_v42 = vmul.f32 %v10380_v41, %v10376_v4  ;;  %v9748_v4 = vpack.c.bf16 %v10048_v54, %v10047_v3  ;;  %v4598_v5 = vpop.permute.xlu0 %4597 }
 0xff8   : > { %9251 = vmatmul.mubr.msk.f32.vlgmr.msra.gmra.mrb[94].mxu0 %vm4121_vm5, %v4341_v42  ;;  %v9755_v42 = vpack.c.bf16 %v10058_v36, %v10057_v19 }
 0xff9   : > { %9254 = vmatpush3.msra.mxu0 %v2711_v46  ;;  %9255 = vmatprep.mubr.msk.f32.mxu0 %vm10496_vm1, %v10497_v12 }
 0xffa   : > { %9258 = vmatprep.subr.mxu0 %v10497_v12 }
0x1072   : > { %v4225_v28 = vpop.f32.mrb[92].mxu0 }
0x1073   : > { %v9218_v48 = vpop.f32.mrb[93].mxu0 }
0x10cb   : > { %v4433_v52 = vpop.f32.mrb[94].mxu0 }
0x10cc   : > { %v9252_v53 = vpop.f32.mrb[95].mxu0  ;;  %9256 = vmatmul.mubr.msk.f32.vlgmr.msra.gmra.mrb[96].mxu0 %vm2831_vm2, %v4433_v52 }
0x10cd   : > { %9259 = vmatpush3.msra.mxu0 %v2710_v50  ;;  %9260 = vmatprep.mubr.msk.f32.mxu0 %vm10496_vm1, %v10497_v12 }
0x10ce   : > { %9739 = vmatprep.subr.bf16.mxu0 %v10495_v7 }
0x10d0   : > { %9261 = vmatmul.mubr.msk.f32.vlgmr.msra.gmra.mrb[98].mxu0 %vm2831_vm2, %v4225_v28 }
0x10d1   : > { %9277 = vmatprep.mubr.msk.f32.mxu0 %vm10496_vm1, %v10497_v12 }
0x10d4   : > { %9742 = vmatpush3.bf16.xpose.msk.msra.mxu0 %vm11405_vm4, %v9740_v57 }
0x10d5   : > { %9743 = vmatprep.subr.bf16.mxu0 %v10495_v7 }
0x10dc   : > { %9746 = vmatpush3.bf16.xpose.msk.msra.mxu0 %vm11405_vm4, %v9744_v62 }
0x10dd   : > { %9747 = vmatprep.subr.bf16.mxu0 %v10495_v7 }
0x10e4   : > { %9750 = vmatpush3.bf16.xpose.msk.msra.mxu0 %vm11405_vm4, %v9748_v4 }
0x10e5   : > { %9275 = vmatprep.subr.mxu0 %v10497_v12 }
0x10ec   : > { %9276 = vmatpush3.xpose.msk.msra.mxu0 %vm2831_vm2, %v4598_v5 }
0x10ed   : > { %9772 = vmatprep.subr.bf16.mxu0 %v10495_v7 }
0x10ef   : > { %9278 = vmatmul.mubr.msk.f32.vlgmr.msra.gmra.mrb[100].mxu0 %vm2831_vm2, %v4584_v55 }
0x10f0   : > { %9333 = vmatprep.mubr.msk.f32.mxu0 %vm10496_vm1, %v10497_v12 }
0x119f   : > { %v4506_v15 = vpop.f32.mrb[96].mxu0 }
0x11a0   : > { %v9257_v16 = vpop.f32.mrb[97].mxu0 }
0x11a3   : > { %v4579_v60 = vpop.f32.mrb[98].mxu0 }
0x11a4   : > { %v11535_v17 = vadd.f32 %v4579_v60, %v4506_v15  ;;  %v9262_v63 = vpop.f32.mrb[99].mxu0 }
0x11c2   : > { %v4681_v18 = vpop.f32.mrb[100].mxu0 }
0x11c3   : > { %v9279_v20 = vpop.f32.mrb[101].mxu0  ;;  %v4685_v0 = vsel %vm4121_vm5, %v4681_v18, -inf }
0x11c4   : > { %4686 = vmax.xlane.f32.xlu0 %v4685_v0 }
0x11da   : > { %10050 = vrot.lane.b32.xlu0 %v11409_v37, %s12252_s7 }
0x11de   : > { %10060 = vrot.lane.b32.xlu0 %v11423_v1, %s12252_s7 }
0x11e2   : > { %10065 = vrot.lane.b32.xlu0 %v11409_v37, %s12248_s23 }
0x11e6   : > { %10075 = vrot.lane.b32.xlu0 %v11423_v1, %s12248_s23 }
0x11ea   : > { %4865 = vrot.lane.b32.xlu0 %v11437_v13, %s12248_s23 }
0x11ee   : > { %10080 = vrot.lane.b32.xlu0 %v11409_v37, %s12285_s26 }
0x1251   : > { %v4687_v6 = vpop.xlane.xlu0 %4686 }
0x1252   : > { %v4688_v21 = vsub.f32 %v4681_v18, %v4687_v6 }
0x1254   : > { %v4689_v9 = vmul.f32 1.442695, %v4688_v21 }
0x1255   : > { %v10051_v33 = vpop.permute.xlu0 %10050 }
0x1256   : > { %10381 = vpow2.f32 %v4689_v9  ;;  %v10053_v34 = vunpack.i.h.bf16 %v10051_v33  ;;  %v10052_v35 = vunpack.i.l.bf16 %v10051_v33 }
0x1258   : > { %v9752_v40 = vpack.c.bf16 %v10053_v34, %v10052_v35 }
0x1259   : > { %v10061_v41 = vpop.permute.xlu0 %10060 }
0x125a   : > { %9753 = vmatpush3.bf16.msra.mxu1 %v9752_v40  ;;  %v10063_v13 = vunpack.i.h.bf16 %v10061_v41  ;;  %v10062_v46 = vunpack.i.l.bf16 %v10061_v41 }
0x125b   : > { %9754 = vmatprep.subr.bf16.mxu1 %v10495_v7 }
0x125c   : > { %v9758_v48 = vpack.c.bf16 %v10063_v13, %v10062_v46 }
0x125d   : > { %v10066_v28 = vpop.permute.xlu0 %10065 }
0x125e   : > { %9756 = vmatpush3.bf16.msra.mxu1 %v9755_v42  ;;  %v10068_v54 = vunpack.i.h.bf16 %v10066_v28  ;;  %v10067_v3 = vunpack.i.l.bf16 %v10066_v28 }
0x125f   : > { %9757 = vmatprep.subr.bf16.mxu1 %v10495_v7 }
0x1260   : > { %v10382_v37 = vpop.eup %10381  ;;  %v9761_v4 = vpack.c.bf16 %v10068_v54, %v10067_v3 }
0x1261   : > { %v10076_v50 = vpop.permute.xlu0 %10075  ;;  %v4691_v51 = vsel %vm4121_vm5, %v10382_v37, 0.0 }
0x1262   : > { %4692 = vadd.xlane.f32.xlu1 %v4691_v51  ;;  %9759 = vmatpush3.bf16.msra.mxu1 %v9758_v48  ;;  %v10078_v18 = vunpack.i.h.bf16 %v10076_v50  ;;  %v10077_v20 = vunpack.i.l.bf16 %v10076_v50 }
0x1263   : > { %9292 = vmatprep.subr.mxu1 %v10497_v12 }
0x1264   : > { %v9769_v0 = vpack.c.bf16 %v10078_v18, %v10077_v20  ;;  %v2732_v18 = vld [vmem:[%s12225_s18] sm:$0xff]  ;;  %v2733_v20 = vld [vmem:[%s12225_s18 + $0x8] sm:$0xff] }
0x1265   : > { %v4866_v52 = vpop.permute.xlu0 %4865 }
0x1269   : > { %v10081_v53 = vpop.permute.xlu0 %10080 }
0x126a   : > { %v10083_v24 = vunpack.i.h.bf16 %v10081_v53  ;;  %v10082_v27 = vunpack.i.l.bf16 %v10081_v53 }
0x126c   : > { %v9773_v57 = vpack.c.bf16 %v10083_v24, %v10082_v27  ;;  %v2713_v24 = vld [vmem:[%s12220_s13 + $0x18] sm:$0xff] }
0x126e   : > { %9774 = vmatpush3.bf16.msra.mxu0 %v9773_v57 }
0x126f   : > { %9775 = vmatprep.subr.bf16.mxu0 %v10495_v7 }
0x1273   : > { %4708 = vrot.lane.b32.xlu1 %v11429_v29, %s12252_s7  ;;  %s12296_s7 = sld [smem:[#allocation21_spill]] }
0x1277   : > { %10070 = vrot.lane.b32.xlu1 %v11416_v56, %s12248_s23 }
0x127b   : > { %4879 = vrot.lane.b32.xlu1 %v11429_v29, %s12248_s23  ;;  %s12287_s23 = smov 80  }
0x12ef   : > { %v4693_v45 = vpop.xlane.xlu1 %4692 }
0x12f0   : > { %10383 = vrcp.f32 %v4693_v45 }
0x12f3   : > { %v4709_v59 = vpop.permute.xlu1 %4708 }
0x12f4   : > { %9293 = vmatpush3.msk.msra.mxu1 %vm4156_vm6, %v4709_v59 }
0x12f5   : > { %9297 = vmatprep.subr.mxu1 %v10497_v12 }
0x12f7   : > { %v10071_v55 = vpop.permute.xlu1 %10070 }
0x12f8   : > { %v10073_v16 = vunpack.i.h.bf16 %v10071_v55  ;;  %v10072_v60 = vunpack.i.l.bf16 %v10071_v55  ;;  %v2722_v55 = vld [vmem:[%s12223_s16] sm:$0xff] }
0x12fa   : > { %v10384_v61 = vpop.eup %10383  ;;  %v9765_v63 = vpack.c.bf16 %v10073_v16, %v10072_v60  ;;  %v2725_v60 = vld [vmem:[%s12223_s16 + $0x18] sm:$0xff] }
0x12fb   : > { %v4695_v62 = vmul.f32 %v10384_v61, %v10382_v37  ;;  %v4880_v6 = vpop.permute.xlu1 %4879 }
0x12fd   : > { %9295 = vmatmul.mubr.msk.f32.vlgmr.msra.gmra.mrb[82].mxu1 %vm4121_vm5, %v4695_v62 }
0x12fe   : > { %9298 = vmatpush3.msra.mxu1 %v2712_v10  ;;  %9299 = vmatprep.mubr.msk.f32.mxu1 %vm10496_vm1, %v10497_v12 }
0x12ff   : > { %9760 = vmatprep.subr.bf16.mxu1 %v10495_v7 }
0x13d0   : > { %v4787_v5 = vpop.f32.mrb[82].mxu1 }
0x13d1   : > { %v9296_v15 = vpop.f32.mrb[83].mxu1  ;;  %9300 = vmatmul.mubr.msk.f32.vlgmr.msra.gmra.mrb[84].mxu1 %vm2831_vm2, %v4787_v5 }
0x13d2   : > { %9763 = vmatpush3.bf16.xpose.msk.msra.mxu1 %vm11405_vm4, %v9761_v4  ;;  %9316 = vmatprep.mubr.msk.f32.mxu1 %vm10496_vm1, %v10497_v12  ;;  %v2723_v15 = vld [vmem:[%s12223_s16 + $0x8] sm:$0xff] }
0x13d3   : > { %9764 = vmatprep.subr.bf16.mxu1 %v10495_v7  ;;  %v9782_v16 = vpack.c.bf16 %v2723_v15, %v2722_v55  ;;  %v2688_v55 = vld [vmem:[%s12215_s8 + $0x30] sm:$0xff]  ;;  %v2689_v15 = vld [vmem:[%s12215_s8 + $0x38] sm:$0xff] }
0x13da   : > { %9767 = vmatpush3.bf16.xpose.msk.msra.mxu1 %vm11405_vm4, %v9765_v63 }
0x13db   : > { %9768 = vmatprep.subr.bf16.mxu1 %v10495_v7 }
0x13e2   : > { %9771 = vmatpush3.bf16.xpose.msk.msra.mxu1 %vm11405_vm4, %v9769_v0  ;;  %v2734_v0 = vld [vmem:[%s12225_s18 + $0x10] sm:$0xff] }
0x13e3   : > { %9314 = vmatprep.subr.mxu1 %v10497_v12 }
0x13ea   : > { %9315 = vmatpush3.xpose.msk.msra.mxu1 %vm2831_vm2, %v4880_v6  ;;  %v9788_v6 = vpack.c.bf16 %v2733_v20, %v2732_v18  ;;  %v8401_v20 = vld [vmem:[%s12227_s20] ss:$0 sm:$0xff] }
0x13eb   : > { %9787 = vmatprep.subr.bf16.mxu1 %v10495_v7 }
0x13ed   : > { %9317 = vmatmul.mubr.msk.f32.vlgmr.msra.gmra.mrb[86].mxu1 %vm2831_vm2, %v4866_v52 }
0x13ee   : > { %9368 = vmatprep.mubr.msk.f32.mxu1 %vm10496_vm1, %v10497_v12  ;;  %9789 = vmatpush3.bf16.msra.mxu1 %v9788_v6  ;;  %v8402_v6 = vld [vmem:[%s12228_s21] ss:$0 sm:$0xff] }
0x13ef   : > { %9790 = vmatprep.subr.bf16.mxu1 %v10495_v7 }
0x14a4   : > { %v4860_v21 = vpop.f32.mrb[84].mxu1 }
0x14a5   : > { %v4864_v9 = vadd.f32 %v4860_v21, %v11535_v17  ;;  %v9301_v23 = vpop.f32.mrb[85].mxu1  ;;  %v2735_v21 = vld [vmem:[%s12225_s18 + $0x18] sm:$0xff] }
0x14a6   : > { %v2736_v23 = vld [vmem:[%s12225_s18 + $0x20] sm:$0xff] }
0x14c0   : > { %v4963_v33 = vpop.f32.mrb[86].mxu1 }
0x14c1   : > { %v9318_v34 = vpop.f32.mrb[87].mxu1  ;;  %v4967_v35 = vsel %vm4121_vm5, %v4963_v33, -inf }
0x14c2   : > { %4968 = vmax.xlane.f32.xlu1 %v4967_v35 }
0x14d3   : > { %10085 = vrot.lane.b32.xlu1 %v11416_v56, %s12285_s26 }
0x14d7   : > { %10090 = vrot.lane.b32.xlu1 %v11423_v1, %s12285_s26 }
0x154f   : > { %v4969_v36 = vpop.xlane.xlu1 %4968 }
0x1550   : > { %v4970_v19 = vsub.f32 %v4963_v33, %v4969_v36  ;;  %v2737_v33 = vld [vmem:[%s12225_s18 + $0x28] sm:$0xff] }
0x1551   : > { %v9794_v34 = vpack.c.bf16 %v2737_v33, %v2736_v23 }
0x1552   : > { %v4971_v40 = vmul.f32 1.442695, %v4970_v19 }
0x1553   : > { %v10086_v41 = vpop.permute.xlu1 %10085 }
0x1554   : > { %10385 = vpow2.f32 %v4971_v40  ;;  %v10088_v42 = vunpack.i.h.bf16 %v10086_v41  ;;  %v10087_v13 = vunpack.i.l.bf16 %v10086_v41  ;;  %v8395_v41 = vld [vmem:[%s12221_s14] ss:$0 sm:$0xff] }
0x1556   : > { %v9776_v17 = vpack.c.bf16 %v10088_v42, %v10087_v13  ;;  %v8396_v13 = vld [vmem:[%s12222_s15] ss:$0 sm:$0xff] }
0x1557   : > { %v10091_v46 = vpop.permute.xlu1 %10090 }
0x1558   : > { %v10093_v28 = vunpack.i.h.bf16 %v10091_v46  ;;  %v10092_v37 = vunpack.i.l.bf16 %v10091_v46  ;;  %9777 = vmatpush3.bf16.msra.mxu0 %v9776_v17 }
0x1559   : > { %9778 = vmatprep.subr.bf16.mxu0 %v10495_v7 }
0x155a   : > { %v9779_v48 = vpack.c.bf16 %v10093_v28, %v10092_v37  ;;  %v2738_v28 = vld [vmem:[%s12225_s18 + $0x30] sm:$0xff]  ;;  %v2739_v37 = vld [vmem:[%s12225_s18 + $0x38] sm:$0xff] }
0x155c   : > { %9780 = vmatpush3.bf16.msra.mxu0 %v9779_v48  ;;  %v9797_v48 = vpack.c.bf16 %v2739_v37, %v2738_v28 }
0x155d   : > { %9331 = vmatprep.subr.mxu0 %v10497_v12 }
0x155e   : > { %v10386_v56 = vpop.eup %10385 }
0x155f   : > { %v4973_v1 = vsel %vm4121_vm5, %v10386_v56, 0.0 }
0x1560   : > { %4974 = vadd.xlane.f32.xlu0 %v4973_v1 }
0x1576   : > { %4990 = vrot.lane.b32.xlu0 %v11429_v29, %s12285_s26 }
0x15ed   : > { %v4975_v50 = vpop.xlane.xlu0 %4974 }
0x15ee   : > { %10387 = vrcp.f32 %v4975_v50 }
0x15f1   : > { %v4991_v51 = vpop.permute.xlu0 %4990 }
0x15f2   : > { %9332 = vmatpush3.msk.msra.mxu0 %vm4156_vm6, %v4991_v51 }
0x15f3   : > { %9336 = vmatprep.subr.mxu0 %v10497_v12 }
0x15f8   : > { %v10388_v52 = vpop.eup %10387 }
0x15f9   : > { %v4977_v53 = vmul.f32 %v10388_v52, %v10386_v56  ;;  %v8397_v56 = vld [vmem:[%s12224_s17] ss:$0 sm:$0xff] }
0x15fb   : > { %9334 = vmatmul.mubr.msk.f32.vlgmr.msra.gmra.mrb[102].mxu0 %vm4121_vm5, %v4977_v53  ;;  %v8399_v53 = vld [vmem:[%s12226_s19] ss:$0 sm:$0xff] }
0x15fc   : > { %9338 = vmatprep.mubr.msk.f32.mxu0 %vm10496_vm1, %v10497_v12  ;;  %9337 = vmatpush3.msra.mxu0 %v2713_v24 }
0x15fd   : > { %9781 = vmatprep.subr.bf16.mxu0 %v10495_v7 }
0x16ce   : > { %v5069_v29 = vpop.f32.mrb[102].mxu0 }
0x16cf   : > { %v9335_v27 = vpop.f32.mrb[103].mxu0  ;;  %9339 = vmatmul.mubr.msk.f32.vlgmr.msra.gmra.mrb[104].mxu0 %vm2831_vm2, %v5069_v29 }
0x16d0   : > { %9349 = vmatprep.mubr.msk.f32.mxu0 %vm10496_vm1, %v10497_v12  ;;  %9783 = vmatpush3.bf16.msra.mxu0 %v9782_v16  ;;  %v9803_v16 = vpack.c.bf16 %v2689_v15, %v2688_v55 }
0x16d1   : > { %9784 = vmatprep.subr.bf16.mxu0 %v10495_v7 }
0x17a2   : > { %v5142_v57 = vpop.f32.mrb[104].mxu0 }
0x17a3   : > { %v5146_v45 = vadd.f32 %v5142_v57, %v4864_v9  ;;  %v9340_v59 = vpop.f32.mrb[105].mxu0  ;;  %v9791_v9 = vpack.c.bf16 %v2735_v21, %v2734_v0 }
0x17a5   : > { %v5147_v61 = vadd.f32 %v5146_v45, %v11397_v44  ;;  %v2724_v44 = vld [vmem:[%s12223_s16 + $0x10] sm:$0xff]  ;;  %9792 = vmatpush3.bf16.msra.mxu1 %v9791_v9 }
0x17a6   : > { %v9785_v63 = vpack.c.bf16 %v2725_v60, %v2724_v44  ;;  %9793 = vmatprep.subr.bf16.mxu1 %v10495_v7 }
0x17a7   : > { %v5148_v62 = vsel %vm2653_vm0, %v5147_v61, 0.0 }
0x17a8   : > { %5149 = vadd.xlane.f32.xlu1 %v5148_v62  ;;  %9786 = vmatpush3.bf16.msra.mxu0 %v9785_v63 }
0x17a9   : > { %9799 = vmatprep.subr.bf16.mxu0 %v10495_v7  ;;  %9795 = vmatpush3.bf16.msra.mxu1 %v9794_v34 }
0x17aa   : > { %9796 = vmatprep.subr.bf16.mxu1 %v10495_v7 }
0x17ad   : > { %9798 = vmatpush3.bf16.msra.mxu1 %v9797_v48 }
0x17ae   : > { %9387 = vmatprep.subr.mxu1 %v10497_v12 }
0x1835   : > { %v5150_v10 = vpop.xlane.xlu1 %5149 }
0x1836   : > { %v5151_v54 = vmul.f32 0.03125, %v5150_v10 }
0x1838   : > { %v5152_v3 = vsub.f32 %v5147_v61, %v5151_v54 }
0x183a   : > { %v5153_v4 = vmul.f32 %v5152_v3, %v5152_v3 }
0x183c   : > { %v5154_v5 = vsel %vm2653_vm0, %v5153_v4, 0.0  ;;  %v2687_v4 = vld [vmem:[%s12215_s8 + $0x28] sm:$0xff] }
0x183d   : > { %5155 = vadd.xlane.f32.xlu0 %v5154_v5 }
0x18ca   : > { %v5156_v35 = vpop.xlane.xlu0 %5155 }
0x18cb   : > { %v5157_v36 = vmul.f32 0.03125, %v5156_v35 }
0x18cd   : > { %v5158_v19 = vadd.f32 1e-06, %v5157_v36 }
0x18cf   : > { %10389 = vrsqrt.f32 %v5158_v19 }
0x18d9   : > { %v10390_v40 = vpop.eup %10389 }
0x18da   : > { %v5160_v42 = vmul.f32 %v10390_v40, %v5152_v3  ;;  %v2686_v3 = vld [vmem:[%s12215_s8 + $0x20] sm:$0xff] }
0x18db   : > { %v9800_v5 = vpack.c.bf16 %v2687_v4, %v2686_v3 }
0x18dc   : > { %v5167_v17 = vmul.f32 %v8395_v41, %v5160_v42 }
0x18de   : > { %v5174_v46 = vadd.f32 %v8396_v13, %v5167_v17 }
0x18e0   : > { %9350 = vmatmul.mubr.msk.f32.vlgmr.msra.gmra.mrb[106].mxu0 %vm2653_vm0, %v5174_v46 }
0x18e1   : > { %9379 = vmatprep.mubr.msk.f32.mxu0 %vm10496_vm1, %v10497_v12  ;;  %9801 = vmatpush3.bf16.msra.mxu0 %v9800_v5  ;;  %v2694_v5 = vld [vmem:[%s12216_s9 + $0x20] sm:$0xff] }
0x18e2   : > { %9802 = vmatprep.subr.bf16.mxu0 %v10495_v7 }
0x18e5   : > { %9804 = vmatpush3.bf16.msra.mxu0 %v9803_v16 }
0x18e6   : > { %9382 = vmatprep.subr.mxu0 %v10497_v12 }
0x19b3   : > { %v5250_v1 = vpop.f32.mrb[106].mxu0 }
0x19b4   : > { %v5251_v50 = vadd.f32 %v8397_v56, %v5250_v1  ;;  %v9351_v51 = vpop.f32.mrb[107].mxu0 }
0x19b6   : > { %v5254_v52 = vmax.f32 %v5251_v50, 0.0 }
0x19b8   : > { %9369 = vmatmul.mubr.msk.f32.vlgmr.msra.gmra.mrb[88].mxu1 %vm5261_vm7, %v5254_v52 }
0x19b9   : > { %9389 = vmatprep.mubr.msk.f32.mxu1 %vm10496_vm1, %v10497_v12 }
0x1a8b   : > { %v5331_v24 = vpop.f32.mrb[88].mxu1 }
0x1a8c   : > { %v5332_v29 = vadd.f32 %v8399_v53, %v5331_v24  ;;  %v9370_v27 = vpop.f32.mrb[89].mxu1 }
0x1a8e   : > { %v5335_v57 = vadd.f32 %v5332_v29, %v5174_v46 }
0x1a90   : > { %v5336_v45 = vsel %vm2653_vm0, %v5335_v57, 0.0 }
0x1a91   : > { %5337 = vadd.xlane.f32.xlu0 %v5336_v45  ;;  %v2695_v45 = vld [vmem:[%s12216_s9 + $0x28] sm:$0xff] }
0x1b1e   : > { %v5338_v59 = vpop.xlane.xlu0 %5337 }
0x1b1f   : > { %v5339_v61 = vmul.f32 0.03125, %v5338_v59 }
0x1b21   : > { %v5340_v62 = vsub.f32 %v5335_v57, %v5339_v61 }
0x1b23   : > { %v5341_v10 = vmul.f32 %v5340_v62, %v5340_v62 }
0x1b25   : > { %v5342_v54 = vsel %vm2653_vm0, %v5341_v10, 0.0 }
0x1b26   : > { %5343 = vadd.xlane.f32.xlu1 %v5342_v54 }
0x1bb3   : > { %v5344_v44 = vpop.xlane.xlu1 %5343 }
0x1bb4   : > { %v5345_v60 = vmul.f32 0.03125, %v5344_v44 }
0x1bb6   : > { %v5346_v63 = vadd.f32 1e-06, %v5345_v60 }
0x1bb8   : > { %10391 = vrsqrt.f32 %v5346_v63 }
0x1bc2   : > { %v10392_v18 = vpop.eup %10391 }
0x1bc3   : > { %v5348_v0 = vmul.f32 %v10392_v18, %v5340_v62 }
0x1bc5   : > { %v5355_v21 = vmul.f32 %v8401_v20, %v5348_v0 }
0x1bc7   : > { %v11695_v9 = vadd.f32 %v8402_v6, %v5355_v21 }
0x1bc9   : > { %9380 = vmatmul.mubr.msk.f32.vlgmr.msra.gmra.mrb[108].mxu0 %vm2653_vm0, %v11695_v9 }
0x1bca   : > { %9384 = vmatprep.mubr.msk.f32.mxu0 %vm10496_vm1, %v10497_v12 }
0x1c9c   : > { %v11701_v23 = vpop.f32.mrb[108].mxu0 }
0x1c9d   : > { %5605 = vrot.lane.b32.xlu1 %v11701_v23, %s12254_s24  ;;  %5438 = vrot.lane.b32.xlu0 %v11701_v23, %s10498_s2  ;;  %v9381_v33 = vpop.f32.mrb[109].mxu0  ;;  %v11708_v34 = vmul.f32 0.35355338, %v11701_v23 }
0x1ca1   : > { %5603 = vrot.lane.b32.xlu1 %v11708_v34, %s10499_s6 }
0x1d0f   : > { %v5439_v35 = vpop.permute.xlu0 %5438  ;;  %v5606_v36 = vpop.permute.xlu1 %5605 }
0x1d10   : > { %9383 = vmatpush3.xpose.msk.msra.mxu0 %vm2831_vm2, %v5439_v35 }
0x1d11   : > { %9392 = vmatprep.subr.mxu0 %v10497_v12 }
0x1d13   : > { %9385 = vmatmul.mubr.msk.f32.vlgmr.msra.gmra.mrb[110].mxu0 %vm2831_vm2, %v11708_v34  ;;  %v5604_v19 = vpop.permute.xlu1 %5603 }
0x1d14   : > { %9393 = vmatpush3.xpose.msk.msra.mxu0 %vm2831_vm2, %v5606_v36  ;;  %9394 = vmatprep.mubr.msk.f32.mxu0 %vm10496_vm1, %v10497_v12 }
0x1d15   : > { %9402 = vmatprep.subr.mxu0 %v10497_v12 }
0x1d17   : > { %9395 = vmatmul.mubr.msk.f32.vlgmr.msra.gmra.mrb[112].mxu0 %vm2831_vm2, %v5604_v19 }
0x1d18   : > { %9404 = vmatprep.mubr.msk.f32.mxu0 %vm10496_vm1, %v10497_v12  ;;  %9403 = vmatpush3.msra.mxu0 %v2695_v45 }
0x1d19   : > { %9412 = vmatprep.subr.mxu0 %v10497_v12 }
0x1de6   : > { %v5511_v40 = vpop.f32.mrb[110].mxu0 }
0x1de7   : > { %v5515_v41 = vsel %vm2907_vm3, -1e+09, %v5511_v40  ;;  %v9386_v42 = vpop.f32.mrb[111].mxu0 }
0x1de8   : > { %v5516_v13 = vsel %vm2831_vm2, %v5515_v41, -inf }
0x1de9   : > { %5517 = vmax.xlane.f32.xlu0 %v5516_v13 }
0x1dea   : > { %v5677_v17 = vpop.f32.mrb[112].mxu0 }
0x1deb   : > { %v5681_v46 = vsel %vm2907_vm3, -1e+09, %v5677_v17  ;;  %v9396_v28 = vpop.f32.mrb[113].mxu0 }
0x1dec   : > { %v5682_v37 = vsel %vm2831_vm2, %v5681_v46, -inf }
0x1ded   : > { %5683 = vmax.xlane.f32.xlu1 %v5682_v37 }
0x1dfe   : > { %5527 = vrot.lane.b32.xlu1 %v11701_v23, %s12286_s29  ;;  %s727_s29 = sand.u32 1, %s10485_s30  }
0x1e02   : > { %5917 = vrot.lane.b32.xlu1 %v11701_v23, %s12287_s23 }
0x1e06   : > { %5915 = vrot.lane.b32.xlu1 %v11708_v34, %s12288_s25 }
0x1e76   : > { %v5518_v48 = vpop.xlane.xlu0 %5517 }
0x1e77   : > { %v5519_v56 = vsub.f32 %v5515_v41, %v5518_v48 }
0x1e79   : > { %v5520_v1 = vmul.f32 1.442695, %v5519_v56 }
0x1e7a   : > { %v5684_v50 = vpop.xlane.xlu1 %5683 }
0x1e7b   : > { %10393 = vpow2.f32 %v5520_v1  ;;  %v5685_v51 = vsub.f32 %v5681_v46, %v5684_v50  ;;  %v2696_v1 = vld [vmem:[%s12216_s9 + $0x30] sm:$0xff] }
0x1e7d   : > { %v5686_v52 = vmul.f32 1.442695, %v5685_v51 }
0x1e7e   : > { %v5528_v53 = vpop.permute.xlu1 %5527 }
0x1e7f   : > { %10395 = vpow2.f32 %v5686_v52  ;;  %9388 = vmatpush3.msra.mxu1 %v5528_v53 }
0x1e80   : > { %9397 = vmatprep.subr.mxu1 %v10497_v12 }
0x1e82   : > { %v5918_v16 = vpop.permute.xlu1 %5917 }
0x1e85   : > { %v10394_v24 = vpop.eup %10393 }
0x1e86   : > { %v5522_v29 = vsel %vm2831_vm2, %v10394_v24, 0.0  ;;  %v5916_v63 = vpop.permute.xlu1 %5915 }
0x1e87   : > { %5523 = vadd.xlane.f32.xlu0 %v5522_v29 }
0x1e89   : > { %v10396_v27 = vpop.eup %10395 }
0x1e8a   : > { %v5688_v57 = vsel %vm2831_vm2, %v10396_v27, 0.0 }
0x1e8b   : > { %5689 = vadd.xlane.f32.xlu0 %v5688_v57 }
0x1ea1   : > { %5693 = vrot.lane.b32.xlu0 %v11701_v23, %s12289_s5 }
0x1f14   : > { %v5524_v59 = vpop.xlane.xlu0 %5523 }
0x1f15   : > { %10397 = vrcp.f32 %v5524_v59 }
0x1f18   : > { %v5690_v61 = vpop.xlane.xlu0 %5689 }
0x1f19   : > { %10399 = vrcp.f32 %v5690_v61 }
0x1f1c   : > { %v5694_v54 = vpop.permute.xlu0 %5693 }
0x1f1f   : > { %v10398_v62 = vpop.eup %10397 }
0x1f20   : > { %v5526_v10 = vmul.f32 %v10398_v62, %v10394_v24 }
0x1f22   : > { %9390 = vmatmul.mubr.msk.f32.vlgmr.msra.gmra.mrb[90].mxu1 %vm2831_vm2, %v5526_v10 }
0x1f23   : > { %v10400_v3 = vpop.eup %10399  ;;  %9398 = vmatpush3.msra.mxu1 %v5694_v54  ;;  %9399 = vmatprep.mubr.msk.f32.mxu1 %vm10496_vm1, %v10497_v12 }
0x1f24   : > { %v5692_v4 = vmul.f32 %v10400_v3, %v10396_v27  ;;  %9407 = vmatprep.subr.mxu1 %v10497_v12 }
0x1f26   : > { %9400 = vmatmul.mubr.msk.f32.vlgmr.msra.gmra.mrb[92].mxu1 %vm2831_vm2, %v5692_v4 }
0x1f27   : > { %9409 = vmatprep.mubr.msk.f32.mxu1 %vm10496_vm1, %v10497_v12  ;;  %9408 = vmatpush3.msra.mxu1 %v2694_v5 }
0x1f28   : > { %9417 = vmatprep.subr.mxu1 %v10497_v12 }
0x1ff5   : > { %v5599_v55 = vpop.f32.mrb[90].mxu1 }
0x1ff6   : > { %v9391_v15 = vpop.f32.mrb[91].mxu1  ;;  %9410 = vmatmul.mubr.msk.f32.vlgmr.msra.gmra.mrb[94].mxu1 %vm2831_vm2, %v5599_v55 }
0x1ff7   : > { %9419 = vmatprep.mubr.msk.f32.mxu1 %vm10496_vm1, %v10497_v12 }
0x1ff9   : > { %v5765_v44 = vpop.f32.mrb[92].mxu1 }
0x1ffa   : > { %v9401_v60 = vpop.f32.mrb[93].mxu1  ;;  %9405 = vmatmul.mubr.msk.f32.vlgmr.msra.gmra.mrb[114].mxu0 %vm2831_vm2, %v5765_v44  ;;  %v2707_v44 = vld [vmem:[%s12219_s12 + $0x28] sm:$0xff] }
0x1ffb   : > { %9413 = vmatpush3.xpose.msk.msra.mxu0 %vm2831_vm2, %v5918_v16  ;;  %9414 = vmatprep.mubr.msk.f32.mxu0 %vm10496_vm1, %v10497_v12  ;;  %v2706_v16 = vld [vmem:[%s12219_s12 + $0x20] sm:$0xff] }
0x1ffc   : > { %9422 = vmatprep.subr.mxu0 %v10497_v12  ;;  %v10094_v60 = vpack.i.bf16 %v2707_v44, %v2706_v16 }
0x1ffe   : > { %9415 = vmatmul.mubr.msk.f32.vlgmr.msra.gmra.mrb[116].mxu0 %vm2831_vm2, %v5916_v63  ;;  %v9806_v63 = vpack.c.bf16 %v2707_v44, %v2706_v16 }
0x1fff   : > { %9424 = vmatprep.mubr.msk.f32.mxu0 %vm10496_vm1, %v10497_v12  ;;  %9423 = vmatpush3.msra.mxu0 %v2696_v1 }
0x2000   : > { %9432 = vmatprep.subr.mxu0 %v10497_v12 }
0x20c9   : > { %v5911_v18 = vpop.f32.mrb[94].mxu1 }
0x20ca   : > { %v9411_v20 = vpop.f32.mrb[95].mxu1 }
0x20cb   : > { %v2709_v20 = vld [vmem:[%s12219_s12 + $0x38] sm:$0xff] }
0x20cd   : > { %v5838_v0 = vpop.f32.mrb[114].mxu0 }
0x20ce   : > { %v5912_v6 = vadd.f32 %v5911_v18, %v5838_v0  ;;  %v9406_v21 = vpop.f32.mrb[115].mxu0  ;;  %v2708_v18 = vld [vmem:[%s12219_s12 + $0x30] sm:$0xff] }
0x20cf   : > { %v10099_v0 = vpack.i.bf16 %v2709_v20, %v2708_v18 }
0x20d1   : > { %v5989_v33 = vpop.f32.mrb[116].mxu0 }
0x20d2   : > { %v5993_v35 = vsel %vm2907_vm3, -1e+09, %v5989_v33  ;;  %v9416_v36 = vpop.f32.mrb[117].mxu0 }
0x20d3   : > { %v5994_v19 = vsel %vm2831_vm2, %v5993_v35, -inf }
0x20d4   : > { %5995 = vmax.xlane.f32.xlu0 %v5994_v19 }
0x20ea   : > { %6005 = vrot.lane.b32.xlu0 %v11701_v23, %s12290_s27 }
0x20ee   : > { %6155 = vrot.lane.b32.xlu0 %v11708_v34, %s12291_s1 }
0x2161   : > { %v5996_v40 = vpop.xlane.xlu0 %5995 }
0x2162   : > { %v5997_v41 = vsub.f32 %v5993_v35, %v5996_v40 }
0x2164   : > { %v5998_v42 = vmul.f32 1.442695, %v5997_v41 }
0x2165   : > { %v6006_v13 = vpop.permute.xlu0 %6005 }
0x2166   : > { %10401 = vpow2.f32 %v5998_v42  ;;  %9418 = vmatpush3.msra.mxu1 %v6006_v13 }
0x2167   : > { %9427 = vmatprep.subr.mxu1 %v10497_v12 }
0x2169   : > { %v6156_v56 = vpop.permute.xlu0 %6155 }
0x2170   : > { %v10402_v17 = vpop.eup %10401 }
0x2171   : > { %v6000_v46 = vsel %vm2831_vm2, %v10402_v17, 0.0 }
0x2172   : > { %6001 = vadd.xlane.f32.xlu1 %v6000_v46 }
0x2183   : > { %6157 = vrot.lane.b32.xlu1 %v11701_v23, %s12285_s26 }
0x21ff   : > { %v6002_v28 = vpop.xlane.xlu1 %6001 }
0x2200   : > { %10403 = vrcp.f32 %v6002_v28 }
0x2203   : > { %v6158_v34 = vpop.permute.xlu1 %6157 }
0x220a   : > { %v10404_v37 = vpop.eup %10403 }
0x220b   : > { %v6004_v48 = vmul.f32 %v10404_v37, %v10402_v17 }
0x220d   : > { %9420 = vmatmul.mubr.msk.f32.vlgmr.msra.gmra.mrb[96].mxu1 %vm2831_vm2, %v6004_v48 }
0x220e   : > { %9428 = vmatpush3.xpose.msk.msra.mxu1 %vm2831_vm2, %v6158_v34  ;;  %9429 = vmatprep.mubr.msk.f32.mxu1 %vm10496_vm1, %v10497_v12 }
0x220f   : > { %9437 = vmatprep.subr.mxu1 %v10497_v12 }
0x2211   : > { %9430 = vmatmul.mubr.msk.f32.vlgmr.msra.gmra.mrb[98].mxu1 %vm2831_vm2, %v6156_v56 }
0x2212   : > { %9439 = vmatprep.mubr.msk.f32.mxu1 %vm10496_vm1, %v10497_v12 }
0x22e0   : > { %v6077_v50 = vpop.f32.mrb[96].mxu1 }
0x22e1   : > { %v9421_v51 = vpop.f32.mrb[97].mxu1  ;;  %9425 = vmatmul.mubr.msk.f32.vlgmr.msra.gmra.mrb[118].mxu0 %vm2831_vm2, %v6077_v50 }
0x22e2   : > { %9434 = vmatprep.mubr.msk.f32.mxu0 %vm10496_vm1, %v10497_v12 }
0x22e4   : > { %v6229_v52 = vpop.f32.mrb[98].mxu1 }
0x22e5   : > { %v6233_v53 = vsel %vm2907_vm3, -1e+09, %v6229_v52  ;;  %v9431_v24 = vpop.f32.mrb[99].mxu1 }
0x22e6   : > { %v6234_v29 = vsel %vm2831_vm2, %v6233_v53, -inf }
0x22e7   : > { %6235 = vmax.xlane.f32.xlu1 %v6234_v29 }
0x2374   : > { %v6236_v27 = vpop.xlane.xlu1 %6235 }
0x2375   : > { %v6237_v57 = vsub.f32 %v6233_v53, %v6236_v27 }
0x2377   : > { %v6238_v45 = vmul.f32 1.442695, %v6237_v57 }
0x2379   : > { %10405 = vpow2.f32 %v6238_v45 }
0x2383   : > { %v10406_v59 = vpop.eup %10405 }
0x2384   : > { %v6240_v61 = vsel %vm2831_vm2, %v10406_v59, 0.0 }
0x2385   : > { %6241 = vadd.xlane.f32.xlu0 %v6240_v61 }
0x239b   : > { %6245 = vrot.lane.b32.xlu0 %v11701_v23, %s12292_s4  ;;  %v2697_v23 = vld [vmem:[%s12216_s9 + $0x38] sm:$0xff] }
0x239c   : > { %9438 = vmatpush3.msra.mxu1 %v2697_v23 }
0x239d   : > { %9811 = vmatprep.subr.bf16.mxu1 %v10495_v7 }
0x239f   : > { %10100 = vrot.lane.b32.xlu0 %v10099_v0, %s10498_s2 }
0x23b4   : > { %v6150_v62 = vpop.f32.mrb[118].mxu0 }
0x23b5   : > { %v6154_v10 = vadd.f32 %v6150_v62, %v5912_v6  ;;  %v9426_v54 = vpop.f32.mrb[119].mxu0  ;;  %v9809_v6 = vpack.c.bf16 %v2709_v20, %v2708_v18 }
0x2412   : > { %v6242_v14 = vpop.xlane.xlu0 %6241 }
0x2413   : > { %10407 = vrcp.f32 %v6242_v14 }
0x2416   : > { %v6246_v3 = vpop.permute.xlu0 %6245 }
0x2417   : > { %9433 = vmatpush3.msra.mxu0 %v6246_v3 }
0x2418   : > { %9805 = vmatprep.subr.bf16.mxu0 %v10495_v7 }
0x241a   : > { %v10101_v42 = vpop.permute.xlu0 %10100 }
0x241b   : > { %v10103_v46 = vunpack.i.h.bf16 %v10101_v42  ;;  %v10102_v48 = vunpack.i.l.bf16 %v10101_v42 }
0x241d   : > { %v10408_v4 = vpop.eup %10407 }
0x241e   : > { %v6244_v5 = vmul.f32 %v10408_v4, %v10406_v59 }
0x2420   : > { %9435 = vmatmul.mubr.msk.f32.vlgmr.msra.gmra.mrb[120].mxu0 %vm2831_vm2, %v6244_v5 }
0x2421   : > { %9450 = vmatprep.mubr.msk.f32.mxu0 %vm10496_vm1, %v10497_v12  ;;  %9807 = vmatpush3.bf16.msra.mxu0 %v9806_v63 }
0x2422   : > { %9808 = vmatprep.subr.bf16.mxu0 %v10495_v7 }
0x2425   : > { %9810 = vmatpush3.bf16.msra.mxu0 %v9809_v6 }
0x2426   : > { %9817 = vmatprep.subr.bf16.mxu0 %v10495_v7 }
0x24f3   : > { %v6317_v55 = vpop.f32.mrb[120].mxu0 }
0x24f4   : > { %v9436_v15 = vpop.f32.mrb[121].mxu0  ;;  %9440 = vmatmul.mubr.msk.f32.vlgmr.msra.gmra.mrb[100].mxu1 %vm2831_vm2, %v6317_v55 }
0x24f5   : > { %9461 = vmatprep.mubr.msk.f32.mxu1 %vm10496_vm1, %v10497_v12 }
0x25c7   : > { %v6390_v21 = vpop.f32.mrb[100].mxu1 }
0x25c8   : > { %v6394_v33 = vadd.f32 %v6390_v21, %v6154_v10  ;;  %v9441_v35 = vpop.f32.mrb[101].mxu1 }
0x25ca   : > { %v6395_v36 = vadd.f32 %v6394_v33, %v11695_v9  ;;  %v9815_v9 = vpack.c.bf16 %v10103_v46, %v10102_v48 }
0x25cc   : > { %v6396_v19 = vsel %vm2653_vm0, %v6395_v36, 0.0 }
0x25cd   : > { %6397 = vadd.xlane.f32.xlu1 %v6396_v19 }
0x25de   : > { %10095 = vrot.lane.b32.xlu1 %v10094_v60, %s10498_s2 }
0x265a   : > { %v6398_v40 = vpop.xlane.xlu1 %6397 }
0x265b   : > { %v6399_v41 = vmul.f32 0.03125, %v6398_v40 }
0x265d   : > { %v6400_v13 = vsub.f32 %v6395_v36, %v6399_v41 }
0x265e   : > { %v10096_v17 = vpop.permute.xlu1 %10095 }
0x265f   : > { %v10098_v28 = vunpack.i.h.bf16 %v10096_v17  ;;  %v10097_v37 = vunpack.i.l.bf16 %v10096_v17  ;;  %v6401_v34 = vmul.f32 %v6400_v13, %v6400_v13 }
0x2661   : > { %v9812_v56 = vpack.c.bf16 %v10098_v28, %v10097_v37  ;;  %v6402_v1 = vsel %vm2653_vm0, %v6401_v34, 0.0 }
0x2662   : > { %6403 = vadd.xlane.f32.xlu1 %v6402_v1 }
0x2663   : > { %9813 = vmatpush3.bf16.msra.mxu1 %v9812_v56 }
0x2664   : > { %9814 = vmatprep.subr.bf16.mxu1 %v10495_v7 }
0x2667   : > { %9816 = vmatpush3.bf16.msra.mxu1 %v9815_v9 }
0x2668   : > { %9829 = vmatprep.subr.bf16.mxu1 %v10495_v7 }
0x266a   : > { %9462 = vmatmul.mubr.msk.f32.vlgmr.msra.gmra.mrb[102].mxu1 %vm2653_vm0, %v2639_v22  ;;  %v8421_v22 = vld [vmem:[%s12218_s11 + $0x1] ss:$0 sm:$0xff] }
0x266b   : > { %9464 = vmatprep.mubr.msk.f32.mxu1 %vm10496_vm1, %v10497_v12 }
0x266e   : > { %9465 = vmatmul.mubr.msk.f32.gmra.mrb[104].mxu1 %vm2653_vm0, %v2640_v2 }
0x266f   : > { %9467 = vmatprep.mubr.msk.f32.mxu1 %vm10496_vm1, %v10497_v12 }
0x2672   : > { %9468 = vmatmul.mubr.msk.f32.gmra.mrb[106].mxu1 %vm2653_vm0, %v2641_v26 }
0x2673   : > { %9470 = vmatprep.mubr.msk.f32.mxu1 %vm10496_vm1, %v10497_v12 }
0x2676   : > { %9471 = vmatmul.mubr.msk.f32.gmra.mrb[108].mxu1 %vm2653_vm0, %v2642_v25 }
0x2677   : > { %9473 = vmatprep.mubr.msk.f32.mxu1 %vm10496_vm1, %v10497_v12 }
0x267a   : > { %9474 = vmatmul.mubr.msk.f32.gmra.mrb[110].mxu1 %vm2653_vm0, %v2643_v30 }
0x267b   : > { %9476 = vmatprep.mubr.msk.f32.mxu1 %vm10496_vm1, %v10497_v12 }
0x267e   : > { %9477 = vmatmul.mubr.msk.f32.gmra.mrb[112].mxu1 %vm2653_vm0, %v2644_v58 }
0x267f   : > { %9479 = vmatprep.mubr.msk.f32.mxu1 %vm10496_vm1, %v10497_v12 }
0x2682   : > { %9480 = vmatmul.mubr.msk.f32.gmra.mrb[114].mxu1 %vm2653_vm0, %v2645_v32 }
0x2683   : > { %9513 = vmatprep.mubr.msk.f32.mxu1 %vm10496_vm1, %v10497_v12 }
0x26ef   : > { %v6404_v38 = vpop.xlane.xlu1 %6403 }
0x26f0   : > { %v6405_v39 = vmul.f32 0.03125, %v6404_v38 }
0x26f2   : > { %v6406_v31 = vadd.f32 1e-06, %v6405_v39 }
0x26f4   : > { %10409 = vrsqrt.f32 %v6406_v31 }
0x26fe   : > { %v10410_v43 = vpop.eup %10409 }
0x26ff   : > { %v6408_v8 = vmul.f32 %v10410_v43, %v6400_v13 }
0x2701   : > { %v6415_v11 = vmul.f32 %v8420_v47, %v6408_v8 }
0x2703   : > { %v11871_v2 = vadd.f32 %v8421_v22, %v6415_v11 }
0x2705   : > { %9451 = vmatmul.mubr.msk.f32.vlgmr.msra.gmra.mrb[122].mxu0 %vm2653_vm0, %v11871_v2 }
0x2706   : > { %9496 = vmatprep.mubr.msk.f32.mxu0 %vm10496_vm1, %v10497_v12 }
0x273d   : > { %v6579_v26 = vpop.f32.mrb[102].mxu1 }
0x273e   : > { %v9463_v25 = vpop.f32.mrb[103].mxu1 }
0x2741   : > { %v6584_v30 = vpop.f32.mrb[104].mxu1 }
0x2742   : > { %v9466_v58 = vpop.f32.mrb[105].mxu1  ;;  %v11877_v32 = vpack.i.bf16 %v6584_v30, %v6579_v26  ;;  %v9818_v50 = vpack.c.bf16 %v6584_v30, %v6579_v26 }
0x2744   : > { %10105 = vrot.lane.b32.xlu0 %v11877_v32, %s10499_s6  ;;  %9820 = vmatpush3.bf16.xpose.msk.msra.mxu0 %vm11405_vm4, %v9818_v50 }
0x2745   : > { %v6589_v51 = vpop.f32.mrb[106].mxu1  ;;  %9821 = vmatprep.subr.bf16.mxu0 %v10495_v7 }
0x2746   : > { %v9469_v52 = vpop.f32.mrb[107].mxu1 }
0x2749   : > { %v6594_v53 = vpop.f32.mrb[108].mxu1 }
0x274a   : > { %v9472_v24 = vpop.f32.mrb[109].mxu1  ;;  %v11884_v29 = vpack.i.bf16 %v6594_v53, %v6589_v51  ;;  %v9822_v27 = vpack.c.bf16 %v6594_v53, %v6589_v51 }
0x274c   : > { %10110 = vrot.lane.b32.xlu0 %v11884_v29, %s10499_s6  ;;  %9824 = vmatpush3.bf16.xpose.msk.msra.mxu0 %vm11405_vm4, %v9822_v27 }
0x274d   : > { %v6599_v57 = vpop.f32.mrb[110].mxu1  ;;  %9825 = vmatprep.subr.bf16.mxu0 %v10495_v7 }
0x274e   : > { %v9475_v45 = vpop.f32.mrb[111].mxu1 }
0x2751   : > { %v6604_v59 = vpop.f32.mrb[112].mxu1 }
0x2752   : > { %v9478_v61 = vpop.f32.mrb[113].mxu1  ;;  %v11891_v62 = vpack.i.bf16 %v6604_v59, %v6599_v57  ;;  %v9826_v10 = vpack.c.bf16 %v6604_v59, %v6599_v57 }
0x2754   : > { %10115 = vrot.lane.b32.xlu0 %v11891_v62, %s10499_s6  ;;  %9828 = vmatpush3.bf16.xpose.msk.msra.mxu0 %vm11405_vm4, %v9826_v10 }
0x2755   : > { %v11897_v54 = vpop.f32.mrb[114].mxu1  ;;  %9494 = vmatprep.subr.mxu0 %v10497_v12 }
0x2756   : > { %v9481_v14 = vpop.f32.mrb[115].mxu1 }
0x2758   : > { %6827 = vrot.lane.b32.xlu0 %v11897_v54, %s10499_s6 }
0x275c   : > { %9495 = vmatpush3.xpose.msk.msra.mxu0 %vm2831_vm2, %v11897_v54 }
0x275d   : > { %9838 = vmatprep.subr.bf16.mxu0 %v10495_v7 }
0x27b6   : > { %v10106_v3 = vpop.permute.xlu0 %10105 }
0x27b7   : > { %v10108_v4 = vunpack.i.h.bf16 %v10106_v3  ;;  %v10107_v5 = vunpack.i.l.bf16 %v10106_v3 }
0x27b9   : > { %v9839_v16 = vpack.c.bf16 %v10108_v4, %v10107_v5 }
0x27be   : > { %v10111_v44 = vpop.permute.xlu0 %10110 }
0x27bf   : > { %v10113_v60 = vunpack.i.h.bf16 %v10111_v44  ;;  %v10112_v63 = vunpack.i.l.bf16 %v10111_v44 }
0x27c1   : > { %v9843_v18 = vpack.c.bf16 %v10113_v60, %v10112_v63 }
0x27c6   : > { %v10116_v20 = vpop.permute.xlu0 %10115 }
0x27c7   : > { %v10118_v0 = vunpack.i.h.bf16 %v10116_v20  ;;  %v10117_v6 = vunpack.i.l.bf16 %v10116_v20 }
0x27c9   : > { %v9847_v21 = vpack.c.bf16 %v10118_v0, %v10117_v6  ;;  %v2714_v6 = vld [vmem:[%s12220_s13 + $0x20] sm:$0xff] }
0x27ca   : > { %v6828_v33 = vpop.permute.xlu0 %6827 }
0x27d8   : > { %v6492_v23 = vpop.f32.mrb[122].mxu0 }
0x27d9   : > { %v11905_v55 = vmul.f32 0.35355338, %v6492_v23  ;;  %v9452_v15 = vpop.f32.mrb[123].mxu0 }
0x27db   : > { %6813 = vrot.lane.b32.xlu0 %v11905_v55, %s10499_s6  ;;  %9497 = vmatmul.mubr.msk.f32.vlgmr.msra.gmra.mrb[124].mxu0 %vm2831_vm2, %v11905_v55  ;;  %s12293_s6 = smov 88  }
0x27dc   : > { %9841 = vmatpush3.bf16.xpose.msk.msra.mxu0 %vm11405_vm4, %v9839_v16  ;;  %9530 = vmatprep.mubr.msk.f32.mxu0 %vm10496_vm1, %v10497_v12 }
0x27dd   : > { %9842 = vmatprep.subr.bf16.mxu0 %v10495_v7 }
0x27e4   : > { %9845 = vmatpush3.bf16.xpose.msk.msra.mxu0 %vm11405_vm4, %v9843_v18  ;;  %v2715_v18 = vld [vmem:[%s12220_s13 + $0x28] sm:$0xff] }
0x27e5   : > { %9846 = vmatprep.subr.bf16.mxu0 %v10495_v7 }
0x27ec   : > { %9849 = vmatpush3.bf16.xpose.msk.msra.mxu0 %vm11405_vm4, %v9847_v21 }
0x27ed   : > { %9528 = vmatprep.subr.mxu0 %v10497_v12 }
0x27f4   : > { %9529 = vmatpush3.xpose.msk.msra.mxu0 %vm2831_vm2, %v6828_v33 }
0x27f5   : > { %9871 = vmatprep.subr.bf16.mxu0 %v10495_v7 }
0x284d   : > { %v6814_v35 = vpop.permute.xlu0 %6813 }
0x284e   : > { %9531 = vmatmul.mubr.msk.f32.vlgmr.msra.gmra.mrb[126].mxu0 %vm2831_vm2, %v6814_v35 }
0x284f   : > { %9591 = vmatprep.mubr.msk.f32.mxu0 %vm10496_vm1, %v10497_v12 }
0x28ae   : > { %v6703_v36 = vpop.f32.mrb[124].mxu0 }
0x28af   : > { %v9498_v19 = vpop.f32.mrb[125].mxu0  ;;  %v6707_v40 = vsel %vm4121_vm5, %v6703_v36, -inf }
0x28b0   : > { %6708 = vmax.xlane.f32.xlu0 %v6707_v40 }
0x28c6   : > { %10125 = vrot.lane.b32.xlu0 %v11884_v29, %s10498_s2 }
0x2921   : > { %v6911_v41 = vpop.f32.mrb[126].mxu0 }
0x2922   : > { %v9532_v42 = vpop.f32.mrb[127].mxu0  ;;  %v6915_v13 = vsel %vm4121_vm5, %v6911_v41, -inf }
0x2923   : > { %6916 = vmax.xlane.f32.xlu1 %v6915_v13 }
0x2934   : > { %10120 = vrot.lane.b32.xlu1 %v11877_v32, %s10498_s2 }
0x2938   : > { %10130 = vrot.lane.b32.xlu1 %v11891_v62, %s10498_s2 }
0x293c   : > { %6730 = vrot.lane.b32.xlu1 %v11897_v54, %s10498_s2 }
0x293d   : > { %v6709_v17 = vpop.xlane.xlu0 %6708 }
0x293e   : > { %v6710_v46 = vsub.f32 %v6703_v36, %v6709_v17 }
0x2940   : > { %10135 = vrot.lane.b32.xlu1 %v11877_v32, %s12293_s6  ;;  %v6711_v28 = vmul.f32 1.442695, %v6710_v46 }
0x2941   : > { %v10126_v9 = vpop.permute.xlu0 %10125 }
0x2942   : > { %10411 = vpow2.f32 %v6711_v28  ;;  %v10128_v43 = vunpack.i.h.bf16 %v10126_v9  ;;  %v10127_v47 = vunpack.i.l.bf16 %v10126_v9 }
0x2944   : > { %10140 = vrot.lane.b32.xlu1 %v11884_v29, %s12293_s6  ;;  %v9833_v11 = vpack.c.bf16 %v10128_v43, %v10127_v47 }
0x294c   : > { %v10412_v37 = vpop.eup %10411 }
0x294d   : > { %v6713_v48 = vsel %vm4121_vm5, %v10412_v37, 0.0 }
0x2968   : > { %6714 = vadd.xlane.f32.xlu1 %v6713_v48 }
0x2979   : > { %10145 = vrot.lane.b32.xlu1 %v11891_v62, %s12293_s6 }
0x297d   : > { %10150 = vrot.lane.b32.xlu1 %v11877_v32, %s12288_s25 }
0x2981   : > { %10160 = vrot.lane.b32.xlu1 %v11891_v62, %s12288_s25 }
0x2985   : > { %7167 = vrot.lane.b32.xlu1 %v11905_v55, %s12288_s25 }
0x2989   : > { %10170 = vrot.lane.b32.xlu1 %v11884_v29, %s12287_s23 }
0x29b0   : > { %v6917_v34 = vpop.xlane.xlu1 %6916 }
0x29b1   : > { %v6918_v56 = vsub.f32 %v6911_v41, %v6917_v34 }
0x29b3   : > { %v6919_v1 = vmul.f32 1.442695, %v6918_v56 }
0x29b4   : > { %v10121_v38 = vpop.permute.xlu1 %10120 }
0x29b5   : > { %10413 = vpow2.f32 %v6919_v1  ;;  %v10123_v39 = vunpack.i.h.bf16 %v10121_v38  ;;  %v10122_v31 = vunpack.i.l.bf16 %v10121_v38 }
0x29b7   : > { %v9830_v8 = vpack.c.bf16 %v10123_v39, %v10122_v31 }
0x29b8   : > { %v10131_v22 = vpop.permute.xlu1 %10130 }
0x29b9   : > { %9831 = vmatpush3.bf16.msra.mxu1 %v9830_v8  ;;  %v10133_v26 = vunpack.i.h.bf16 %v10131_v22  ;;  %v10132_v25 = vunpack.i.l.bf16 %v10131_v22 }
0x29ba   : > { %9832 = vmatprep.subr.bf16.mxu1 %v10495_v7 }
0x29bb   : > { %v9836_v58 = vpack.c.bf16 %v10133_v26, %v10132_v25 }
0x29bc   : > { %v6731_v51 = vpop.permute.xlu1 %6730 }
0x29bd   : > { %9834 = vmatpush3.bf16.msra.mxu1 %v9833_v11 }
0x29be   : > { %9835 = vmatprep.subr.bf16.mxu1 %v10495_v7 }
0x29bf   : > { %v10414_v30 = vpop.eup %10413 }
0x29c0   : > { %v6921_v50 = vsel %vm4121_vm5, %v10414_v30, 0.0  ;;  %v10136_v52 = vpop.permute.xlu1 %10135 }
0x29c1   : > { %6922 = vadd.xlane.f32.xlu0 %v6921_v50  ;;  %9837 = vmatpush3.bf16.msra.mxu1 %v9836_v58  ;;  %v10138_v27 = vunpack.i.h.bf16 %v10136_v52  ;;  %v10137_v57 = vunpack.i.l.bf16 %v10136_v52 }
0x29c2   : > { %9511 = vmatprep.subr.mxu1 %v10497_v12 }
0x29c3   : > { %v9851_v61 = vpack.c.bf16 %v10138_v27, %v10137_v57 }
0x29c4   : > { %v10141_v53 = vpop.permute.xlu1 %10140 }
0x29c5   : > { %9512 = vmatpush3.msk.msra.mxu1 %vm4156_vm6, %v6731_v51  ;;  %v10143_v10 = vunpack.i.h.bf16 %v10141_v53  ;;  %v10142_v14 = vunpack.i.l.bf16 %v10141_v53 }
0x29c6   : > { %9850 = vmatprep.subr.bf16.mxu1 %v10495_v7 }
0x29c7   : > { %v9854_v4 = vpack.c.bf16 %v10143_v10, %v10142_v14 }
0x29d7   : > { %6938 = vrot.lane.b32.xlu0 %v11897_v54, %s12293_s6  ;;  %s8125_s6 = sshll.u32 %s727_s29, 3 }
0x29d8   : > { %s729_s2 = scalar_lea.vmem [#allocation2], %s8125_s6 }
0x29db   : > { %10155 = vrot.lane.b32.xlu0 %v11884_v29, %s12288_s25 }
0x29df   : > { %7181 = vrot.lane.b32.xlu0 %v11897_v54, %s12288_s25  ;;  %s8038_s25 = sshll.u32 %s729_s2, 4  ;;  %s12162_s25 = int_to_ptr.vmem [resolvable:$true] %s8038_s25 }
0x29e0   : > { %s10431_s24 = scalar_lea.vmem %s12162_s25, 128 }
0x29e1   : > { %p10432_p11 = scmp.ne.s32.totalorder %s12162_s25, %s10431_s24 }
0x29e3   : > { %p10433_p12 = pnand %p10432_p11, %p10668_p5 }
0x29e5   : > { %p10434_p13 = pneg %p10433_p12 }
0x29f5   : > { %v6715_v24 = vpop.xlane.xlu1 %6714 }
0x29f6   : > { %10415 = vrcp.f32 %v6715_v24 }
0x29f9   : > { %v10146_v3 = vpop.permute.xlu1 %10145 }
0x29fa   : > { %v10148_v5 = vunpack.i.h.bf16 %v10146_v3  ;;  %v10147_v23 = vunpack.i.l.bf16 %v10146_v3 }
0x29fc   : > { %v9857_v15 = vpack.c.bf16 %v10148_v5, %v10147_v23 }
0x29fd   : > { %v10151_v21 = vpop.permute.xlu1 %10150 }
0x29fe   : > { %v10153_v36 = vunpack.i.h.bf16 %v10151_v21  ;;  %v10152_v19 = vunpack.i.l.bf16 %v10151_v21 }
0x2a00   : > { %v10416_v45 = vpop.eup %10415  ;;  %v9860_v40 = vpack.c.bf16 %v10153_v36, %v10152_v19 }
0x2a01   : > { %v6717_v59 = vmul.f32 %v10416_v45, %v10412_v37  ;;  %v10161_v46 = vpop.permute.xlu1 %10160 }
0x2a02   : > { %v10163_v28 = vunpack.i.h.bf16 %v10161_v46  ;;  %v10162_v37 = vunpack.i.l.bf16 %v10161_v46 }
0x2a03   : > { %9514 = vmatmul.mubr.msk.f32.vlgmr.msra.gmra.mrb[116].mxu1 %vm4121_vm5, %v6717_v59 }
0x2a04   : > { %9852 = vmatpush3.bf16.msra.mxu1 %v9851_v61  ;;  %9547 = vmatprep.mubr.msk.f32.mxu1 %vm10496_vm1, %v10497_v12  ;;  %v9868_v48 = vpack.c.bf16 %v10163_v28, %v10162_v37 }
0x2a05   : > { %9853 = vmatprep.subr.bf16.mxu1 %v10495_v7  ;;  %v7168_v56 = vpop.permute.xlu1 %7167 }
0x2a08   : > { %9855 = vmatpush3.bf16.msra.mxu1 %v9854_v4 }
0x2a09   : > { %9856 = vmatprep.subr.bf16.mxu1 %v10495_v7  ;;  %v10171_v25 = vpop.permute.xlu1 %10170 }
0x2a0a   : > { %v10173_v51 = vunpack.i.h.bf16 %v10171_v25  ;;  %v10172_v52 = vunpack.i.l.bf16 %v10171_v25 }
0x2a0c   : > { %9858 = vmatpush3.bf16.msra.mxu1 %v9857_v15  ;;  %v9875_v27 = vpack.c.bf16 %v10173_v51, %v10172_v52 }
0x2a0d   : > { %9545 = vmatprep.subr.mxu1 %v10497_v12 }
0x2a4e   : > { %v6923_v16 = vpop.xlane.xlu0 %6922 }
0x2a4f   : > { %10417 = vrcp.f32 %v6923_v16 }
0x2a52   : > { %v6939_v44 = vpop.permute.xlu0 %6938 }
0x2a53   : > { %9546 = vmatpush3.msk.msra.mxu1 %vm4156_vm6, %v6939_v44 }
0x2a54   : > { %9550 = vmatprep.subr.mxu1 %v10497_v12 }
0x2a56   : > { %v10156_v41 = vpop.permute.xlu0 %10155 }
0x2a57   : > { %v10158_v42 = vunpack.i.h.bf16 %v10156_v41  ;;  %v10157_v13 = vunpack.i.l.bf16 %v10156_v41 }
0x2a59   : > { %v10418_v60 = vpop.eup %10417  ;;  %v9864_v17 = vpack.c.bf16 %v10158_v42, %v10157_v13 }
0x2a5a   : > { %v6925_v63 = vmul.f32 %v10418_v60, %v10414_v30  ;;  %v7182_v34 = vpop.permute.xlu0 %7181 }
0x2a5c   : > { %9548 = vmatmul.mubr.msk.f32.vlgmr.msra.gmra.mrb[118].mxu1 %vm4121_vm5, %v6925_v63  ;;  %v2716_v63 = vld [vmem:[%s12220_s13 + $0x30] sm:$0xff] }
0x2a5d   : > { %9551 = vmatpush3.msra.mxu1 %v2715_v18  ;;  %9552 = vmatprep.mubr.msk.f32.mxu1 %vm10496_vm1, %v10497_v12 }
0x2a5e   : > { %9555 = vmatprep.subr.mxu1 %v10497_v12 }
0x2ad6   : > { %v6809_v20 = vpop.f32.mrb[116].mxu1 }
0x2ad7   : > { %v9515_v0 = vpop.f32.mrb[117].mxu1 }
0x2b2f   : > { %v7017_v33 = vpop.f32.mrb[118].mxu1 }
0x2b30   : > { %v9549_v35 = vpop.f32.mrb[119].mxu1  ;;  %9553 = vmatmul.mubr.msk.f32.vlgmr.msra.gmra.mrb[120].mxu1 %vm2831_vm2, %v7017_v33 }
0x2b31   : > { %9556 = vmatpush3.msra.mxu1 %v2714_v6  ;;  %9557 = vmatprep.mubr.msk.f32.mxu1 %vm10496_vm1, %v10497_v12 }
0x2b32   : > { %9859 = vmatprep.subr.bf16.mxu1 %v10495_v7 }
0x2b34   : > { %9558 = vmatmul.mubr.msk.f32.vlgmr.msra.gmra.mrb[122].mxu1 %vm2831_vm2, %v6809_v20 }
0x2b35   : > { %9574 = vmatprep.mubr.msk.f32.mxu1 %vm10496_vm1, %v10497_v12 }
0x2b38   : > { %9862 = vmatpush3.bf16.xpose.msk.msra.mxu1 %vm11405_vm4, %v9860_v40 }
0x2b39   : > { %9863 = vmatprep.subr.bf16.mxu1 %v10495_v7 }
0x2b40   : > { %9866 = vmatpush3.bf16.xpose.msk.msra.mxu1 %vm11405_vm4, %v9864_v17 }
0x2b41   : > { %9867 = vmatprep.subr.bf16.mxu1 %v10495_v7 }
0x2b48   : > { %9870 = vmatpush3.bf16.xpose.msk.msra.mxu1 %vm11405_vm4, %v9868_v48 }
0x2b49   : > { %9572 = vmatprep.subr.mxu1 %v10497_v12 }
0x2b50   : > { %9573 = vmatpush3.xpose.msk.msra.mxu1 %vm2831_vm2, %v7182_v34 }
0x2b51   : > { %9892 = vmatprep.subr.bf16.mxu1 %v10495_v7 }
0x2b53   : > { %9575 = vmatmul.mubr.msk.f32.vlgmr.msra.gmra.mrb[124].mxu1 %vm2831_vm2, %v7168_v56 }
0x2b54   : > { %9630 = vmatprep.mubr.msk.f32.mxu1 %vm10496_vm1, %v10497_v12 }
0x2c03   : > { %v7090_v1 = vpop.f32.mrb[120].mxu1 }
0x2c04   : > { %v9554_v9 = vpop.f32.mrb[121].mxu1 }
0x2c07   : > { %v7163_v38 = vpop.f32.mrb[122].mxu1 }
0x2c08   : > { %v12003_v39 = vadd.f32 %v7163_v38, %v7090_v1  ;;  %v9559_v31 = vpop.f32.mrb[123].mxu1 }
0x2c26   : > { %v7265_v43 = vpop.f32.mrb[124].mxu1 }
0x2c27   : > { %v9576_v47 = vpop.f32.mrb[125].mxu1  ;;  %v7269_v8 = vsel %vm4121_vm5, %v7265_v43, -inf }
0x2c28   : > { %7270 = vmax.xlane.f32.xlu0 %v7269_v8 }
0x2c3e   : > { %10165 = vrot.lane.b32.xlu0 %v11877_v32, %s12287_s23 }
0x2c42   : > { %10175 = vrot.lane.b32.xlu0 %v11891_v62, %s12287_s23 }
0x2c46   : > { %10180 = vrot.lane.b32.xlu0 %v11877_v32, %s12291_s1 }
0x2c4a   : > { %10190 = vrot.lane.b32.xlu0 %v11891_v62, %s12291_s1 }
0x2c4e   : > { %7449 = vrot.lane.b32.xlu0 %v11905_v55, %s12291_s1 }
0x2c52   : > { %10195 = vrot.lane.b32.xlu0 %v11877_v32, %s12285_s26 }
0x2cb5   : > { %v7271_v22 = vpop.xlane.xlu0 %7270 }
0x2cb6   : > { %v7272_v11 = vsub.f32 %v7265_v43, %v7271_v22 }
0x2cb8   : > { %v7273_v26 = vmul.f32 1.442695, %v7272_v11 }
0x2cb9   : > { %v10166_v30 = vpop.permute.xlu0 %10165 }
0x2cba   : > { %10419 = vpow2.f32 %v7273_v26  ;;  %v10168_v58 = vunpack.i.h.bf16 %v10166_v30  ;;  %v10167_v50 = vunpack.i.l.bf16 %v10166_v30 }
0x2cbc   : > { %v9872_v53 = vpack.c.bf16 %v10168_v58, %v10167_v50  ;;  %v2717_v58 = vld [vmem:[%s12220_s13 + $0x38] sm:$0xff] }
0x2cbd   : > { %v10176_v24 = vpop.permute.xlu0 %10175 }
0x2cbe   : > { %9873 = vmatpush3.bf16.msra.mxu0 %v9872_v53  ;;  %v10178_v55 = vunpack.i.h.bf16 %v10176_v24  ;;  %v10177_v57 = vunpack.i.l.bf16 %v10176_v24 }
0x2cbf   : > { %9874 = vmatprep.subr.bf16.mxu0 %v10495_v7 }
0x2cc0   : > { %v9878_v59 = vpack.c.bf16 %v10178_v55, %v10177_v57 }
0x2cc1   : > { %v10181_v45 = vpop.permute.xlu0 %10180 }
0x2cc2   : > { %9876 = vmatpush3.bf16.msra.mxu0 %v9875_v27  ;;  %v10183_v18 = vunpack.i.h.bf16 %v10181_v45  ;;  %v10182_v20 = vunpack.i.l.bf16 %v10181_v45 }
0x2cc3   : > { %9877 = vmatprep.subr.bf16.mxu0 %v10495_v7 }
0x2cc4   : > { %v10420_v32 = vpop.eup %10419  ;;  %v9881_v0 = vpack.c.bf16 %v10183_v18, %v10182_v20  ;;  %v2745_v18 = vld [vmem:[%s12225_s18 + $0x68] sm:$0xff] }
0x2cc5   : > { %v10191_v61 = vpop.permute.xlu0 %10190  ;;  %v7275_v10 = vsel %vm4121_vm5, %v10420_v32, 0.0 }
0x2cc6   : > { %7276 = vadd.xlane.f32.xlu1 %v7275_v10  ;;  %9879 = vmatpush3.bf16.msra.mxu0 %v9878_v59  ;;  %v10193_v40 = vunpack.i.h.bf16 %v10191_v61  ;;  %v10192_v41 = vunpack.i.l.bf16 %v10191_v61  ;;  %v2726_v61 = vld [vmem:[%s12223_s16 + $0x20] sm:$0xff]  ;;  %v2727_v10 = vld [vmem:[%s12223_s16 + $0x28] sm:$0xff] }
0x2cc7   : > { %9589 = vmatprep.subr.mxu0 %v10497_v12 }
0x2cc8   : > { %v9889_v42 = vpack.c.bf16 %v10193_v40, %v10192_v41 }
0x2cc9   : > { %v7450_v14 = vpop.permute.xlu0 %7449 }
0x2ccd   : > { %v10196_v3 = vpop.permute.xlu0 %10195 }
0x2cce   : > { %v10198_v4 = vunpack.i.h.bf16 %v10196_v3  ;;  %v10197_v5 = vunpack.i.l.bf16 %v10196_v3  ;;  %v2729_v3 = vld [vmem:[%s12223_s16 + $0x38] sm:$0xff] }
0x2cd0   : > { %v9893_v23 = vpack.c.bf16 %v10198_v4, %v10197_v5  ;;  %v2740_v5 = vld [vmem:[%s12225_s18 + $0x40] sm:$0xff] }
0x2cd2   : > { %9894 = vmatpush3.bf16.msra.mxu1 %v9893_v23  ;;  %v2741_v23 = vld [vmem:[%s12225_s18 + $0x48] sm:$0xff] }
0x2cd3   : > { %9895 = vmatprep.subr.bf16.mxu1 %v10495_v7 }
0x2cd7   : > { %7292 = vrot.lane.b32.xlu1 %v11897_v54, %s12287_s23  ;;  %s12294_s23 = sld [smem:[#allocation8_spill]] }
0x2cdb   : > { %10185 = vrot.lane.b32.xlu1 %v11884_v29, %s12291_s1 }
0x2cdd   : > { %s8484_s5 = sshll.u32 %s12294_s23, 7  ;;  %s10509_s23 = smov [#allocation2]  }
0x2cde   : > { %s10435_s3 = sshll.u32 %s10509_s23, 4  ;;  %s10436_s3 = int_to_ptr.vmem [resolvable:$false] %s10435_s3 }
0x2cdf   : > { %7463 = vrot.lane.b32.xlu1 %v11897_v54, %s12291_s1  ;;  %s12167_s1 = scalar_lea.hbm %s12296_s7, %s8484_s5  ;;  %s10437_s6 = scalar_lea.vmem %s10436_s3, 256 }
0x2ce0   : > { %p10438_p0 = scmp.lt.s32.totalorder %s12162_s25, %s10436_s3  ;;  %p10439_p1 = scmp.lt.s32.totalorder %s10437_s6, %s10431_s24 }
0x2ce2   : > { %p10440_p2 = por %p10439_p1, %p10438_p0 }
0x2ce4   : > { %p10441_p3 = pnand %p10440_p2, %p10434_p13 }
0x2d53   : > { %v7277_v15 = vpop.xlane.xlu1 %7276 }
0x2d54   : > { %10421 = vrcp.f32 %v7277_v15  ;;  %v2742_v15 = vld [vmem:[%s12225_s18 + $0x50] sm:$0xff] }
0x2d57   : > { %v7293_v16 = vpop.permute.xlu1 %7292 }
0x2d58   : > { %9590 = vmatpush3.msk.msra.mxu0 %vm4156_vm6, %v7293_v16  ;;  %v9908_v16 = vpack.c.bf16 %v2741_v23, %v2740_v5 }
0x2d59   : > { %9594 = vmatprep.subr.mxu0 %v10497_v12 }
0x2d5b   : > { %v10186_v21 = vpop.permute.xlu1 %10185 }
0x2d5c   : > { %v10188_v35 = vunpack.i.h.bf16 %v10186_v21  ;;  %v10187_v36 = vunpack.i.l.bf16 %v10186_v21 }
0x2d5e   : > { %v10422_v44 = vpop.eup %10421  ;;  %v9885_v19 = vpack.c.bf16 %v10188_v35, %v10187_v36  ;;  %v8474_v35 = vld [vmem:[%s12221_s14 + $0x1] ss:$0 sm:$0xff] }
0x2d5f   : > { %v7279_v60 = vmul.f32 %v10422_v44, %v10420_v32  ;;  %v7464_v13 = vpop.permute.xlu1 %7463  ;;  %v2743_v44 = vld [vmem:[%s12225_s18 + $0x58] sm:$0xff] }
0x2d61   : > { %9592 = vmatmul.mubr.msk.f32.vlgmr.msra.gmra.mrb[128].mxu0 %vm4121_vm5, %v7279_v60  ;;  %v9911_v60 = vpack.c.bf16 %v2743_v44, %v2742_v15 }
0x2d62   : > { %9595 = vmatpush3.msra.mxu0 %v2716_v63  ;;  %9596 = vmatprep.mubr.msk.f32.mxu0 %vm10496_vm1, %v10497_v12  ;;  %v2744_v63 = vld [vmem:[%s12225_s18 + $0x60] sm:$0xff] }
0x2d63   : > { %9880 = vmatprep.subr.bf16.mxu0 %v10495_v7  ;;  %v9914_v20 = vpack.c.bf16 %v2745_v18, %v2744_v63 }
0x2e34   : > { %v7371_v6 = vpop.f32.mrb[128].mxu0 }
0x2e35   : > { %v9593_v33 = vpop.f32.mrb[129].mxu0  ;;  %9597 = vmatmul.mubr.msk.f32.vlgmr.msra.gmra.mrb[130].mxu0 %vm2831_vm2, %v7371_v6 }
0x2e36   : > { %9883 = vmatpush3.bf16.xpose.msk.msra.mxu0 %vm11405_vm4, %v9881_v0  ;;  %9613 = vmatprep.mubr.msk.f32.mxu0 %vm10496_vm1, %v10497_v12 }
0x2e37   : > { %9884 = vmatprep.subr.bf16.mxu0 %v10495_v7 }
0x2e3e   : > { %9887 = vmatpush3.bf16.xpose.msk.msra.mxu0 %vm11405_vm4, %v9885_v19  ;;  %v8475_v19 = vld [vmem:[%s12222_s15 + $0x1] ss:$0 sm:$0xff] }
0x2e3f   : > { %9888 = vmatprep.subr.bf16.mxu0 %v10495_v7 }
0x2e46   : > { %9891 = vmatpush3.bf16.xpose.msk.msra.mxu0 %vm11405_vm4, %v9889_v42  ;;  %v2746_v42 = vld [vmem:[%s12225_s18 + $0x70] sm:$0xff] }
0x2e47   : > { %9611 = vmatprep.subr.mxu0 %v10497_v12 }
0x2e4e   : > { %9612 = vmatpush3.xpose.msk.msra.mxu0 %vm2831_vm2, %v7464_v13  ;;  %v2747_v13 = vld [vmem:[%s12225_s18 + $0x78] sm:$0xff] }
0x2e4f   : > { %9907 = vmatprep.subr.bf16.mxu0 %v10495_v7 }
0x2e51   : > { %9614 = vmatmul.mubr.msk.f32.vlgmr.msra.gmra.mrb[132].mxu0 %vm2831_vm2, %v7450_v14  ;;  %v9902_v14 = vpack.c.bf16 %v2727_v10, %v2726_v61 }
0x2e52   : > { %9665 = vmatprep.mubr.msk.f32.mxu0 %vm10496_vm1, %v10497_v12  ;;  %9909 = vmatpush3.bf16.msra.mxu0 %v9908_v16 }
0x2e53   : > { %9910 = vmatprep.subr.bf16.mxu0 %v10495_v7 }
0x2e56   : > { %9912 = vmatpush3.bf16.msra.mxu0 %v9911_v60 }
0x2e57   : > { %9913 = vmatprep.subr.bf16.mxu0 %v10495_v7 }
0x2e5a   : > { %9915 = vmatpush3.bf16.msra.mxu0 %v9914_v20 }
0x2e5b   : > { %9916 = vmatprep.subr.bf16.mxu0 %v10495_v7 }
0x2f08   : > { %v7444_v17 = vpop.f32.mrb[130].mxu0 }
0x2f09   : > { %v7448_v46 = vadd.f32 %v7444_v17, %v12003_v39  ;;  %v9598_v28 = vpop.f32.mrb[131].mxu0  ;;  %v9917_v17 = vpack.c.bf16 %v2747_v13, %v2746_v42 }
0x2f0b   : > { %9918 = vmatpush3.bf16.msra.mxu0 %v9917_v17 }
0x2f24   : > { %v7547_v37 = vpop.f32.mrb[132].mxu0 }
0x2f25   : > { %v9615_v48 = vpop.f32.mrb[133].mxu0  ;;  %v7551_v49 = vsel %vm4121_vm5, %v7547_v37, -inf }
0x2f26   : > { %7552 = vmax.xlane.f32.xlu1 %v7551_v49 }
0x2f37   : > { %10200 = vrot.lane.b32.xlu1 %v11884_v29, %s12285_s26 }
0x2f3b   : > { %10205 = vrot.lane.b32.xlu1 %v11891_v62, %s12285_s26 }
0x2fb3   : > { %v7553_v34 = vpop.xlane.xlu1 %7552 }
0x2fb4   : > { %v7554_v56 = vsub.f32 %v7547_v37, %v7553_v34 }
0x2fb6   : > { %v7555_v1 = vmul.f32 1.442695, %v7554_v56 }
0x2fb7   : > { %v10201_v9 = vpop.permute.xlu1 %10200 }
0x2fb8   : > { %10423 = vpow2.f32 %v7555_v1  ;;  %v10203_v38 = vunpack.i.h.bf16 %v10201_v9  ;;  %v10202_v31 = vunpack.i.l.bf16 %v10201_v9 }
0x2fba   : > { %v9896_v39 = vpack.c.bf16 %v10203_v38, %v10202_v31 }
0x2fbb   : > { %v10206_v43 = vpop.permute.xlu1 %10205 }
0x2fbc   : > { %v10208_v47 = vunpack.i.h.bf16 %v10206_v43  ;;  %v10207_v8 = vunpack.i.l.bf16 %v10206_v43  ;;  %9897 = vmatpush3.bf16.msra.mxu1 %v9896_v39 }
0x2fbd   : > { %9898 = vmatprep.subr.bf16.mxu1 %v10495_v7 }
0x2fbe   : > { %v9899_v22 = vpack.c.bf16 %v10208_v47, %v10207_v8 }
0x2fc0   : > { %9900 = vmatpush3.bf16.msra.mxu1 %v9899_v22  ;;  %v7946_v22 = vld [vmem:[%s12229_s22] sm:$0xff] }
0x2fc1   : > { %9628 = vmatprep.subr.mxu1 %v10497_v12 }
0x2fc2   : > { %v10424_v29 = vpop.eup %10423 }
0x2fc3   : > { %v7557_v62 = vsel %vm4121_vm5, %v10424_v29, 0.0 }
0x2fc4   : > { %7558 = vadd.xlane.f32.xlu0 %v7557_v62 }
0x2fda   : > { %7574 = vrot.lane.b32.xlu0 %v11897_v54, %s12285_s26  ;;  %s8025_s26 = scalar_lea.sflag [#allocation3], %s727_s29 }
0x3051   : > { %v7559_v11 = vpop.xlane.xlu0 %7558 }
0x3052   : > { %10425 = vrcp.f32 %v7559_v11  ;;  %v7948_v11 = vld [vmem:[%s12229_s22 + $0x10] sm:$0xff] }
0x3055   : > { %v7575_v26 = vpop.permute.xlu0 %7574 }
0x3056   : > { %9629 = vmatpush3.msk.msra.mxu1 %vm4156_vm6, %v7575_v26  ;;  %v7949_v26 = vld [vmem:[%s12229_s22 + $0x18] sm:$0xff] }
0x3057   : > { %9633 = vmatprep.subr.mxu1 %v10497_v12 }
0x305c   : > { %v10426_v25 = vpop.eup %10425 }
0x305d   : > { %v7561_v30 = vmul.f32 %v10426_v25, %v10424_v29  ;;  %v7947_v29 = vld [vmem:[%s12229_s22 + $0x8] sm:$0xff]  ;;  %v9923_v25 = vpack.c.bf16 %v7949_v26, %v7948_v11 }
0x305e   : > { %v9920_v62 = vpack.c.bf16 %v7947_v29, %v7946_v22 }
0x305f   : > { %9631 = vmatmul.mubr.msk.f32.vlgmr.msra.gmra.mrb[126].mxu1 %vm4121_vm5, %v7561_v30 }
0x3060   : > { %9635 = vmatprep.mubr.msk.f32.mxu1 %vm10496_vm1, %v10497_v12  ;;  %9634 = vmatpush3.msra.mxu1 %v2717_v58 }
0x3061   : > { %9901 = vmatprep.subr.bf16.mxu1 %v10495_v7 }
0x3132   : > { %v7653_v54 = vpop.f32.mrb[126].mxu1 }
0x3133   : > { %v9632_v50 = vpop.f32.mrb[127].mxu1  ;;  %9636 = vmatmul.mubr.msk.f32.vlgmr.msra.gmra.mrb[128].mxu1 %vm2831_vm2, %v7653_v54 }
0x3134   : > { %9646 = vmatprep.mubr.msk.f32.mxu1 %vm10496_vm1, %v10497_v12  ;;  %9903 = vmatpush3.bf16.msra.mxu1 %v9902_v14 }
0x3135   : > { %9904 = vmatprep.subr.bf16.mxu1 %v10495_v7 }
0x3206   : > { %v7726_v51 = vpop.f32.mrb[128].mxu1 }
0x3207   : > { %v7730_v52 = vadd.f32 %v7726_v51, %v7448_v46  ;;  %v9637_v53 = vpop.f32.mrb[129].mxu1  ;;  %v8476_v46 = vld [vmem:[%s12224_s17 + $0x1] ss:$0 sm:$0xff] }
0x3209   : > { %v7731_v24 = vadd.f32 %v7730_v52, %v11871_v2  ;;  %v2728_v2 = vld [vmem:[%s12223_s16 + $0x30] sm:$0xff]  ;;  %v8481_v52 = vld [vmem:[%s12228_s21 + $0x1] ss:$0 sm:$0xff] }
0x320a   : > { %v9905_v4 = vpack.c.bf16 %v2729_v3, %v2728_v2 }
0x320b   : > { %v7732_v27 = vsel %vm2653_vm0, %v7731_v24, 0.0 }
0x320c   : > { %7733 = vadd.xlane.f32.xlu1 %v7732_v27  ;;  %9906 = vmatpush3.bf16.msra.mxu1 %v9905_v4 }
0x320d   : > { %9919 = vmatprep.subr.bf16.mxu1 %v10495_v7 }
0x3299   : > { %v7734_v55 = vpop.xlane.xlu1 %7733 }
0x329a   : > { %v7735_v57 = vmul.f32 0.03125, %v7734_v55 }
0x329c   : > { %v7736_v45 = vsub.f32 %v7731_v24, %v7735_v57 }
0x329e   : > { %v7737_v32 = vmul.f32 %v7736_v45, %v7736_v45 }
0x32a0   : > { %v7738_v59 = vsel %vm2653_vm0, %v7737_v32, 0.0 }
0x32a1   : > { %7739 = vadd.xlane.f32.xlu0 %v7738_v59 }
0x332e   : > { %v7740_v0 = vpop.xlane.xlu0 %7739 }
0x332f   : > { %v7741_v6 = vmul.f32 0.03125, %v7740_v0 }
0x3331   : > { %v7742_v21 = vadd.f32 1e-06, %v7741_v6 }
0x3333   : > { %10427 = vrsqrt.f32 %v7742_v21 }
0x333d   : > { %v10428_v33 = vpop.eup %10427 }
0x333e   : > { %v7744_v36 = vmul.f32 %v10428_v33, %v7736_v45 }
0x3340   : > { %v7751_v40 = vmul.f32 %v8474_v35, %v7744_v36 }
0x3342   : > { %v7758_v41 = vadd.f32 %v8475_v19, %v7751_v40 }
0x3344   : > { %9647 = vmatmul.mubr.msk.f32.vlgmr.msra.gmra.mrb[130].mxu1 %vm2653_vm0, %v7758_v41 }
0x3345   : > { %9676 = vmatprep.mubr.msk.f32.mxu1 %vm10496_vm1, %v10497_v12  ;;  %v8478_v12 = vld [vmem:[%s12226_s19 + $0x1] ss:$0 sm:$0xff]  ;;  %9921 = vmatpush3.bf16.msra.mxu1 %v9920_v62 }
0x3346   : > { %9922 = vmatprep.subr.bf16.mxu1 %v10495_v7  ;;  %v8480_v7 = vld [vmem:[%s12227_s20 + $0x1] ss:$0 sm:$0xff] }
0x3349   : > { %9924 = vmatpush3.bf16.msra.mxu1 %v9923_v25 }
0x3417   : > { %v7834_v28 = vpop.f32.mrb[130].mxu1 }
0x3418   : > { %v7835_v37 = vadd.f32 %v8476_v46, %v7834_v28  ;;  %v9648_v48 = vpop.f32.mrb[131].mxu1 }
0x341a   : > { %v7838_v49 = vmax.f32 %v7835_v37, 0.0 }
0x341c   : > { %9666 = vmatmul.mubr.msk.f32.vlgmr.msra.gmra.mrb[134].mxu0 %vm5261_vm7, %v7838_v49 }
0x34ef   : > { %v7914_v34 = vpop.f32.mrb[134].mxu0 }
0x34f0   : > { %v7915_v56 = vadd.f32 %v8478_v12, %v7914_v34  ;;  %v9667_v1 = vpop.f32.mrb[135].mxu0 }
0x34f2   : > { %v7918_v9 = vadd.f32 %v7915_v56, %v7758_v41 }
0x34f4   : > { %v7919_v38 = vsel %vm2653_vm0, %v7918_v9, 0.0 }
0x34f5   : > { %7920 = vadd.xlane.f32.xlu0 %v7919_v38 }
0x3582   : > { %v7921_v31 = vpop.xlane.xlu0 %7920 }
0x3583   : > { %v7922_v39 = vmul.f32 0.03125, %v7921_v31 }
0x3585   : > { %v7923_v43 = vsub.f32 %v7918_v9, %v7922_v39 }
0x3587   : > { %v7924_v47 = vmul.f32 %v7923_v43, %v7923_v43 }
0x3589   : > { %v7925_v8 = vsel %vm2653_vm0, %v7924_v47, 0.0 }
0x358a   : > { %7926 = vadd.xlane.f32.xlu1 %v7925_v8 }
0x3617   : > { %v7927_v30 = vpop.xlane.xlu1 %7926 }
0x3618   : > { %v7928_v58 = vmul.f32 0.03125, %v7927_v30 }
0x361a   : > { %v7929_v54 = vadd.f32 1e-06, %v7928_v58 }
0x361c   : > { %10429 = vrsqrt.f32 %v7929_v54 }
0x3626   : > { %v10430_v50 = vpop.eup %10429 }
0x3627   : > { %v7931_v51 = vmul.f32 %v10430_v50, %v7923_v43 }
0x3629   : > { %v7938_v53 = vmul.f32 %v8480_v7, %v7931_v51 }
0x362b   : > { %v7945_v24 = vadd.f32 %v8481_v52, %v7938_v53 }
0x362d   : > { %9677 = vmatmul.mubr.msk.f32.vlgmr.msra.gmra.mrb[132].mxu1 %vm2653_vm0, %v7945_v24 }
0x3700   : > { %v8019_v27 = vpop.f32.mrb[132].mxu1 }
0x3701   : > { %8023 = vst [vmem:[%s729_s2] sm:$0xff] %v8019_v27  ;;  %v9678_v55 = vpop.f32.mrb[133].mxu1 }
0x3702   : > { %10444 = shalt.err (!%p10441_p3)
}
0x3703   : > { %s10445_s29 = scalar_lea.hbm %s12167_s1, 128  ;;  %s10449_s4 = scalar_lea.hbm %s12296_s7, 256 }
0x3704   : > { %p10446_p4 = scmp.ne.s32.totalorder %s12167_s1, %s10445_s29  ;;  %p10450_p9 = scmp.lt.u32.totalorder %s12167_s1, %s12296_s7 }
0x3705   : > { %p10451_p10 = scmp.lt.u32.totalorder %s10449_s4, %s10445_s29  ;;  %p10453_p12 = scmp.lt.u32.totalorder %s10445_s29, %s12167_s1 }
0x3706   : > { %p10447_p7 = pnand %p10446_p4, %p10668_p5 }
0x3707   : > { %p10452_p11 = por %p10451_p10, %p10450_p9 }
0x3708   : > { %p10448_p8 = pneg %p10447_p7 }
0x3709   : > { %p10454_p13 = por %p10453_p12, %p10452_p11 }
0x370b   : > { %p10455_p0 = pnand %p10454_p13, %p10448_p8 }
0x370d   : > { %10458 = shalt.err (!%p10455_p0)
}
0x370e   : > { %9926 = dma.vmem_to_hbm [thread:$0]  (%p10668_p5), %s12162_s25, 128, %s12167_s1, %s8025_s26  }
0x370f PF: > { %s12297_s24 = sld [smem:[#allocation7_spill]]  ;;  %s12298_s3 = sld [smem:[#allocation5_spill]] }
0x3715   : > { %p9932_p1 = scmp.ge.s32.totalorder %s12297_s24, 2  ;;  %s8050_s2 = sand.u32 1, %s12298_s3  }
0x3716   : > { %s8051_s5 = scalar_lea.sflag [#allocation3], %s8050_s2 }
0x3717   : > { %p9929_p2 = pnand %p9932_p1, %p10672_p6 }
0x3719   : > { %10476 = dma.done.wait (!%p9929_p2), %s8051_s5, 128  }
0x371a   : > { %10478 = vsyncadd (!%p9929_p2), %s8051_s5, 4294967168  ;;  %s12300_s25 = sld [smem:[#allocation9_spill]]  ;;  %s12301_s29 = sld [smem:[#allocation6_spill]] }
0x371b   : > { %s12302_s24 = sld [smem:[#allocation10_spill]]  ;;  %s12303_s4 = smov %s10485_s30 }
0x3720   : > { %p33_p3 = scmp.ge.s32.totalorder %s12300_s25, 4   ;;  %s12304_s30 = smov %s12301_s29 }
0x3722   :  { %35 = sbr.rel (!%p33_p3) target bundleno = 13 (0xd), region = 153 }
0x3729   :  { %8056 = vsyncpa [#allocation3], 1 }
0x372a   :  { %8058 = vsyncpa [#allocation3 + $0x1], 1 }

</bundles_post_ra>
